<compile_context>
chip_gen: v7x
topology: tpu7x:2x2x1
jax: 0.10.0
libtpu: 0.0.40
codegen_flags: <defaults>
</compile_context>

<pallas_src>
import jax
import jax.numpy as jnp
from jax.experimental import pallas as pl
from jax.experimental.pallas import tpu as pltpu


# ---------------------------------------------------------------------------
# helpers (exact PyTorch padding arithmetic of up_orig.forward)
# ---------------------------------------------------------------------------

def _pad_amounts(diff):
    if diff % 2 != 0:
        return int(diff / 2), int(diff / 2) - 1
    return int(diff / 2), int(diff / 2)


def _copy_region(pad_lo, pad_hi, src_size):
    # F.pad semantics (negative pads crop): (src_start, dst_start, copy_len)
    s0 = max(0, -pad_lo)
    s1 = src_size - max(0, -pad_hi)
    return s0, s0 + pad_lo, max(s1 - s0, 0)


# ---------------------------------------------------------------------------
# fused forward pass of up_orig (single pallas_call)
# ---------------------------------------------------------------------------

@jax.jit
def up_orig_forward(x1_nchw, x2_nchw, params):
    f32 = jnp.float32
    N, C1, H1, W1 = x1_nchw.shape
    _, C2, H2, W2 = x2_nchw.shape
    wt = params["up_w"].astype(f32)            # (C1, Cup, 2, 2)
    Cup = wt.shape[1]
    c1_w = params["c1_w"].astype(f32)          # (Cout, Cup + C2, 3, 3)
    c2_w = params["c2_w"].astype(f32)          # (Cout, Cout, 3, 3)
    Cout = c1_w.shape[0]

    Hc, Wc = 2 * H1, 2 * W1                    # upsampled spatial size
    ch1, ch2 = _pad_amounts(Hc - H2)           # torch dim 2 (height)
    cw1, cw2 = _pad_amounts(Wc - W2)           # torch dim 3 (width)
    Ho1, Wo1 = Hc - 2, Wc - 2                  # after conv1 (valid 3x3)
    Ho2, Wo2 = Ho1 - 2, Wo1 - 2                # after conv2
    Hb = Hc                                    # per-sample row block height
    R = N * Hb                                 # conv GEMM row count
    cnt1 = float(N * Ho1 * Wo1)
    cnt2 = float(N * Ho2 * Wo2)
    sh0, dh0, lh = _copy_region(ch1, ch2, H2)
    sw0, dw0, lw = _copy_region(cw1, cw2, W2)

    # --- wrapper-side layout plumbing (tiny XLA glue; no compute hoisted) ---
    x1_nhwc = jnp.transpose(x1_nchw, (0, 2, 3, 1)).astype(f32)
    x2_nhwc = jnp.transpose(x2_nchw, (0, 2, 3, 1)).astype(f32)
    base = x1_nhwc.reshape(N, H1, W1 * C1)
    # row-parity expansion: slab row (n, 2i+di) holds x1[n, i] in column block di,
    # so ConvTranspose(k=2,s=2) + pixel shuffle become ONE in-kernel GEMM.
    x1p = jnp.einsum("nhk,de->nhdek", base, jnp.eye(2, dtype=f32)).reshape(R, 2 * W1 * C1)
    x2s = x2_nhwc.reshape(N * H2, W2 * C2)

    # ConvTranspose2d weight -> width-expanding GEMM operand (2*W1*C1, Wc*Cup)
    E = (jnp.arange(Wc)[None, None, :] ==
         (2 * jnp.arange(W1)[:, None, None] + jnp.arange(2)[None, :, None])).astype(f32)
    wu = jnp.einsum("jdw,cokd->kjcwo", E, wt).reshape(2 * W1 * C1, Wc * Cup)
    bup_row = jnp.tile(params["up_b"].astype(f32), Wc)[None, :]

    # 3x3 conv weights -> per-tap block-diagonal (kron) operands so the GEMM
    # contracts over channels only while slabs stay in (rows, width*chan) layout.
    def kron_taps(w_blk, Wo):
        cin = w_blk.shape[1]
        k = jnp.einsum("uv,ocij->ijucvo", jnp.eye(Wo, dtype=f32), w_blk)
        return k.reshape(9, Wo * cin, Wo * Cout)

    bd1u = kron_taps(c1_w[:, :Cup], Wo1)       # concat channels [0, Cup)   (upsample)
    bd1x = kron_taps(c1_w[:, Cup:], Wo1)       # concat channels [Cup, ...) (x2)
    bd2 = kron_taps(c2_w, Wo2)
    b1_row = jnp.tile(params["c1_b"].astype(f32), Wo1)[None, :]
    b2_row = jnp.tile(params["c2_b"].astype(f32), Wo2)[None, :]
    s1 = jnp.tile(jnp.eye(Cout, dtype=f32), (Wo1, 1))      # (Wo1*Cout, Cout) selector
    s2 = jnp.tile(jnp.eye(Cout, dtype=f32), (Wo2, 1))
    s1t, s2t = s1.T, s2.T
    g1 = params["bn1_g"].astype(f32)[None, :]
    be1 = params["bn1_b"].astype(f32)[None, :]
    g2 = params["bn2_g"].astype(f32)[None, :]
    be2 = params["bn2_b"].astype(f32)[None, :]

    def kernel(x1p_ref, x2s_ref, wu_ref, bup_ref,
               bd1u_ref, bd1x_ref, b1_ref, g1_ref, be1_ref, s1_ref, s1t_ref,
               bd2_ref, b2_ref, g2_ref, be2_ref, s2_ref, s2t_ref,
               out_ref, up_scr, x2p_scr, z1_scr):
        eps = 1e-5

        # -- ConvTranspose2d(k=2, s=2): single GEMM (pixel shuffle baked into layout)
        up = jnp.dot(x1p_ref[...], wu_ref[...], preferred_element_type=jnp.float32)
        up_scr[0:R, :] = up + bup_ref[...]
        up_scr[R:R + 2, :] = jnp.zeros((2, Wc * Cup), jnp.float32)

        # -- pad (or crop) x2 into its own channel-block slab (F.pad semantics)
        x2p_scr[...] = jnp.zeros((R + 2, Wc * C2), jnp.float32)
        for n in range(N):
            x2p_scr[n * Hb + dh0:n * Hb + dh0 + lh,
                    dw0 * C2:(dw0 + lw) * C2] = (
                x2s_ref[n * H2 + sh0:n * H2 + sh0 + lh,
                        sw0 * C2:(sw0 + lw) * C2])

        def bn_relu(y, s_ref, st_ref, g_ref, be_ref, valid_h, cnt):
            # BatchNorm2d training forward: one-sweep batch stats (sum, sum-sq)
            # over the valid rows of every sample; per-channel reduce/broadcast
            # via tiny selector GEMMs (channels are interleaved along lanes).
            colsum = jnp.zeros((1, y.shape[1]), jnp.float32)
            colsq = jnp.zeros((1, y.shape[1]), jnp.float32)
            for n in range(N):
                blk = y[n * Hb:n * Hb + valid_h, :]
                colsum = colsum + jnp.sum(blk, axis=0, keepdims=True)
                colsq = colsq + jnp.sum(blk * blk, axis=0, keepdims=True)
            mean = jnp.dot(colsum, s_ref[...], preferred_element_type=jnp.float32) / cnt
            ex2 = jnp.dot(colsq, s_ref[...], preferred_element_type=jnp.float32) / cnt
            var = jnp.maximum(ex2 - mean * mean, 0.0)
            inv = jax.lax.rsqrt(var + eps)
            scale = g_ref[...] * inv                       # (1, Cout)
            shift = be_ref[...] - mean * scale
            scale_f = jnp.dot(scale, st_ref[...], preferred_element_type=jnp.float32)
            shift_f = jnp.dot(shift, st_ref[...], preferred_element_type=jnp.float32)
            return jnp.maximum(y * scale_f + shift_f, 0.0)

        # -- conv1 (3x3 valid over concat(up, x2p)): 9 shifted block-diag GEMMs per
        #    input-channel group; the channel concat is folded into the weight split.
        y1 = jnp.zeros((R, Wo1 * Cout), jnp.float32) + b1_ref[...]
        for ti in range(3):
            for tj in range(3):
                t = ti * 3 + tj
                lu = up_scr[ti:ti + R, tj * Cup:(tj + Wo1) * Cup]
                lx = x2p_scr[ti:ti + R, tj * C2:(tj + Wo1) * C2]
                y1 = y1 + jnp.dot(lu, bd1u_ref[t], preferred_element_type=jnp.float32)
                y1 = y1 + jnp.dot(lx, bd1x_ref[t], preferred_element_type=jnp.float32)
        z1 = bn_relu(y1, s1_ref, s1t_ref, g1_ref, be1_ref, Ho1, cnt1)
        z1_scr[0:R, :] = z1
        z1_scr[R:R + 2, :] = jnp.zeros((2, Wo1 * Cout), jnp.float32)

        # -- conv2 (3x3 valid) + BN + ReLU
        y2 = jnp.zeros((R, Wo2 * Cout), jnp.float32) + b2_ref[...]
        for ti in range(3):
            for tj in range(3):
                t = ti * 3 + tj
                l2 = z1_scr[ti:ti + R, tj * Cout:(tj + Wo2) * Cout]
                y2 = y2 + jnp.dot(l2, bd2_ref[t], preferred_element_type=jnp.float32)
        z2 = bn_relu(y2, s2_ref, s2t_ref, g2_ref, be2_ref, Ho2, cnt2)

        # -- strip the per-sample pad rows; store lane-dense (Wo2*Cout-wide) rows
        for n in range(N):
            out_ref[n * Ho2:(n + 1) * Ho2, :] = z2[n * Hb:n * Hb + Ho2, :]

    vmem = pl.BlockSpec(memory_space=pltpu.MemorySpace.VMEM)
    out2d = pl.pallas_call(
        kernel,
        out_shape=jax.ShapeDtypeStruct((N * Ho2, Wo2 * Cout), jnp.float32),
        in_specs=[vmem] * 17,
        out_specs=vmem,
        scratch_shapes=[
            pltpu.VMEM((R + 2, Wc * Cup), jnp.float32),    # upsampled x1 slab (+2 pad rows)
            pltpu.VMEM((R + 2, Wc * C2), jnp.float32),     # padded x2 slab
            pltpu.VMEM((R + 2, Wo1 * Cout), jnp.float32),  # conv1 activation slab
        ],
    )(x1p, x2s, wu, bup_row,
      bd1u, bd1x, b1_row, g1, be1, s1, s1t,
      bd2, b2_row, g2, be2, s2, s2t)

    # (N*Ho2, Wo2*Cout) -> NCHW (layout plumbing only)
    return out2d.reshape(N, Ho2, Wo2, Cout).transpose(0, 3, 1, 2)


# ---------------------------------------------------------------------------
# Pure-JAX reference (independent conv path) for a sanity check
# ---------------------------------------------------------------------------

def _ref_conv3(x_nchw, w_oihw, b):
    y = jax.lax.conv_general_dilated(
        x_nchw, w_oihw, (1, 1), "VALID",
        dimension_numbers=("NCHW", "OIHW", "NCHW"))
    return y + b[None, :, None, None]


def _ref_bn_relu(y, g, b, eps=1e-5):
    mean = y.mean(axis=(0, 2, 3), keepdims=True)
    var = ((y - mean) ** 2).mean(axis=(0, 2, 3), keepdims=True)
    yn = (y - mean) * jax.lax.rsqrt(var + eps)
    yn = yn * g[None, :, None, None] + b[None, :, None, None]
    return jnp.maximum(yn, 0.0)


def ref_forward(x1, x2, p):
    N, Cin, H, W = x1.shape
    wt, bt = p["up_w"], p["up_b"]
    Cup = wt.shape[1]
    e = jnp.einsum("ncij,cokl->noikjl", x1, wt)
    up = e.reshape(N, Cup, 2 * H, 2 * W) + bt[None, :, None, None]
    ch1, ch2 = _pad_amounts(up.shape[2] - x2.shape[2])
    cw1, cw2 = _pad_amounts(up.shape[3] - x2.shape[3])
    x2p = jax.lax.pad(x2, jnp.array(0.0, x2.dtype),
                      [(0, 0, 0), (0, 0, 0), (ch1, ch2, 0), (cw1, cw2, 0)])
    x = jnp.concatenate([up, x2p], axis=1)
    y = _ref_bn_relu(_ref_conv3(x, p["c1_w"], p["c1_b"]), p["bn1_g"], p["bn1_b"])
    y = _ref_bn_relu(_ref_conv3(y, p["c2_w"], p["c2_b"]), p["bn2_g"], p["bn2_b"])
    return y


# ---------------------------------------------------------------------------
# main
# ---------------------------------------------------------------------------

if __name__ == "__main__":
    in_ch, out_ch, n_batch = 4, 8, 2

    key = jax.random.PRNGKey(0)
    keys = jax.random.split(key, 12)

    x1 = jax.random.normal(keys[0], (n_batch, in_ch, 8, 8), jnp.float32)
    x2 = jax.random.normal(keys[1], (n_batch, in_ch // 2, 14, 14), jnp.float32)

    params = {
        # ConvTranspose2d(in_ch, in_ch//2, 2, stride=2): weight (in_ch, in_ch//2, 2, 2)
        "up_w": 0.3 * jax.random.normal(keys[2], (in_ch, in_ch // 2, 2, 2), jnp.float32),
        "up_b": 0.1 * jax.random.normal(keys[3], (in_ch // 2,), jnp.float32),
        # Conv2d(in_ch, out_ch, 3): weight (out_ch, in_ch, 3, 3)
        "c1_w": 0.2 * jax.random.normal(keys[4], (out_ch, in_ch, 3, 3), jnp.float32),
        "c1_b": 0.1 * jax.random.normal(keys[5], (out_ch,), jnp.float32),
        "bn1_g": 1.0 + 0.1 * jax.random.normal(keys[6], (out_ch,), jnp.float32),
        "bn1_b": 0.1 * jax.random.normal(keys[7], (out_ch,), jnp.float32),
        # Conv2d(out_ch, out_ch, 3)
        "c2_w": 0.2 * jax.random.normal(keys[8], (out_ch, out_ch, 3, 3), jnp.float32),
        "c2_b": 0.1 * jax.random.normal(keys[9], (out_ch,), jnp.float32),
        "bn2_g": 1.0 + 0.1 * jax.random.normal(keys[10], (out_ch,), jnp.float32),
        "bn2_b": 0.1 * jax.random.normal(keys[11], (out_ch,), jnp.float32),
    }

    out = up_orig_forward(x1, x2, params)
    out = jax.block_until_ready(out)

    assert out.shape == (n_batch, out_ch, 12, 12), out.shape

    ref = jax.block_until_ready(ref_forward(x1, x2, params))
    max_err = float(jnp.max(jnp.abs(out - ref)))
    assert max_err < 1e-2, f"mismatch vs reference, max abs err = {max_err}"

    print("KERNEL_OK")
</pallas_src>

<mosaic_0001>
module attributes {stable_mosaic.version = 11 : i64} {
  func.func @kernel(%arg0: memref<32x64xf32, #tpu.memory_space<vmem>>, %arg1: memref<28x28xf32, #tpu.memory_space<vmem>>, %arg2: memref<64x32xf32, #tpu.memory_space<vmem>>, %arg3: memref<1x32xf32, #tpu.memory_space<vmem>>, %arg4: memref<9x28x112xf32, #tpu.memory_space<vmem>>, %arg5: memref<9x28x112xf32, #tpu.memory_space<vmem>>, %arg6: memref<1x112xf32, #tpu.memory_space<vmem>>, %arg7: memref<1x8xf32, #tpu.memory_space<vmem>>, %arg8: memref<1x8xf32, #tpu.memory_space<vmem>>, %arg9: memref<112x8xf32, #tpu.memory_space<vmem>>, %arg10: memref<8x112xf32, #tpu.memory_space<vmem>>, %arg11: memref<9x96x96xf32, #tpu.memory_space<vmem>>, %arg12: memref<1x96xf32, #tpu.memory_space<vmem>>, %arg13: memref<1x8xf32, #tpu.memory_space<vmem>>, %arg14: memref<1x8xf32, #tpu.memory_space<vmem>>, %arg15: memref<96x8xf32, #tpu.memory_space<vmem>>, %arg16: memref<8x96xf32, #tpu.memory_space<vmem>>, %arg17: memref<24x96xf32, #tpu.memory_space<vmem>>, %arg18: memref<34x32xf32, #tpu.memory_space<vmem>>, %arg19: memref<34x32xf32, #tpu.memory_space<vmem>>, %arg20: memref<34x112xf32, #tpu.memory_space<vmem>>) attributes {dimension_semantics = [], scalar_prefetch = 0 : i64, scratch_operands = 3 : i64, tpu.core_type = #tpu.core_type<tc>} {
    %c0 = arith.constant 0 : index
    %c0_0 = arith.constant 0 : index
    %0 = vector.load %arg0[%c0, %c0_0] : memref<32x64xf32, #tpu.memory_space<vmem>>, vector<32x64xf32>
    %c0_1 = arith.constant 0 : index
    %c0_2 = arith.constant 0 : index
    %1 = vector.load %arg2[%c0_1, %c0_2] : memref<64x32xf32, #tpu.memory_space<vmem>>, vector<64x32xf32>
    %cst = arith.constant dense<0.000000e+00> : vector<32x32xf32>
    %2 = tpu.matmul %0, %1, %cst {dimension_numbers = #tpu.dot_dimension_numbers<[1], [0], [0], [1], [0, 0, 1, 1], [], []>} : vector<32x64xf32>, vector<64x32xf32>, vector<32x32xf32> -> vector<32x32xf32>
    %c0_3 = arith.constant 0 : index
    %c0_4 = arith.constant 0 : index
    %3 = vector.load %arg3[%c0_3, %c0_4] : memref<1x32xf32, #tpu.memory_space<vmem>>, vector<1x32xf32>
    %4 = vector.broadcast %3 : vector<1x32xf32> to vector<32x32xf32>
    %5 = arith.addf %2, %4 : vector<32x32xf32>
    %c0_5 = arith.constant 0 : index
    %c0_6 = arith.constant 0 : index
    %6 = vector.load %arg18[%c0_5, %c0_6] : memref<34x32xf32, #tpu.memory_space<vmem>>, vector<32x32xf32>
    tpu.vector_store %arg18[%c0_5, %c0_6], %5 {strides = array<i32>} : memref<34x32xf32, #tpu.memory_space<vmem>>, vector<32x32xf32>,
    %cst_7 = arith.constant 0.000000e+00 : f32
    %7 = vector.broadcast %cst_7 : f32 to vector<2x32xf32>
    %c32 = arith.constant 32 : index
    %c0_8 = arith.constant 0 : index
    %8 = vector.load %arg18[%c32, %c0_8] : memref<34x32xf32, #tpu.memory_space<vmem>>, vector<2x32xf32>
    tpu.vector_store %arg18[%c32, %c0_8], %7 {strides = array<i32>} : memref<34x32xf32, #tpu.memory_space<vmem>>, vector<2x32xf32>,
    %cst_9 = arith.constant 0.000000e+00 : f32
    %9 = vector.broadcast %cst_9 : f32 to vector<34x32xf32>
    %c0_10 = arith.constant 0 : index
    %c0_11 = arith.constant 0 : index
    %10 = vector.load %arg19[%c0_10, %c0_11] : memref<34x32xf32, #tpu.memory_space<vmem>>, vector<34x32xf32>
    tpu.vector_store %arg19[%c0_10, %c0_11], %9 {strides = array<i32>} : memref<34x32xf32, #tpu.memory_space<vmem>>, vector<34x32xf32>,
    %c0_12 = arith.constant 0 : index
    %c0_13 = arith.constant 0 : index
    %11 = vector.load %arg1[%c0_12, %c0_13] : memref<28x28xf32, #tpu.memory_space<vmem>>, vector<14x28xf32>
    %c1 = arith.constant 1 : index
    %c2 = arith.constant 2 : index
    %12 = vector.load %arg19[%c1, %c2] : memref<34x32xf32, #tpu.memory_space<vmem>>, vector<14x28xf32>
    tpu.vector_store %arg19[%c1, %c2], %11 {strides = array<i32>} : memref<34x32xf32, #tpu.memory_space<vmem>>, vector<14x28xf32>,
    %c14 = arith.constant 14 : index
    %c0_14 = arith.constant 0 : index
    %13 = vector.load %arg1[%c14, %c0_14] : memref<28x28xf32, #tpu.memory_space<vmem>>, vector<14x28xf32>
    %c17 = arith.constant 17 : index
    %c2_15 = arith.constant 2 : index
    %14 = vector.load %arg19[%c17, %c2_15] : memref<34x32xf32, #tpu.memory_space<vmem>>, vector<14x28xf32>
    tpu.vector_store %arg19[%c17, %c2_15], %13 {strides = array<i32>} : memref<34x32xf32, #tpu.memory_space<vmem>>, vector<14x28xf32>,
    %cst_16 = arith.constant 0.000000e+00 : f32
    %15 = vector.broadcast %cst_16 : f32 to vector<32x112xf32>
    %c0_17 = arith.constant 0 : index
    %c0_18 = arith.constant 0 : index
    %16 = vector.load %arg6[%c0_17, %c0_18] : memref<1x112xf32, #tpu.memory_space<vmem>>, vector<1x112xf32>
    %17 = vector.broadcast %16 : vector<1x112xf32> to vector<32x112xf32>
    %18 = arith.addf %15, %17 : vector<32x112xf32>
    %c0_19 = arith.constant 0 : index
    %c0_20 = arith.constant 0 : index
    %19 = vector.load %arg18[%c0_19, %c0_20] : memref<34x32xf32, #tpu.memory_space<vmem>>, vector<32x28xf32>
    %c0_21 = arith.constant 0 : index
    %c0_22 = arith.constant 0 : index
    %20 = vector.load %arg19[%c0_21, %c0_22] : memref<34x32xf32, #tpu.memory_space<vmem>>, vector<32x28xf32>
    %c0_23 = arith.constant 0 : index
    %c0_24 = arith.constant 0 : index
    %c0_25 = arith.constant 0 : index
    %21 = vector.load %arg4[%c0_23, %c0_24, %c0_25] : memref<9x28x112xf32, #tpu.memory_space<vmem>>, vector<1x28x112xf32>
    %22 = vector.shape_cast %21 : vector<1x28x112xf32> to vector<28x112xf32>
    %cst_26 = arith.constant dense<0.000000e+00> : vector<32x112xf32>
    %23 = tpu.matmul %19, %22, %cst_26 {dimension_numbers = #tpu.dot_dimension_numbers<[1], [0], [0], [1], [0, 0, 1, 1], [], []>} : vector<32x28xf32>, vector<28x112xf32>, vector<32x112xf32> -> vector<32x112xf32>
    %24 = arith.addf %18, %23 : vector<32x112xf32>
    %c0_27 = arith.constant 0 : index
    %c0_28 = arith.constant 0 : index
    %c0_29 = arith.constant 0 : index
    %25 = vector.load %arg5[%c0_27, %c0_28, %c0_29] : memref<9x28x112xf32, #tpu.memory_space<vmem>>, vector<1x28x112xf32>
    %26 = vector.shape_cast %25 : vector<1x28x112xf32> to vector<28x112xf32>
    %cst_30 = arith.constant dense<0.000000e+00> : vector<32x112xf32>
    %27 = tpu.matmul %20, %26, %cst_30 {dimension_numbers = #tpu.dot_dimension_numbers<[1], [0], [0], [1], [0, 0, 1, 1], [], []>} : vector<32x28xf32>, vector<28x112xf32>, vector<32x112xf32> -> vector<32x112xf32>
    %28 = arith.addf %24, %27 : vector<32x112xf32>
    %c0_31 = arith.constant 0 : index
    %c2_32 = arith.constant 2 : index
    %29 = vector.load %arg18[%c0_31, %c2_32] : memref<34x32xf32, #tpu.memory_space<vmem>>, vector<32x28xf32>
    %c0_33 = arith.constant 0 : index
    %c2_34 = arith.constant 2 : index
    %30 = vector.load %arg19[%c0_33, %c2_34] : memref<34x32xf32, #tpu.memory_space<vmem>>, vector<32x28xf32>
    %c1_35 = arith.constant 1 : index
    %c0_36 = arith.constant 0 : index
    %c0_37 = arith.constant 0 : index
    %31 = vector.load %arg4[%c1_35, %c0_36, %c0_37] : memref<9x28x112xf32, #tpu.memory_space<vmem>>, vector<1x28x112xf32>
    %32 = vector.shape_cast %31 : vector<1x28x112xf32> to vector<28x112xf32>
    %cst_38 = arith.constant dense<0.000000e+00> : vector<32x112xf32>
    %33 = tpu.matmul %29, %32, %cst_38 {dimension_numbers = #tpu.dot_dimension_numbers<[1], [0], [0], [1], [0, 0, 1, 1], [], []>} : vector<32x28xf32>, vector<28x112xf32>, vector<32x112xf32> -> vector<32x112xf32>
    %34 = arith.addf %28, %33 : vector<32x112xf32>
    %c1_39 = arith.constant 1 : index
    %c0_40 = arith.constant 0 : index
    %c0_41 = arith.constant 0 : index
    %35 = vector.load %arg5[%c1_39, %c0_40, %c0_41] : memref<9x28x112xf32, #tpu.memory_space<vmem>>, vector<1x28x112xf32>
    %36 = vector.shape_cast %35 : vector<1x28x112xf32> to vector<28x112xf32>
    %cst_42 = arith.constant dense<0.000000e+00> : vector<32x112xf32>
    %37 = tpu.matmul %30, %36, %cst_42 {dimension_numbers = #tpu.dot_dimension_numbers<[1], [0], [0], [1], [0, 0, 1, 1], [], []>} : vector<32x28xf32>, vector<28x112xf32>, vector<32x112xf32> -> vector<32x112xf32>
    %38 = arith.addf %34, %37 : vector<32x112xf32>
    %c0_43 = arith.constant 0 : index
    %c4 = arith.constant 4 : index
    %39 = vector.load %arg18[%c0_43, %c4] : memref<34x32xf32, #tpu.memory_space<vmem>>, vector<32x28xf32>
    %c0_44 = arith.constant 0 : index
    %c4_45 = arith.constant 4 : index
    %40 = vector.load %arg19[%c0_44, %c4_45] : memref<34x32xf32, #tpu.memory_space<vmem>>, vector<32x28xf32>
    %c2_46 = arith.constant 2 : index
    %c0_47 = arith.constant 0 : index
    %c0_48 = arith.constant 0 : index
    %41 = vector.load %arg4[%c2_46, %c0_47, %c0_48] : memref<9x28x112xf32, #tpu.memory_space<vmem>>, vector<1x28x112xf32>
    %42 = vector.shape_cast %41 : vector<1x28x112xf32> to vector<28x112xf32>
    %cst_49 = arith.constant dense<0.000000e+00> : vector<32x112xf32>
    %43 = tpu.matmul %39, %42, %cst_49 {dimension_numbers = #tpu.dot_dimension_numbers<[1], [0], [0], [1], [0, 0, 1, 1], [], []>} : vector<32x28xf32>, vector<28x112xf32>, vector<32x112xf32> -> vector<32x112xf32>
    %44 = arith.addf %38, %43 : vector<32x112xf32>
    %c2_50 = arith.constant 2 : index
    %c0_51 = arith.constant 0 : index
    %c0_52 = arith.constant 0 : index
    %45 = vector.load %arg5[%c2_50, %c0_51, %c0_52] : memref<9x28x112xf32, #tpu.memory_space<vmem>>, vector<1x28x112xf32>
    %46 = vector.shape_cast %45 : vector<1x28x112xf32> to vector<28x112xf32>
    %cst_53 = arith.constant dense<0.000000e+00> : vector<32x112xf32>
    %47 = tpu.matmul %40, %46, %cst_53 {dimension_numbers = #tpu.dot_dimension_numbers<[1], [0], [0], [1], [0, 0, 1, 1], [], []>} : vector<32x28xf32>, vector<28x112xf32>, vector<32x112xf32> -> vector<32x112xf32>
    %48 = arith.addf %44, %47 : vector<32x112xf32>
    %c1_54 = arith.constant 1 : index
    %c0_55 = arith.constant 0 : index
    %49 = vector.load %arg18[%c1_54, %c0_55] : memref<34x32xf32, #tpu.memory_space<vmem>>, vector<32x28xf32>
    %c1_56 = arith.constant 1 : index
    %c0_57 = arith.constant 0 : index
    %50 = vector.load %arg19[%c1_56, %c0_57] : memref<34x32xf32, #tpu.memory_space<vmem>>, vector<32x28xf32>
    %c3 = arith.constant 3 : index
    %c0_58 = arith.constant 0 : index
    %c0_59 = arith.constant 0 : index
    %51 = vector.load %arg4[%c3, %c0_58, %c0_59] : memref<9x28x112xf32, #tpu.memory_space<vmem>>, vector<1x28x112xf32>
    %52 = vector.shape_cast %51 : vector<1x28x112xf32> to vector<28x112xf32>
    %cst_60 = arith.constant dense<0.000000e+00> : vector<32x112xf32>
    %53 = tpu.matmul %49, %52, %cst_60 {dimension_numbers = #tpu.dot_dimension_numbers<[1], [0], [0], [1], [0, 0, 1, 1], [], []>} : vector<32x28xf32>, vector<28x112xf32>, vector<32x112xf32> -> vector<32x112xf32>
    %54 = arith.addf %48, %53 : vector<32x112xf32>
    %c3_61 = arith.constant 3 : index
    %c0_62 = arith.constant 0 : index
    %c0_63 = arith.constant 0 : index
    %55 = vector.load %arg5[%c3_61, %c0_62, %c0_63] : memref<9x28x112xf32, #tpu.memory_space<vmem>>, vector<1x28x112xf32>
    %56 = vector.shape_cast %55 : vector<1x28x112xf32> to vector<28x112xf32>
    %cst_64 = arith.constant dense<0.000000e+00> : vector<32x112xf32>
    %57 = tpu.matmul %50, %56, %cst_64 {dimension_numbers = #tpu.dot_dimension_numbers<[1], [0], [0], [1], [0, 0, 1, 1], [], []>} : vector<32x28xf32>, vector<28x112xf32>, vector<32x112xf32> -> vector<32x112xf32>
    %58 = arith.addf %54, %57 : vector<32x112xf32>
    %c1_65 = arith.constant 1 : index
    %c2_66 = arith.constant 2 : index
    %59 = vector.load %arg18[%c1_65, %c2_66] : memref<34x32xf32, #tpu.memory_space<vmem>>, vector<32x28xf32>
    %c1_67 = arith.constant 1 : index
    %c2_68 = arith.constant 2 : index
    %60 = vector.load %arg19[%c1_67, %c2_68] : memref<34x32xf32, #tpu.memory_space<vmem>>, vector<32x28xf32>
    %c4_69 = arith.constant 4 : index
    %c0_70 = arith.constant 0 : index
    %c0_71 = arith.constant 0 : index
    %61 = vector.load %arg4[%c4_69, %c0_70, %c0_71] : memref<9x28x112xf32, #tpu.memory_space<vmem>>, vector<1x28x112xf32>
    %62 = vector.shape_cast %61 : vector<1x28x112xf32> to vector<28x112xf32>
    %cst_72 = arith.constant dense<0.000000e+00> : vector<32x112xf32>
    %63 = tpu.matmul %59, %62, %cst_72 {dimension_numbers = #tpu.dot_dimension_numbers<[1], [0], [0], [1], [0, 0, 1, 1], [], []>} : vector<32x28xf32>, vector<28x112xf32>, vector<32x112xf32> -> vector<32x112xf32>
    %64 = arith.addf %58, %63 : vector<32x112xf32>
    %c4_73 = arith.constant 4 : index
    %c0_74 = arith.constant 0 : index
    %c0_75 = arith.constant 0 : index
    %65 = vector.load %arg5[%c4_73, %c0_74, %c0_75] : memref<9x28x112xf32, #tpu.memory_space<vmem>>, vector<1x28x112xf32>
    %66 = vector.shape_cast %65 : vector<1x28x112xf32> to vector<28x112xf32>
    %cst_76 = arith.constant dense<0.000000e+00> : vector<32x112xf32>
    %67 = tpu.matmul %60, %66, %cst_76 {dimension_numbers = #tpu.dot_dimension_numbers<[1], [0], [0], [1], [0, 0, 1, 1], [], []>} : vector<32x28xf32>, vector<28x112xf32>, vector<32x112xf32> -> vector<32x112xf32>
    %68 = arith.addf %64, %67 : vector<32x112xf32>
    %c1_77 = arith.constant 1 : index
    %c4_78 = arith.constant 4 : index
    %69 = vector.load %arg18[%c1_77, %c4_78] : memref<34x32xf32, #tpu.memory_space<vmem>>, vector<32x28xf32>
    %c1_79 = arith.constant 1 : index
    %c4_80 = arith.constant 4 : index
    %70 = vector.load %arg19[%c1_79, %c4_80] : memref<34x32xf32, #tpu.memory_space<vmem>>, vector<32x28xf32>
    %c5 = arith.constant 5 : index
    %c0_81 = arith.constant 0 : index
    %c0_82 = arith.constant 0 : index
    %71 = vector.load %arg4[%c5, %c0_81, %c0_82] : memref<9x28x112xf32, #tpu.memory_space<vmem>>, vector<1x28x112xf32>
    %72 = vector.shape_cast %71 : vector<1x28x112xf32> to vector<28x112xf32>
    %cst_83 = arith.constant dense<0.000000e+00> : vector<32x112xf32>
    %73 = tpu.matmul %69, %72, %cst_83 {dimension_numbers = #tpu.dot_dimension_numbers<[1], [0], [0], [1], [0, 0, 1, 1], [], []>} : vector<32x28xf32>, vector<28x112xf32>, vector<32x112xf32> -> vector<32x112xf32>
    %74 = arith.addf %68, %73 : vector<32x112xf32>
    %c5_84 = arith.constant 5 : index
    %c0_85 = arith.constant 0 : index
    %c0_86 = arith.constant 0 : index
    %75 = vector.load %arg5[%c5_84, %c0_85, %c0_86] : memref<9x28x112xf32, #tpu.memory_space<vmem>>, vector<1x28x112xf32>
    %76 = vector.shape_cast %75 : vector<1x28x112xf32> to vector<28x112xf32>
    %cst_87 = arith.constant dense<0.000000e+00> : vector<32x112xf32>
    %77 = tpu.matmul %70, %76, %cst_87 {dimension_numbers = #tpu.dot_dimension_numbers<[1], [0], [0], [1], [0, 0, 1, 1], [], []>} : vector<32x28xf32>, vector<28x112xf32>, vector<32x112xf32> -> vector<32x112xf32>
    %78 = arith.addf %74, %77 : vector<32x112xf32>
    %c2_88 = arith.constant 2 : index
    %c0_89 = arith.constant 0 : index
    %79 = vector.load %arg18[%c2_88, %c0_89] : memref<34x32xf32, #tpu.memory_space<vmem>>, vector<32x28xf32>
    %c2_90 = arith.constant 2 : index
    %c0_91 = arith.constant 0 : index
    %80 = vector.load %arg19[%c2_90, %c0_91] : memref<34x32xf32, #tpu.memory_space<vmem>>, vector<32x28xf32>
    %c6 = arith.constant 6 : index
    %c0_92 = arith.constant 0 : index
    %c0_93 = arith.constant 0 : index
    %81 = vector.load %arg4[%c6, %c0_92, %c0_93] : memref<9x28x112xf32, #tpu.memory_space<vmem>>, vector<1x28x112xf32>
    %82 = vector.shape_cast %81 : vector<1x28x112xf32> to vector<28x112xf32>
    %cst_94 = arith.constant dense<0.000000e+00> : vector<32x112xf32>
    %83 = tpu.matmul %79, %82, %cst_94 {dimension_numbers = #tpu.dot_dimension_numbers<[1], [0], [0], [1], [0, 0, 1, 1], [], []>} : vector<32x28xf32>, vector<28x112xf32>, vector<32x112xf32> -> vector<32x112xf32>
    %84 = arith.addf %78, %83 : vector<32x112xf32>
    %c6_95 = arith.constant 6 : index
    %c0_96 = arith.constant 0 : index
    %c0_97 = arith.constant 0 : index
    %85 = vector.load %arg5[%c6_95, %c0_96, %c0_97] : memref<9x28x112xf32, #tpu.memory_space<vmem>>, vector<1x28x112xf32>
    %86 = vector.shape_cast %85 : vector<1x28x112xf32> to vector<28x112xf32>
    %cst_98 = arith.constant dense<0.000000e+00> : vector<32x112xf32>
    %87 = tpu.matmul %80, %86, %cst_98 {dimension_numbers = #tpu.dot_dimension_numbers<[1], [0], [0], [1], [0, 0, 1, 1], [], []>} : vector<32x28xf32>, vector<28x112xf32>, vector<32x112xf32> -> vector<32x112xf32>
    %88 = arith.addf %84, %87 : vector<32x112xf32>
    %c2_99 = arith.constant 2 : index
    %c2_100 = arith.constant 2 : index
    %89 = vector.load %arg18[%c2_99, %c2_100] : memref<34x32xf32, #tpu.memory_space<vmem>>, vector<32x28xf32>
    %c2_101 = arith.constant 2 : index
    %c2_102 = arith.constant 2 : index
    %90 = vector.load %arg19[%c2_101, %c2_102] : memref<34x32xf32, #tpu.memory_space<vmem>>, vector<32x28xf32>
    %c7 = arith.constant 7 : index
    %c0_103 = arith.constant 0 : index
    %c0_104 = arith.constant 0 : index
    %91 = vector.load %arg4[%c7, %c0_103, %c0_104] : memref<9x28x112xf32, #tpu.memory_space<vmem>>, vector<1x28x112xf32>
    %92 = vector.shape_cast %91 : vector<1x28x112xf32> to vector<28x112xf32>
    %cst_105 = arith.constant dense<0.000000e+00> : vector<32x112xf32>
    %93 = tpu.matmul %89, %92, %cst_105 {dimension_numbers = #tpu.dot_dimension_numbers<[1], [0], [0], [1], [0, 0, 1, 1], [], []>} : vector<32x28xf32>, vector<28x112xf32>, vector<32x112xf32> -> vector<32x112xf32>
    %94 = arith.addf %88, %93 : vector<32x112xf32>
    %c7_106 = arith.constant 7 : index
    %c0_107 = arith.constant 0 : index
    %c0_108 = arith.constant 0 : index
    %95 = vector.load %arg5[%c7_106, %c0_107, %c0_108] : memref<9x28x112xf32, #tpu.memory_space<vmem>>, vector<1x28x112xf32>
    %96 = vector.shape_cast %95 : vector<1x28x112xf32> to vector<28x112xf32>
    %cst_109 = arith.constant dense<0.000000e+00> : vector<32x112xf32>
    %97 = tpu.matmul %90, %96, %cst_109 {dimension_numbers = #tpu.dot_dimension_numbers<[1], [0], [0], [1], [0, 0, 1, 1], [], []>} : vector<32x28xf32>, vector<28x112xf32>, vector<32x112xf32> -> vector<32x112xf32>
    %98 = arith.addf %94, %97 : vector<32x112xf32>
    %c2_110 = arith.constant 2 : index
    %c4_111 = arith.constant 4 : index
    %99 = vector.load %arg18[%c2_110, %c4_111] : memref<34x32xf32, #tpu.memory_space<vmem>>, vector<32x28xf32>
    %c2_112 = arith.constant 2 : index
    %c4_113 = arith.constant 4 : index
    %100 = vector.load %arg19[%c2_112, %c4_113] : memref<34x32xf32, #tpu.memory_space<vmem>>, vector<32x28xf32>
    %c8 = arith.constant 8 : index
    %c0_114 = arith.constant 0 : index
    %c0_115 = arith.constant 0 : index
    %101 = vector.load %arg4[%c8, %c0_114, %c0_115] : memref<9x28x112xf32, #tpu.memory_space<vmem>>, vector<1x28x112xf32>
    %102 = vector.shape_cast %101 : vector<1x28x112xf32> to vector<28x112xf32>
    %cst_116 = arith.constant dense<0.000000e+00> : vector<32x112xf32>
    %103 = tpu.matmul %99, %102, %cst_116 {dimension_numbers = #tpu.dot_dimension_numbers<[1], [0], [0], [1], [0, 0, 1, 1], [], []>} : vector<32x28xf32>, vector<28x112xf32>, vector<32x112xf32> -> vector<32x112xf32>
    %104 = arith.addf %98, %103 : vector<32x112xf32>
    %c8_117 = arith.constant 8 : index
    %c0_118 = arith.constant 0 : index
    %c0_119 = arith.constant 0 : index
    %105 = vector.load %arg5[%c8_117, %c0_118, %c0_119] : memref<9x28x112xf32, #tpu.memory_space<vmem>>, vector<1x28x112xf32>
    %106 = vector.shape_cast %105 : vector<1x28x112xf32> to vector<28x112xf32>
    %cst_120 = arith.constant dense<0.000000e+00> : vector<32x112xf32>
    %107 = tpu.matmul %100, %106, %cst_120 {dimension_numbers = #tpu.dot_dimension_numbers<[1], [0], [0], [1], [0, 0, 1, 1], [], []>} : vector<32x28xf32>, vector<28x112xf32>, vector<32x112xf32> -> vector<32x112xf32>
    %108 = arith.addf %104, %107 : vector<32x112xf32>
    %cst_121 = arith.constant 0.000000e+00 : f32
    %109 = vector.broadcast %cst_121 : f32 to vector<1x112xf32>
    %cst_122 = arith.constant 0.000000e+00 : f32
    %110 = vector.broadcast %cst_122 : f32 to vector<1x112xf32>
    %111 = vector.extract_strided_slice %108 {offsets = [0, 0], sizes = [14, 112], strides = [1, 1]} : vector<32x112xf32> to vector<14x112xf32>
    %cst_123 = arith.constant dense<0.000000e+00> : vector<112xf32>
    %112 = vector.multi_reduction <add>, %111, %cst_123 [0] : vector<14x112xf32> to vector<112xf32>
    %113 = vector.shape_cast %112 : vector<112xf32> to vector<1x112xf32>
    %114 = arith.addf %109, %113 : vector<1x112xf32>
    %115 = arith.mulf %111, %111 : vector<14x112xf32>
    %cst_124 = arith.constant dense<0.000000e+00> : vector<112xf32>
    %116 = vector.multi_reduction <add>, %115, %cst_124 [0] : vector<14x112xf32> to vector<112xf32>
    %117 = vector.shape_cast %116 : vector<112xf32> to vector<1x112xf32>
    %118 = arith.addf %110, %117 : vector<1x112xf32>
    %119 = vector.extract_strided_slice %108 {offsets = [16, 0], sizes = [14, 112], strides = [1, 1]} : vector<32x112xf32> to vector<14x112xf32>
    %cst_125 = arith.constant dense<0.000000e+00> : vector<112xf32>
    %120 = vector.multi_reduction <add>, %119, %cst_125 [0] : vector<14x112xf32> to vector<112xf32>
    %121 = vector.shape_cast %120 : vector<112xf32> to vector<1x112xf32>
    %122 = arith.addf %114, %121 : vector<1x112xf32>
    %123 = arith.mulf %119, %119 : vector<14x112xf32>
    %cst_126 = arith.constant dense<0.000000e+00> : vector<112xf32>
    %124 = vector.multi_reduction <add>, %123, %cst_126 [0] : vector<14x112xf32> to vector<112xf32>
    %125 = vector.shape_cast %124 : vector<112xf32> to vector<1x112xf32>
    %126 = arith.addf %118, %125 : vector<1x112xf32>
    %c0_127 = arith.constant 0 : index
    %c0_128 = arith.constant 0 : index
    %127 = vector.load %arg9[%c0_127, %c0_128] : memref<112x8xf32, #tpu.memory_space<vmem>>, vector<112x8xf32>
    %cst_129 = arith.constant dense<0.000000e+00> : vector<1x8xf32>
    %128 = tpu.matmul %122, %127, %cst_129 {dimension_numbers = #tpu.dot_dimension_numbers<[1], [0], [0], [1], [0, 0, 1, 1], [], []>} : vector<1x112xf32>, vector<112x8xf32>, vector<1x8xf32> -> vector<1x8xf32>
    %cst_130 = arith.constant 3.920000e+02 : f32
    %129 = vector.broadcast %cst_130 : f32 to vector<1x8xf32>
    %130 = arith.divf %128, %129 : vector<1x8xf32>
    %c0_131 = arith.constant 0 : index
    %c0_132 = arith.constant 0 : index
    %131 = vector.load %arg9[%c0_131, %c0_132] : memref<112x8xf32, #tpu.memory_space<vmem>>, vector<112x8xf32>
    %cst_133 = arith.constant dense<0.000000e+00> : vector<1x8xf32>
    %132 = tpu.matmul %126, %131, %cst_133 {dimension_numbers = #tpu.dot_dimension_numbers<[1], [0], [0], [1], [0, 0, 1, 1], [], []>} : vector<1x112xf32>, vector<112x8xf32>, vector<1x8xf32> -> vector<1x8xf32>
    %cst_134 = arith.constant 3.920000e+02 : f32
    %133 = vector.broadcast %cst_134 : f32 to vector<1x8xf32>
    %134 = arith.divf %132, %133 : vector<1x8xf32>
    %135 = arith.mulf %130, %130 : vector<1x8xf32>
    %136 = arith.subf %134, %135 : vector<1x8xf32>
    %cst_135 = arith.constant 0.000000e+00 : f32
    %137 = vector.broadcast %cst_135 : f32 to vector<1x8xf32>
    %138 = arith.maximumf %136, %137 : vector<1x8xf32>
    %cst_136 = arith.constant 9.99999974E-6 : f32
    %139 = vector.broadcast %cst_136 : f32 to vector<1x8xf32>
    %140 = arith.addf %138, %139 : vector<1x8xf32>
    %141 = math.rsqrt %140 : vector<1x8xf32>
    %c0_137 = arith.constant 0 : index
    %c0_138 = arith.constant 0 : index
    %142 = vector.load %arg7[%c0_137, %c0_138] : memref<1x8xf32, #tpu.memory_space<vmem>>, vector<1x8xf32>
    %143 = arith.mulf %142, %141 : vector<1x8xf32>
    %c0_139 = arith.constant 0 : index
    %c0_140 = arith.constant 0 : index
    %144 = vector.load %arg8[%c0_139, %c0_140] : memref<1x8xf32, #tpu.memory_space<vmem>>, vector<1x8xf32>
    %145 = arith.mulf %130, %143 : vector<1x8xf32>
    %146 = arith.subf %144, %145 : vector<1x8xf32>
    %c0_141 = arith.constant 0 : index
    %c0_142 = arith.constant 0 : index
    %147 = vector.load %arg10[%c0_141, %c0_142] : memref<8x112xf32, #tpu.memory_space<vmem>>, vector<8x112xf32>
    %cst_143 = arith.constant dense<0.000000e+00> : vector<1x112xf32>
    %148 = tpu.matmul %143, %147, %cst_143 {dimension_numbers = #tpu.dot_dimension_numbers<[1], [0], [0], [1], [0, 0, 1, 1], [], []>} : vector<1x8xf32>, vector<8x112xf32>, vector<1x112xf32> -> vector<1x112xf32>
    %c0_144 = arith.constant 0 : index
    %c0_145 = arith.constant 0 : index
    %149 = vector.load %arg10[%c0_144, %c0_145] : memref<8x112xf32, #tpu.memory_space<vmem>>, vector<8x112xf32>
    %cst_146 = arith.constant dense<0.000000e+00> : vector<1x112xf32>
    %150 = tpu.matmul %146, %149, %cst_146 {dimension_numbers = #tpu.dot_dimension_numbers<[1], [0], [0], [1], [0, 0, 1, 1], [], []>} : vector<1x8xf32>, vector<8x112xf32>, vector<1x112xf32> -> vector<1x112xf32>
    %151 = vector.broadcast %148 : vector<1x112xf32> to vector<32x112xf32>
    %152 = arith.mulf %108, %151 : vector<32x112xf32>
    %153 = vector.broadcast %150 : vector<1x112xf32> to vector<32x112xf32>
    %154 = arith.addf %152, %153 : vector<32x112xf32>
    %cst_147 = arith.constant 0.000000e+00 : f32
    %155 = vector.broadcast %cst_147 : f32 to vector<32x112xf32>
    %156 = arith.maximumf %154, %155 : vector<32x112xf32>
    %c0_148 = arith.constant 0 : index
    %c0_149 = arith.constant 0 : index
    %157 = vector.load %arg20[%c0_148, %c0_149] : memref<34x112xf32, #tpu.memory_space<vmem>>, vector<32x112xf32>
    tpu.vector_store %arg20[%c0_148, %c0_149], %156 {strides = array<i32>} : memref<34x112xf32, #tpu.memory_space<vmem>>, vector<32x112xf32>,
    %cst_150 = arith.constant 0.000000e+00 : f32
    %158 = vector.broadcast %cst_150 : f32 to vector<2x112xf32>
    %c32_151 = arith.constant 32 : index
    %c0_152 = arith.constant 0 : index
    %159 = vector.load %arg20[%c32_151, %c0_152] : memref<34x112xf32, #tpu.memory_space<vmem>>, vector<2x112xf32>
    tpu.vector_store %arg20[%c32_151, %c0_152], %158 {strides = array<i32>} : memref<34x112xf32, #tpu.memory_space<vmem>>, vector<2x112xf32>,
    %cst_153 = arith.constant 0.000000e+00 : f32
    %160 = vector.broadcast %cst_153 : f32 to vector<32x96xf32>
    %c0_154 = arith.constant 0 : index
    %c0_155 = arith.constant 0 : index
    %161 = vector.load %arg12[%c0_154, %c0_155] : memref<1x96xf32, #tpu.memory_space<vmem>>, vector<1x96xf32>
    %162 = vector.broadcast %161 : vector<1x96xf32> to vector<32x96xf32>
    %163 = arith.addf %160, %162 : vector<32x96xf32>
    %c0_156 = arith.constant 0 : index
    %c0_157 = arith.constant 0 : index
    %164 = vector.load %arg20[%c0_156, %c0_157] : memref<34x112xf32, #tpu.memory_space<vmem>>, vector<32x96xf32>
    %c0_158 = arith.constant 0 : index
    %c0_159 = arith.constant 0 : index
    %c0_160 = arith.constant 0 : index
    %165 = vector.load %arg11[%c0_158, %c0_159, %c0_160] : memref<9x96x96xf32, #tpu.memory_space<vmem>>, vector<1x96x96xf32>
    %166 = vector.shape_cast %165 : vector<1x96x96xf32> to vector<96x96xf32>
    %cst_161 = arith.constant dense<0.000000e+00> : vector<32x96xf32>
    %167 = tpu.matmul %164, %166, %cst_161 {dimension_numbers = #tpu.dot_dimension_numbers<[1], [0], [0], [1], [0, 0, 1, 1], [], []>} : vector<32x96xf32>, vector<96x96xf32>, vector<32x96xf32> -> vector<32x96xf32>
    %168 = arith.addf %163, %167 : vector<32x96xf32>
    %c0_162 = arith.constant 0 : index
    %c8_163 = arith.constant 8 : index
    %169 = vector.load %arg20[%c0_162, %c8_163] : memref<34x112xf32, #tpu.memory_space<vmem>>, vector<32x96xf32>
    %c1_164 = arith.constant 1 : index
    %c0_165 = arith.constant 0 : index
    %c0_166 = arith.constant 0 : index
    %170 = vector.load %arg11[%c1_164, %c0_165, %c0_166] : memref<9x96x96xf32, #tpu.memory_space<vmem>>, vector<1x96x96xf32>
    %171 = vector.shape_cast %170 : vector<1x96x96xf32> to vector<96x96xf32>
    %cst_167 = arith.constant dense<0.000000e+00> : vector<32x96xf32>
    %172 = tpu.matmul %169, %171, %cst_167 {dimension_numbers = #tpu.dot_dimension_numbers<[1], [0], [0], [1], [0, 0, 1, 1], [], []>} : vector<32x96xf32>, vector<96x96xf32>, vector<32x96xf32> -> vector<32x96xf32>
    %173 = arith.addf %168, %172 : vector<32x96xf32>
    %c0_168 = arith.constant 0 : index
    %c16 = arith.constant 16 : index
    %174 = vector.load %arg20[%c0_168, %c16] : memref<34x112xf32, #tpu.memory_space<vmem>>, vector<32x96xf32>
    %c2_169 = arith.constant 2 : index
    %c0_170 = arith.constant 0 : index
    %c0_171 = arith.constant 0 : index
    %175 = vector.load %arg11[%c2_169, %c0_170, %c0_171] : memref<9x96x96xf32, #tpu.memory_space<vmem>>, vector<1x96x96xf32>
    %176 = vector.shape_cast %175 : vector<1x96x96xf32> to vector<96x96xf32>
    %cst_172 = arith.constant dense<0.000000e+00> : vector<32x96xf32>
    %177 = tpu.matmul %174, %176, %cst_172 {dimension_numbers = #tpu.dot_dimension_numbers<[1], [0], [0], [1], [0, 0, 1, 1], [], []>} : vector<32x96xf32>, vector<96x96xf32>, vector<32x96xf32> -> vector<32x96xf32>
    %178 = arith.addf %173, %177 : vector<32x96xf32>
    %c1_173 = arith.constant 1 : index
    %c0_174 = arith.constant 0 : index
    %179 = vector.load %arg20[%c1_173, %c0_174] : memref<34x112xf32, #tpu.memory_space<vmem>>, vector<32x96xf32>
    %c3_175 = arith.constant 3 : index
    %c0_176 = arith.constant 0 : index
    %c0_177 = arith.constant 0 : index
    %180 = vector.load %arg11[%c3_175, %c0_176, %c0_177] : memref<9x96x96xf32, #tpu.memory_space<vmem>>, vector<1x96x96xf32>
    %181 = vector.shape_cast %180 : vector<1x96x96xf32> to vector<96x96xf32>
    %cst_178 = arith.constant dense<0.000000e+00> : vector<32x96xf32>
    %182 = tpu.matmul %179, %181, %cst_178 {dimension_numbers = #tpu.dot_dimension_numbers<[1], [0], [0], [1], [0, 0, 1, 1], [], []>} : vector<32x96xf32>, vector<96x96xf32>, vector<32x96xf32> -> vector<32x96xf32>
    %183 = arith.addf %178, %182 : vector<32x96xf32>
    %c1_179 = arith.constant 1 : index
    %c8_180 = arith.constant 8 : index
    %184 = vector.load %arg20[%c1_179, %c8_180] : memref<34x112xf32, #tpu.memory_space<vmem>>, vector<32x96xf32>
    %c4_181 = arith.constant 4 : index
    %c0_182 = arith.constant 0 : index
    %c0_183 = arith.constant 0 : index
    %185 = vector.load %arg11[%c4_181, %c0_182, %c0_183] : memref<9x96x96xf32, #tpu.memory_space<vmem>>, vector<1x96x96xf32>
    %186 = vector.shape_cast %185 : vector<1x96x96xf32> to vector<96x96xf32>
    %cst_184 = arith.constant dense<0.000000e+00> : vector<32x96xf32>
    %187 = tpu.matmul %184, %186, %cst_184 {dimension_numbers = #tpu.dot_dimension_numbers<[1], [0], [0], [1], [0, 0, 1, 1], [], []>} : vector<32x96xf32>, vector<96x96xf32>, vector<32x96xf32> -> vector<32x96xf32>
    %188 = arith.addf %183, %187 : vector<32x96xf32>
    %c1_185 = arith.constant 1 : index
    %c16_186 = arith.constant 16 : index
    %189 = vector.load %arg20[%c1_185, %c16_186] : memref<34x112xf32, #tpu.memory_space<vmem>>, vector<32x96xf32>
    %c5_187 = arith.constant 5 : index
    %c0_188 = arith.constant 0 : index
    %c0_189 = arith.constant 0 : index
    %190 = vector.load %arg11[%c5_187, %c0_188, %c0_189] : memref<9x96x96xf32, #tpu.memory_space<vmem>>, vector<1x96x96xf32>
    %191 = vector.shape_cast %190 : vector<1x96x96xf32> to vector<96x96xf32>
    %cst_190 = arith.constant dense<0.000000e+00> : vector<32x96xf32>
    %192 = tpu.matmul %189, %191, %cst_190 {dimension_numbers = #tpu.dot_dimension_numbers<[1], [0], [0], [1], [0, 0, 1, 1], [], []>} : vector<32x96xf32>, vector<96x96xf32>, vector<32x96xf32> -> vector<32x96xf32>
    %193 = arith.addf %188, %192 : vector<32x96xf32>
    %c2_191 = arith.constant 2 : index
    %c0_192 = arith.constant 0 : index
    %194 = vector.load %arg20[%c2_191, %c0_192] : memref<34x112xf32, #tpu.memory_space<vmem>>, vector<32x96xf32>
    %c6_193 = arith.constant 6 : index
    %c0_194 = arith.constant 0 : index
    %c0_195 = arith.constant 0 : index
    %195 = vector.load %arg11[%c6_193, %c0_194, %c0_195] : memref<9x96x96xf32, #tpu.memory_space<vmem>>, vector<1x96x96xf32>
    %196 = vector.shape_cast %195 : vector<1x96x96xf32> to vector<96x96xf32>
    %cst_196 = arith.constant dense<0.000000e+00> : vector<32x96xf32>
    %197 = tpu.matmul %194, %196, %cst_196 {dimension_numbers = #tpu.dot_dimension_numbers<[1], [0], [0], [1], [0, 0, 1, 1], [], []>} : vector<32x96xf32>, vector<96x96xf32>, vector<32x96xf32> -> vector<32x96xf32>
    %198 = arith.addf %193, %197 : vector<32x96xf32>
    %c2_197 = arith.constant 2 : index
    %c8_198 = arith.constant 8 : index
    %199 = vector.load %arg20[%c2_197, %c8_198] : memref<34x112xf32, #tpu.memory_space<vmem>>, vector<32x96xf32>
    %c7_199 = arith.constant 7 : index
    %c0_200 = arith.constant 0 : index
    %c0_201 = arith.constant 0 : index
    %200 = vector.load %arg11[%c7_199, %c0_200, %c0_201] : memref<9x96x96xf32, #tpu.memory_space<vmem>>, vector<1x96x96xf32>
    %201 = vector.shape_cast %200 : vector<1x96x96xf32> to vector<96x96xf32>
    %cst_202 = arith.constant dense<0.000000e+00> : vector<32x96xf32>
    %202 = tpu.matmul %199, %201, %cst_202 {dimension_numbers = #tpu.dot_dimension_numbers<[1], [0], [0], [1], [0, 0, 1, 1], [], []>} : vector<32x96xf32>, vector<96x96xf32>, vector<32x96xf32> -> vector<32x96xf32>
    %203 = arith.addf %198, %202 : vector<32x96xf32>
    %c2_203 = arith.constant 2 : index
    %c16_204 = arith.constant 16 : index
    %204 = vector.load %arg20[%c2_203, %c16_204] : memref<34x112xf32, #tpu.memory_space<vmem>>, vector<32x96xf32>
    %c8_205 = arith.constant 8 : index
    %c0_206 = arith.constant 0 : index
    %c0_207 = arith.constant 0 : index
    %205 = vector.load %arg11[%c8_205, %c0_206, %c0_207] : memref<9x96x96xf32, #tpu.memory_space<vmem>>, vector<1x96x96xf32>
    %206 = vector.shape_cast %205 : vector<1x96x96xf32> to vector<96x96xf32>
    %cst_208 = arith.constant dense<0.000000e+00> : vector<32x96xf32>
    %207 = tpu.matmul %204, %206, %cst_208 {dimension_numbers = #tpu.dot_dimension_numbers<[1], [0], [0], [1], [0, 0, 1, 1], [], []>} : vector<32x96xf32>, vector<96x96xf32>, vector<32x96xf32> -> vector<32x96xf32>
    %208 = arith.addf %203, %207 : vector<32x96xf32>
    %cst_209 = arith.constant 0.000000e+00 : f32
    %209 = vector.broadcast %cst_209 : f32 to vector<1x96xf32>
    %cst_210 = arith.constant 0.000000e+00 : f32
    %210 = vector.broadcast %cst_210 : f32 to vector<1x96xf32>
    %211 = vector.extract_strided_slice %208 {offsets = [0, 0], sizes = [12, 96], strides = [1, 1]} : vector<32x96xf32> to vector<12x96xf32>
    %cst_211 = arith.constant dense<0.000000e+00> : vector<96xf32>
    %212 = vector.multi_reduction <add>, %211, %cst_211 [0] : vector<12x96xf32> to vector<96xf32>
    %213 = vector.shape_cast %212 : vector<96xf32> to vector<1x96xf32>
    %214 = arith.addf %209, %213 : vector<1x96xf32>
    %215 = arith.mulf %211, %211 : vector<12x96xf32>
    %cst_212 = arith.constant dense<0.000000e+00> : vector<96xf32>
    %216 = vector.multi_reduction <add>, %215, %cst_212 [0] : vector<12x96xf32> to vector<96xf32>
    %217 = vector.shape_cast %216 : vector<96xf32> to vector<1x96xf32>
    %218 = arith.addf %210, %217 : vector<1x96xf32>
    %219 = vector.extract_strided_slice %208 {offsets = [16, 0], sizes = [12, 96], strides = [1, 1]} : vector<32x96xf32> to vector<12x96xf32>
    %cst_213 = arith.constant dense<0.000000e+00> : vector<96xf32>
    %220 = vector.multi_reduction <add>, %219, %cst_213 [0] : vector<12x96xf32> to vector<96xf32>
    %221 = vector.shape_cast %220 : vector<96xf32> to vector<1x96xf32>
    %222 = arith.addf %214, %221 : vector<1x96xf32>
    %223 = arith.mulf %219, %219 : vector<12x96xf32>
    %cst_214 = arith.constant dense<0.000000e+00> : vector<96xf32>
    %224 = vector.multi_reduction <add>, %223, %cst_214 [0] : vector<12x96xf32> to vector<96xf32>
    %225 = vector.shape_cast %224 : vector<96xf32> to vector<1x96xf32>
    %226 = arith.addf %218, %225 : vector<1x96xf32>
    %c0_215 = arith.constant 0 : index
    %c0_216 = arith.constant 0 : index
    %227 = vector.load %arg15[%c0_215, %c0_216] : memref<96x8xf32, #tpu.memory_space<vmem>>, vector<96x8xf32>
    %cst_217 = arith.constant dense<0.000000e+00> : vector<1x8xf32>
    %228 = tpu.matmul %222, %227, %cst_217 {dimension_numbers = #tpu.dot_dimension_numbers<[1], [0], [0], [1], [0, 0, 1, 1], [], []>} : vector<1x96xf32>, vector<96x8xf32>, vector<1x8xf32> -> vector<1x8xf32>
    %cst_218 = arith.constant 2.880000e+02 : f32
    %229 = vector.broadcast %cst_218 : f32 to vector<1x8xf32>
    %230 = arith.divf %228, %229 : vector<1x8xf32>
    %c0_219 = arith.constant 0 : index
    %c0_220 = arith.constant 0 : index
    %231 = vector.load %arg15[%c0_219, %c0_220] : memref<96x8xf32, #tpu.memory_space<vmem>>, vector<96x8xf32>
    %cst_221 = arith.constant dense<0.000000e+00> : vector<1x8xf32>
    %232 = tpu.matmul %226, %231, %cst_221 {dimension_numbers = #tpu.dot_dimension_numbers<[1], [0], [0], [1], [0, 0, 1, 1], [], []>} : vector<1x96xf32>, vector<96x8xf32>, vector<1x8xf32> -> vector<1x8xf32>
    %cst_222 = arith.constant 2.880000e+02 : f32
    %233 = vector.broadcast %cst_222 : f32 to vector<1x8xf32>
    %234 = arith.divf %232, %233 : vector<1x8xf32>
    %235 = arith.mulf %230, %230 : vector<1x8xf32>
    %236 = arith.subf %234, %235 : vector<1x8xf32>
    %cst_223 = arith.constant 0.000000e+00 : f32
    %237 = vector.broadcast %cst_223 : f32 to vector<1x8xf32>
    %238 = arith.maximumf %236, %237 : vector<1x8xf32>
    %cst_224 = arith.constant 9.99999974E-6 : f32
    %239 = vector.broadcast %cst_224 : f32 to vector<1x8xf32>
    %240 = arith.addf %238, %239 : vector<1x8xf32>
    %241 = math.rsqrt %240 : vector<1x8xf32>
    %c0_225 = arith.constant 0 : index
    %c0_226 = arith.constant 0 : index
    %242 = vector.load %arg13[%c0_225, %c0_226] : memref<1x8xf32, #tpu.memory_space<vmem>>, vector<1x8xf32>
    %243 = arith.mulf %242, %241 : vector<1x8xf32>
    %c0_227 = arith.constant 0 : index
    %c0_228 = arith.constant 0 : index
    %244 = vector.load %arg14[%c0_227, %c0_228] : memref<1x8xf32, #tpu.memory_space<vmem>>, vector<1x8xf32>
    %245 = arith.mulf %230, %243 : vector<1x8xf32>
    %246 = arith.subf %244, %245 : vector<1x8xf32>
    %c0_229 = arith.constant 0 : index
    %c0_230 = arith.constant 0 : index
    %247 = vector.load %arg16[%c0_229, %c0_230] : memref<8x96xf32, #tpu.memory_space<vmem>>, vector<8x96xf32>
    %cst_231 = arith.constant dense<0.000000e+00> : vector<1x96xf32>
    %248 = tpu.matmul %243, %247, %cst_231 {dimension_numbers = #tpu.dot_dimension_numbers<[1], [0], [0], [1], [0, 0, 1, 1], [], []>} : vector<1x8xf32>, vector<8x96xf32>, vector<1x96xf32> -> vector<1x96xf32>
    %c0_232 = arith.constant 0 : index
    %c0_233 = arith.constant 0 : index
    %249 = vector.load %arg16[%c0_232, %c0_233] : memref<8x96xf32, #tpu.memory_space<vmem>>, vector<8x96xf32>
    %cst_234 = arith.constant dense<0.000000e+00> : vector<1x96xf32>
    %250 = tpu.matmul %246, %249, %cst_234 {dimension_numbers = #tpu.dot_dimension_numbers<[1], [0], [0], [1], [0, 0, 1, 1], [], []>} : vector<1x8xf32>, vector<8x96xf32>, vector<1x96xf32> -> vector<1x96xf32>
    %251 = vector.broadcast %248 : vector<1x96xf32> to vector<32x96xf32>
    %252 = arith.mulf %208, %251 : vector<32x96xf32>
    %253 = vector.broadcast %250 : vector<1x96xf32> to vector<32x96xf32>
    %254 = arith.addf %252, %253 : vector<32x96xf32>
    %cst_235 = arith.constant 0.000000e+00 : f32
    %255 = vector.broadcast %cst_235 : f32 to vector<32x96xf32>
    %256 = arith.maximumf %254, %255 : vector<32x96xf32>
    %257 = vector.extract_strided_slice %256 {offsets = [0, 0], sizes = [12, 96], strides = [1, 1]} : vector<32x96xf32> to vector<12x96xf32>
    %c0_236 = arith.constant 0 : index
    %c0_237 = arith.constant 0 : index
    %258 = vector.load %arg17[%c0_236, %c0_237] : memref<24x96xf32, #tpu.memory_space<vmem>>, vector<12x96xf32>
    tpu.vector_store %arg17[%c0_236, %c0_237], %257 {strides = array<i32>} : memref<24x96xf32, #tpu.memory_space<vmem>>, vector<12x96xf32>,
    %259 = vector.extract_strided_slice %256 {offsets = [16, 0], sizes = [12, 96], strides = [1, 1]} : vector<32x96xf32> to vector<12x96xf32>
    %c12 = arith.constant 12 : index
    %c0_238 = arith.constant 0 : index
    %260 = vector.load %arg17[%c12, %c0_238] : memref<24x96xf32, #tpu.memory_space<vmem>>, vector<12x96xf32>
    tpu.vector_store %arg17[%c12, %c0_238], %259 {strides = array<i32>} : memref<24x96xf32, #tpu.memory_space<vmem>>, vector<12x96xf32>,
    return
  }
}

</mosaic_0001>

<bundles_post_ra>
// kernel: tile.44
= control target key start
LH: loop header
LB: loop body
LE: loop exit
PB: predicated region body
PF: predicated region fallthrough
CT: control target
= control target key end

     0   :  { %vm6_vm0 = vcmask 1043458   ;;  %vm10_vm1 = vcmask 1045508   ;;  %vm14_vm2 = vcmask 1047558   ;;  %s19_s6 = smov 3  ;;  %s22_s7 = smov 12  ;;  %vm16_vm3 = vcmask 64512   ;;  %s644_s0 = inlined_call_operand.vmem [shape: f32[14,8,8], index: 0, kind: input, shape index: {}]   ;;  %s645_s1 = inlined_call_operand.vmem [shape: f32[112,8], index: 1, kind: output, shape index: {}]  }
   0x1   :  { %v304_v0 = vld [vmem:[%s644_s0 + $0xd] ss:$16 sm:%s19_s6]   ;;  %s27_s12 = smov 48  ;;  %s32_s13 = smov 192  ;;  %vm38_vm4 = vcmask 917312   ;;  %vm60_vm5 = vcmask 851712  }
   0x2   :  { %v305_v1 = vld [vmem:[%s644_s0 + $0xd] ss:$16 sm:%s22_s7]   ;;  %s63_s18 = smov 3  ;;  %s66_s21 = smov 12  ;;  %vm82_vm6 = vcmask 786112   ;;  %vm104_vm7 = vcmask 720512  }
   0x3   :  { %v25_v2 = vsel %vm6_vm0, %v305_v1, %v304_v0  ;;  %v306_v3 = vld [vmem:[%s644_s0 + $0xd] ss:$16 sm:%s27_s12]   ;;  %v312_v6 = vld [vmem:[%s644_s0 + $0xb] ss:$16 sm:%s63_s18]   ;;  %s71_s22 = smov 48  ;;  %s76_s27 = smov 192 }
   0x4   :  { %v307_v4 = vld [vmem:[%s644_s0 + $0xd] ss:$16 sm:%s32_s13]   ;;  %v30_v5 = vsel %vm10_vm1, %v306_v3, %v25_v2  ;;  %v313_v8 = vld [vmem:[%s644_s0 + $0xb] ss:$16 sm:%s66_s21]   ;;  %s369_s28 = smov 104   ;;  %s41_s2 = smov 3 }
   0x5   :  { %v35_v7 = vsel %vm14_vm2, %v307_v4, %v30_v5  ;;  %v314_v9 = vld [vmem:[%s644_s0 + $0xb] ss:$16 sm:%s71_s22]   ;;  %v69_v10 = vsel %vm6_vm0, %v313_v8, %v312_v6  ;;  %s44_s3 = smov 12  ;;  %v308_v13 = vld [vmem:[%s644_s0 + $0xc] ss:$16 sm:%s41_s2]   ;;  %s49_s8 = smov 48 }
   0x6   :  { %36 = vrot.lane.b32.xlu0 %v35_v7, %s369_s28  ;;  %v315_v11 = vld [vmem:[%s644_s0 + $0xb] ss:$16 sm:%s76_s27]   ;;  %v74_v12 = vsel %vm10_vm1, %v314_v9, %v69_v10  ;;  %s54_s9 = smov 192  ;;  %s85_s14 = smov 3  ;;  %vm126_vm8 = vcmask 654912   ;;  %vm148_vm9 = vcmask 589312  }
   0x7   :  { %v309_v14 = vld [vmem:[%s644_s0 + $0xc] ss:$16 sm:%s44_s3]   ;;  %v79_v15 = vsel %vm14_vm2, %v315_v11, %v74_v12  ;;  %s370_s15 = smov 88   ;;  %v316_v20 = vld [vmem:[%s644_s0 + $0xa] ss:$16 sm:%s85_s14]   ;;  %s88_s18 = smov 12 }
   0x8   :  { %v47_v16 = vsel %vm6_vm0, %v309_v14, %v308_v13  ;;  %v310_v17 = vld [vmem:[%s644_s0 + $0xc] ss:$16 sm:%s49_s8]   ;;  %80 = vrot.lane.b32.xlu1 %v79_v15, %s370_s15  ;;  %s93_s19 = smov 48  ;;  %s98_s24 = smov 192  ;;  %vm170_vm10 = vcmask 523712   ;;  %vm192_vm11 = vcmask 458112  }
   0x9   :  { %v311_v18 = vld [vmem:[%s644_s0 + $0xc] ss:$16 sm:%s54_s9]   ;;  %v52_v19 = vsel %vm10_vm1, %v310_v17, %v47_v16  ;;  %v317_v22 = vld [vmem:[%s644_s0 + $0xa] ss:$16 sm:%s88_s18]   ;;  %s371_s25 = smov 96   ;;  %s107_s28 = smov 3 }
   0xa   :  { %v57_v21 = vsel %vm14_vm2, %v311_v18, %v52_v19  ;;  %v318_v23 = vld [vmem:[%s644_s0 + $0xa] ss:$16 sm:%s93_s19]   ;;  %v91_v24 = vsel %vm6_vm0, %v317_v22, %v316_v20  ;;  %s110_s29 = smov 12  ;;  %v320_v27 = vld [vmem:[%s644_s0 + $0x9] ss:$16 sm:%s107_s28]   ;;  %s115_s5 = smov 48 }
   0xb   :  { %58 = vrot.lane.b32.xlu0 %v57_v21, %s371_s25  ;;  %v319_v25 = vld [vmem:[%s644_s0 + $0xa] ss:$16 sm:%s98_s24]   ;;  %v96_v26 = vsel %vm10_vm1, %v318_v23, %v91_v24  ;;  %s120_s6 = smov 192  ;;  %s129_s11 = smov 3  ;;  %vm214_vm12 = vcmask 392512   ;;  %vm236_vm13 = vcmask 326912  }
   0xc   :  { %v321_v28 = vld [vmem:[%s644_s0 + $0x9] ss:$16 sm:%s110_s29]   ;;  %v101_v29 = vsel %vm14_vm2, %v319_v25, %v96_v26  ;;  %s372_s12 = smov 80   ;;  %v324_v34 = vld [vmem:[%s644_s0 + $0x8] ss:$16 sm:%s129_s11]   ;;  %s132_s15 = smov 12 }
   0xd   :  { %v113_v30 = vsel %vm6_vm0, %v321_v28, %v320_v27  ;;  %v322_v31 = vld [vmem:[%s644_s0 + $0x9] ss:$16 sm:%s115_s5]   ;;  %102 = vrot.lane.b32.xlu1 %v101_v29, %s372_s12  ;;  %s137_s16 = smov 48  ;;  %s142_s21 = smov 192  ;;  %vm258_vm14 = vcmask 261312   ;;  %vm280_vm15 = vcmask 195712  }
   0xe   :  { %v323_v32 = vld [vmem:[%s644_s0 + $0x9] ss:$16 sm:%s120_s6]   ;;  %v118_v33 = vsel %vm10_vm1, %v322_v31, %v113_v30  ;;  %v325_v36 = vld [vmem:[%s644_s0 + $0x8] ss:$16 sm:%s132_s15]   ;;  %s373_s22 = smov 72   ;;  %s151_s25 = smov 3 }
   0xf   :  { %v123_v35 = vsel %vm14_vm2, %v323_v32, %v118_v33  ;;  %v326_v37 = vld [vmem:[%s644_s0 + $0x8] ss:$16 sm:%s137_s16]   ;;  %v135_v38 = vsel %vm6_vm0, %v325_v36, %v324_v34  ;;  %s154_s26 = smov 12  ;;  %v328_v41 = vld [vmem:[%s644_s0 + $0x7] ss:$16 sm:%s151_s25]   ;;  %s159_s2 = smov 48 }
  0x10   :  { %124 = vrot.lane.b32.xlu0 %v123_v35, %s373_s22  ;;  %v327_v39 = vld [vmem:[%s644_s0 + $0x8] ss:$16 sm:%s142_s21]   ;;  %v140_v40 = vsel %vm10_vm1, %v326_v37, %v135_v38  ;;  %s164_s3 = smov 192  ;;  %s173_s8 = smov 3 }
  0x11   :  { %v329_v42 = vld [vmem:[%s644_s0 + $0x7] ss:$16 sm:%s154_s26]   ;;  %v145_v43 = vsel %vm14_vm2, %v327_v39, %v140_v40  ;;  %s374_s9 = smov 64   ;;  %v332_v48 = vld [vmem:[%s644_s0 + $0x6] ss:$16 sm:%s173_s8]   ;;  %s176_s12 = smov 12 }
  0x12   :  { %v157_v44 = vsel %vm6_vm0, %v329_v42, %v328_v41  ;;  %v330_v45 = vld [vmem:[%s644_s0 + $0x7] ss:$16 sm:%s159_s2]   ;;  %146 = vrot.lane.b32.xlu1 %v145_v43, %s374_s9  ;;  %s181_s13 = smov 48  ;;  %s186_s18 = smov 192 }
  0x13   :  { %v331_v46 = vld [vmem:[%s644_s0 + $0x7] ss:$16 sm:%s164_s3]   ;;  %v162_v47 = vsel %vm10_vm1, %v330_v45, %v157_v44  ;;  %v333_v50 = vld [vmem:[%s644_s0 + $0x6] ss:$16 sm:%s176_s12]   ;;  %s375_s19 = smov 56   ;;  %s195_s22 = smov 3 }
  0x14   :  { %v167_v49 = vsel %vm14_vm2, %v331_v46, %v162_v47  ;;  %v334_v51 = vld [vmem:[%s644_s0 + $0x6] ss:$16 sm:%s181_s13]   ;;  %v179_v52 = vsel %vm6_vm0, %v333_v50, %v332_v48  ;;  %s198_s23 = smov 12  ;;  %v336_v55 = vld [vmem:[%s644_s0 + $0x5] ss:$16 sm:%s195_s22]   ;;  %s203_s28 = smov 48 }
  0x15   :  { %168 = vrot.lane.b32.xlu0 %v167_v49, %s375_s19  ;;  %v335_v53 = vld [vmem:[%s644_s0 + $0x6] ss:$16 sm:%s186_s18]   ;;  %v184_v54 = vsel %vm10_vm1, %v334_v51, %v179_v52  ;;  %s208_s29 = smov 192  ;;  %s217_s5 = smov 3 }
  0x16   :  { %v337_v56 = vld [vmem:[%s644_s0 + $0x5] ss:$16 sm:%s198_s23]   ;;  %v189_v57 = vsel %vm14_vm2, %v335_v53, %v184_v54  ;;  %s376_s6 = smov 48   ;;  %v340_v62 = vld [vmem:[%s644_s0 + $0x4] ss:$16 sm:%s217_s5]   ;;  %s220_s9 = smov 12 }
  0x17   :  { %v201_v58 = vsel %vm6_vm0, %v337_v56, %v336_v55  ;;  %v338_v59 = vld [vmem:[%s644_s0 + $0x5] ss:$16 sm:%s203_s28]   ;;  %190 = vrot.lane.b32.xlu1 %v189_v57, %s376_s6  ;;  %s225_s10 = smov 48  ;;  %s230_s15 = smov 192 }
  0x18   :  { %v339_v60 = vld [vmem:[%s644_s0 + $0x5] ss:$16 sm:%s208_s29]   ;;  %v206_v61 = vsel %vm10_vm1, %v338_v59, %v201_v58  ;;  %v341_v0 = vld [vmem:[%s644_s0 + $0x4] ss:$16 sm:%s220_s9]   ;;  %s377_s16 = smov 40   ;;  %s239_s19 = smov 3 }
  0x19   :  { %v211_v63 = vsel %vm14_vm2, %v339_v60, %v206_v61  ;;  %v342_v1 = vld [vmem:[%s644_s0 + $0x4] ss:$16 sm:%s225_s10]   ;;  %v223_v2 = vsel %vm6_vm0, %v341_v0, %v340_v62  ;;  %s242_s20 = smov 12  ;;  %v344_v5 = vld [vmem:[%s644_s0 + $0x3] ss:$16 sm:%s239_s19]   ;;  %s247_s25 = smov 48 }
  0x1a   :  { %212 = vrot.lane.b32.xlu0 %v211_v63, %s377_s16  ;;  %v343_v3 = vld [vmem:[%s644_s0 + $0x4] ss:$16 sm:%s230_s15]   ;;  %v228_v4 = vsel %vm10_vm1, %v342_v1, %v223_v2  ;;  %s252_s26 = smov 192  ;;  %s261_s2 = smov 3 }
  0x1b   :  { %v345_v6 = vld [vmem:[%s644_s0 + $0x3] ss:$16 sm:%s242_s20]   ;;  %v233_v7 = vsel %vm14_vm2, %v343_v3, %v228_v4  ;;  %s378_s3 = smov 32   ;;  %v348_v12 = vld [vmem:[%s644_s0 + $0x2] ss:$16 sm:%s261_s2]   ;;  %s264_s6 = smov 12 }
  0x1c   :  { %v245_v8 = vsel %vm6_vm0, %v345_v6, %v344_v5  ;;  %v346_v9 = vld [vmem:[%s644_s0 + $0x3] ss:$16 sm:%s247_s25]   ;;  %234 = vrot.lane.b32.xlu1 %v233_v7, %s378_s3  ;;  %s269_s7 = smov 48  ;;  %s274_s12 = smov 192 }
  0x1d   :  { %v347_v10 = vld [vmem:[%s644_s0 + $0x3] ss:$16 sm:%s252_s26]   ;;  %v250_v11 = vsel %vm10_vm1, %v346_v9, %v245_v8  ;;  %v349_v14 = vld [vmem:[%s644_s0 + $0x2] ss:$16 sm:%s264_s6]   ;;  %s379_s13 = smov 24   ;;  %s283_s16 = smov 3 }
  0x1e   :  { %v255_v13 = vsel %vm14_vm2, %v347_v10, %v250_v11  ;;  %v350_v15 = vld [vmem:[%s644_s0 + $0x2] ss:$16 sm:%s269_s7]   ;;  %v267_v16 = vsel %vm6_vm0, %v349_v14, %v348_v12  ;;  %s286_s17 = smov 12  ;;  %v352_v19 = vld [vmem:[%s644_s0 + $0x1] ss:$16 sm:%s283_s16]   ;;  %s291_s22 = smov 48 }
  0x1f   :  { %256 = vrot.lane.b32.xlu0 %v255_v13, %s379_s13  ;;  %v351_v17 = vld [vmem:[%s644_s0 + $0x2] ss:$16 sm:%s274_s12]   ;;  %v272_v18 = vsel %vm10_vm1, %v350_v15, %v267_v16  ;;  %s296_s23 = smov 192  ;;  %s2_s28 = smov 3 }
  0x20   :  { %v353_v20 = vld [vmem:[%s644_s0 + $0x1] ss:$16 sm:%s286_s17]   ;;  %v277_v21 = vsel %vm14_vm2, %v351_v17, %v272_v18  ;;  %s380_s29 = smov 16   ;;  %s4_s30 = smov 12  ;;  %v3_v26 = vld [vmem:[%s644_s0] ss:$16 sm:%s2_s28]  }
  0x21   :  { %v289_v22 = vsel %vm6_vm0, %v353_v20, %v352_v19  ;;  %v354_v23 = vld [vmem:[%s644_s0 + $0x1] ss:$16 sm:%s291_s22]   ;;  %278 = vrot.lane.b32.xlu1 %v277_v21, %s380_s29  ;;  %s8_s2 = smov 48  ;;  %s12_s5 = smov 192 }
  0x22   :  { %v355_v24 = vld [vmem:[%s644_s0 + $0x1] ss:$16 sm:%s296_s23]   ;;  %v294_v25 = vsel %vm10_vm1, %v354_v23, %v289_v22  ;;  %v5_v28 = vld [vmem:[%s644_s0] ss:$16 sm:%s4_s30]   ;;  %s381_s10 = smov 8  }
  0x23   :  { %v299_v27 = vsel %vm14_vm2, %v355_v24, %v294_v25  ;;  %v9_v29 = vld [vmem:[%s644_s0] ss:$16 sm:%s8_s2]   ;;  %v7_v30 = vsel %vm6_vm0, %v5_v28, %v3_v26  ;;  %vm302_vm0 = vcmask 130112  }
  0x24   :  { %300 = vrot.lane.b32.xlu0 %v299_v27, %s381_s10  ;;  %v13_v31 = vld [vmem:[%s644_s0] ss:$16 sm:%s12_s5]   ;;  %v11_v32 = vsel %vm10_vm1, %v9_v29, %v7_v30 }
  0x25   :  { %v15_v33 = vsel %vm14_vm2, %v13_v31, %v11_v32 }
  0x26   :  { %17 = vst.msk [vmem:[%s645_s1] sm:$0xff] %vm16_vm3, %v15_v33  }
  0x78   :  { %v37_v34 = vpop.permute.xlu0 %36  }
  0x79   :  { %39 = vst.msk [vmem:[%s645_s1] sm:$0xff] %vm38_vm4, %v37_v34  }
  0x7a   :  { %v81_v35 = vpop.permute.xlu1 %80  }
  0x7d   :  { %v59_v36 = vpop.permute.xlu0 %58  }
  0x7e   :  { %61 = vst.msk [vmem:[%s645_s1] sm:$0xff] %vm60_vm5, %v59_v36  }
  0x7f   :  { %83 = vst.msk [vmem:[%s645_s1] sm:$0xff] %vm82_vm6, %v81_v35   ;;  %v103_v37 = vpop.permute.xlu1 %102  }
  0x80   :  { %105 = vst.msk [vmem:[%s645_s1] sm:$0xff] %vm104_vm7, %v103_v37  }
  0x82   :  { %v125_v38 = vpop.permute.xlu0 %124  }
  0x83   :  { %127 = vst.msk [vmem:[%s645_s1] sm:$0xff] %vm126_vm8, %v125_v38  }
  0x84   :  { %v147_v39 = vpop.permute.xlu1 %146  }
  0x85   :  { %149 = vst.msk [vmem:[%s645_s1] sm:$0xff] %vm148_vm9, %v147_v39  }
  0x87   :  { %v169_v40 = vpop.permute.xlu0 %168  }
  0x88   :  { %171 = vst.msk [vmem:[%s645_s1] sm:$0xff] %vm170_vm10, %v169_v40  }
  0x89   :  { %v191_v41 = vpop.permute.xlu1 %190  }
  0x8a   :  { %193 = vst.msk [vmem:[%s645_s1] sm:$0xff] %vm192_vm11, %v191_v41  }
  0x8c   :  { %v213_v42 = vpop.permute.xlu0 %212  }
  0x8d   :  { %215 = vst.msk [vmem:[%s645_s1] sm:$0xff] %vm214_vm12, %v213_v42  }
  0x8e   :  { %v235_v43 = vpop.permute.xlu1 %234  }
  0x8f   :  { %237 = vst.msk [vmem:[%s645_s1] sm:$0xff] %vm236_vm13, %v235_v43  }
  0x91   :  { %v257_v44 = vpop.permute.xlu0 %256  }
  0x92   :  { %259 = vst.msk [vmem:[%s645_s1] sm:$0xff] %vm258_vm14, %v257_v44  }
  0x93   :  { %v279_v45 = vpop.permute.xlu1 %278  }
  0x94   :  { %281 = vst.msk [vmem:[%s645_s1] sm:$0xff] %vm280_vm15, %v279_v45  }
  0x96   :  { %v301_v46 = vpop.permute.xlu0 %300  }
  0x97   :  { %303 = vst.msk [vmem:[%s645_s1] sm:$0xff] %vm302_vm0, %v301_v46  }

// kernel: tile.49
= control target key start
LH: loop header
LB: loop body
LE: loop exit
PB: predicated region body
PF: predicated region fallthrough
CT: control target
= control target key end

     0   :  { %vm6_vm0 = vcmask 1043458   ;;  %vm10_vm1 = vcmask 1045508   ;;  %vm14_vm2 = vcmask 1047558   ;;  %s19_s6 = smov 3  ;;  %s22_s7 = smov 12  ;;  %vm16_vm3 = vcmask 64512   ;;  %s552_s0 = inlined_call_operand.vmem [shape: f32[12,8,8], index: 0, kind: input, shape index: {}]   ;;  %s553_s1 = inlined_call_operand.vmem [shape: f32[96,8], index: 1, kind: output, shape index: {}]  }
   0x1   :  { %v260_v0 = vld [vmem:[%s552_s0 + $0xb] ss:$16 sm:%s19_s6]   ;;  %s27_s12 = smov 48  ;;  %s32_s13 = smov 192  ;;  %vm38_vm4 = vcmask 786112   ;;  %vm60_vm5 = vcmask 720512  }
   0x2   :  { %v261_v1 = vld [vmem:[%s552_s0 + $0xb] ss:$16 sm:%s22_s7]   ;;  %s63_s18 = smov 3  ;;  %s66_s21 = smov 12  ;;  %vm82_vm6 = vcmask 654912   ;;  %vm104_vm7 = vcmask 589312  }
   0x3   :  { %v25_v2 = vsel %vm6_vm0, %v261_v1, %v260_v0  ;;  %v262_v3 = vld [vmem:[%s552_s0 + $0xb] ss:$16 sm:%s27_s12]   ;;  %v268_v6 = vld [vmem:[%s552_s0 + $0x9] ss:$16 sm:%s63_s18]   ;;  %s71_s22 = smov 48  ;;  %s76_s27 = smov 192 }
   0x4   :  { %v263_v4 = vld [vmem:[%s552_s0 + $0xb] ss:$16 sm:%s32_s13]   ;;  %v30_v5 = vsel %vm10_vm1, %v262_v3, %v25_v2  ;;  %v269_v8 = vld [vmem:[%s552_s0 + $0x9] ss:$16 sm:%s66_s21]   ;;  %s315_s28 = smov 88   ;;  %s41_s2 = smov 3 }
   0x5   :  { %v35_v7 = vsel %vm14_vm2, %v263_v4, %v30_v5  ;;  %v270_v9 = vld [vmem:[%s552_s0 + $0x9] ss:$16 sm:%s71_s22]   ;;  %v69_v10 = vsel %vm6_vm0, %v269_v8, %v268_v6  ;;  %s44_s3 = smov 12  ;;  %v264_v13 = vld [vmem:[%s552_s0 + $0xa] ss:$16 sm:%s41_s2]   ;;  %s49_s8 = smov 48 }
   0x6   :  { %36 = vrot.lane.b32.xlu0 %v35_v7, %s315_s28  ;;  %v271_v11 = vld [vmem:[%s552_s0 + $0x9] ss:$16 sm:%s76_s27]   ;;  %v74_v12 = vsel %vm10_vm1, %v270_v9, %v69_v10  ;;  %s54_s9 = smov 192  ;;  %s85_s14 = smov 3  ;;  %vm126_vm8 = vcmask 523712   ;;  %vm148_vm9 = vcmask 458112  }
   0x7   :  { %v265_v14 = vld [vmem:[%s552_s0 + $0xa] ss:$16 sm:%s44_s3]   ;;  %v79_v15 = vsel %vm14_vm2, %v271_v11, %v74_v12  ;;  %s316_s15 = smov 72   ;;  %v272_v20 = vld [vmem:[%s552_s0 + $0x8] ss:$16 sm:%s85_s14]   ;;  %s88_s18 = smov 12 }
   0x8   :  { %v47_v16 = vsel %vm6_vm0, %v265_v14, %v264_v13  ;;  %v266_v17 = vld [vmem:[%s552_s0 + $0xa] ss:$16 sm:%s49_s8]   ;;  %80 = vrot.lane.b32.xlu1 %v79_v15, %s316_s15  ;;  %s93_s19 = smov 48  ;;  %s98_s24 = smov 192  ;;  %vm170_vm10 = vcmask 392512   ;;  %vm192_vm11 = vcmask 326912  }
   0x9   :  { %v267_v18 = vld [vmem:[%s552_s0 + $0xa] ss:$16 sm:%s54_s9]   ;;  %v52_v19 = vsel %vm10_vm1, %v266_v17, %v47_v16  ;;  %v273_v22 = vld [vmem:[%s552_s0 + $0x8] ss:$16 sm:%s88_s18]   ;;  %s317_s25 = smov 80   ;;  %s107_s28 = smov 3 }
   0xa   :  { %v57_v21 = vsel %vm14_vm2, %v267_v18, %v52_v19  ;;  %v274_v23 = vld [vmem:[%s552_s0 + $0x8] ss:$16 sm:%s93_s19]   ;;  %v91_v24 = vsel %vm6_vm0, %v273_v22, %v272_v20  ;;  %s110_s29 = smov 12  ;;  %v276_v27 = vld [vmem:[%s552_s0 + $0x7] ss:$16 sm:%s107_s28]   ;;  %s115_s5 = smov 48 }
   0xb   :  { %58 = vrot.lane.b32.xlu0 %v57_v21, %s317_s25  ;;  %v275_v25 = vld [vmem:[%s552_s0 + $0x8] ss:$16 sm:%s98_s24]   ;;  %v96_v26 = vsel %vm10_vm1, %v274_v23, %v91_v24  ;;  %s120_s6 = smov 192  ;;  %s129_s11 = smov 3  ;;  %vm214_vm12 = vcmask 261312   ;;  %vm236_vm13 = vcmask 195712  }
   0xc   :  { %v277_v28 = vld [vmem:[%s552_s0 + $0x7] ss:$16 sm:%s110_s29]   ;;  %v101_v29 = vsel %vm14_vm2, %v275_v25, %v96_v26  ;;  %s318_s12 = smov 64   ;;  %v280_v34 = vld [vmem:[%s552_s0 + $0x6] ss:$16 sm:%s129_s11]   ;;  %s132_s15 = smov 12 }
   0xd   :  { %v113_v30 = vsel %vm6_vm0, %v277_v28, %v276_v27  ;;  %v278_v31 = vld [vmem:[%s552_s0 + $0x7] ss:$16 sm:%s115_s5]   ;;  %102 = vrot.lane.b32.xlu1 %v101_v29, %s318_s12  ;;  %s137_s16 = smov 48  ;;  %s142_s21 = smov 192  ;;  %vm258_vm14 = vcmask 130112  }
   0xe   :  { %v279_v32 = vld [vmem:[%s552_s0 + $0x7] ss:$16 sm:%s120_s6]   ;;  %v118_v33 = vsel %vm10_vm1, %v278_v31, %v113_v30  ;;  %v281_v36 = vld [vmem:[%s552_s0 + $0x6] ss:$16 sm:%s132_s15]   ;;  %s319_s22 = smov 56   ;;  %s151_s25 = smov 3 }
   0xf   :  { %v123_v35 = vsel %vm14_vm2, %v279_v32, %v118_v33  ;;  %v282_v37 = vld [vmem:[%s552_s0 + $0x6] ss:$16 sm:%s137_s16]   ;;  %v135_v38 = vsel %vm6_vm0, %v281_v36, %v280_v34  ;;  %s154_s26 = smov 12  ;;  %v284_v41 = vld [vmem:[%s552_s0 + $0x5] ss:$16 sm:%s151_s25]   ;;  %s159_s2 = smov 48 }
  0x10   :  { %124 = vrot.lane.b32.xlu0 %v123_v35, %s319_s22  ;;  %v283_v39 = vld [vmem:[%s552_s0 + $0x6] ss:$16 sm:%s142_s21]   ;;  %v140_v40 = vsel %vm10_vm1, %v282_v37, %v135_v38  ;;  %s164_s3 = smov 192  ;;  %s173_s8 = smov 3 }
  0x11   :  { %v285_v42 = vld [vmem:[%s552_s0 + $0x5] ss:$16 sm:%s154_s26]   ;;  %v145_v43 = vsel %vm14_vm2, %v283_v39, %v140_v40  ;;  %s320_s9 = smov 48   ;;  %v288_v48 = vld [vmem:[%s552_s0 + $0x4] ss:$16 sm:%s173_s8]   ;;  %s176_s12 = smov 12 }
  0x12   :  { %v157_v44 = vsel %vm6_vm0, %v285_v42, %v284_v41  ;;  %v286_v45 = vld [vmem:[%s552_s0 + $0x5] ss:$16 sm:%s159_s2]   ;;  %146 = vrot.lane.b32.xlu1 %v145_v43, %s320_s9  ;;  %s181_s13 = smov 48  ;;  %s186_s18 = smov 192 }
  0x13   :  { %v287_v46 = vld [vmem:[%s552_s0 + $0x5] ss:$16 sm:%s164_s3]   ;;  %v162_v47 = vsel %vm10_vm1, %v286_v45, %v157_v44  ;;  %v289_v50 = vld [vmem:[%s552_s0 + $0x4] ss:$16 sm:%s176_s12]   ;;  %s321_s19 = smov 40   ;;  %s195_s22 = smov 3 }
  0x14   :  { %v167_v49 = vsel %vm14_vm2, %v287_v46, %v162_v47  ;;  %v290_v51 = vld [vmem:[%s552_s0 + $0x4] ss:$16 sm:%s181_s13]   ;;  %v179_v52 = vsel %vm6_vm0, %v289_v50, %v288_v48  ;;  %s198_s23 = smov 12  ;;  %v292_v55 = vld [vmem:[%s552_s0 + $0x3] ss:$16 sm:%s195_s22]   ;;  %s203_s28 = smov 48 }
  0x15   :  { %168 = vrot.lane.b32.xlu0 %v167_v49, %s321_s19  ;;  %v291_v53 = vld [vmem:[%s552_s0 + $0x4] ss:$16 sm:%s186_s18]   ;;  %v184_v54 = vsel %vm10_vm1, %v290_v51, %v179_v52  ;;  %s208_s29 = smov 192  ;;  %s217_s5 = smov 3 }
  0x16   :  { %v293_v56 = vld [vmem:[%s552_s0 + $0x3] ss:$16 sm:%s198_s23]   ;;  %v189_v57 = vsel %vm14_vm2, %v291_v53, %v184_v54  ;;  %s322_s6 = smov 32   ;;  %v296_v62 = vld [vmem:[%s552_s0 + $0x2] ss:$16 sm:%s217_s5]   ;;  %s220_s9 = smov 12 }
  0x17   :  { %v201_v58 = vsel %vm6_vm0, %v293_v56, %v292_v55  ;;  %v294_v59 = vld [vmem:[%s552_s0 + $0x3] ss:$16 sm:%s203_s28]   ;;  %190 = vrot.lane.b32.xlu1 %v189_v57, %s322_s6  ;;  %s225_s10 = smov 48  ;;  %s230_s15 = smov 192 }
  0x18   :  { %v295_v60 = vld [vmem:[%s552_s0 + $0x3] ss:$16 sm:%s208_s29]   ;;  %v206_v61 = vsel %vm10_vm1, %v294_v59, %v201_v58  ;;  %v297_v0 = vld [vmem:[%s552_s0 + $0x2] ss:$16 sm:%s220_s9]   ;;  %s323_s16 = smov 24   ;;  %s239_s19 = smov 3 }
  0x19   :  { %v211_v63 = vsel %vm14_vm2, %v295_v60, %v206_v61  ;;  %v298_v1 = vld [vmem:[%s552_s0 + $0x2] ss:$16 sm:%s225_s10]   ;;  %v223_v2 = vsel %vm6_vm0, %v297_v0, %v296_v62  ;;  %s242_s20 = smov 12  ;;  %v300_v5 = vld [vmem:[%s552_s0 + $0x1] ss:$16 sm:%s239_s19]   ;;  %s247_s25 = smov 48 }
  0x1a   :  { %212 = vrot.lane.b32.xlu0 %v211_v63, %s323_s16  ;;  %v299_v3 = vld [vmem:[%s552_s0 + $0x2] ss:$16 sm:%s230_s15]   ;;  %v228_v4 = vsel %vm10_vm1, %v298_v1, %v223_v2  ;;  %s252_s26 = smov 192  ;;  %s2_s2 = smov 3 }
  0x1b   :  { %v301_v6 = vld [vmem:[%s552_s0 + $0x1] ss:$16 sm:%s242_s20]   ;;  %v233_v7 = vsel %vm14_vm2, %v299_v3, %v228_v4  ;;  %s324_s3 = smov 16   ;;  %s4_s4 = smov 12  ;;  %v3_v12 = vld [vmem:[%s552_s0] ss:$16 sm:%s2_s2]  }
  0x1c   :  { %v245_v8 = vsel %vm6_vm0, %v301_v6, %v300_v5  ;;  %v302_v9 = vld [vmem:[%s552_s0 + $0x1] ss:$16 sm:%s247_s25]   ;;  %234 = vrot.lane.b32.xlu1 %v233_v7, %s324_s3  ;;  %s8_s5 = smov 48  ;;  %s12_s8 = smov 192 }
  0x1d   :  { %v303_v10 = vld [vmem:[%s552_s0 + $0x1] ss:$16 sm:%s252_s26]   ;;  %v250_v11 = vsel %vm10_vm1, %v302_v9, %v245_v8  ;;  %v5_v14 = vld [vmem:[%s552_s0] ss:$16 sm:%s4_s4]   ;;  %s325_s13 = smov 8  }
  0x1e   :  { %v255_v13 = vsel %vm14_vm2, %v303_v10, %v250_v11  ;;  %v9_v15 = vld [vmem:[%s552_s0] ss:$16 sm:%s8_s5]   ;;  %v7_v16 = vsel %vm6_vm0, %v5_v14, %v3_v12 }
  0x1f   :  { %256 = vrot.lane.b32.xlu0 %v255_v13, %s325_s13  ;;  %v13_v17 = vld [vmem:[%s552_s0] ss:$16 sm:%s12_s8]   ;;  %v11_v18 = vsel %vm10_vm1, %v9_v15, %v7_v16 }
  0x20   :  { %v15_v19 = vsel %vm14_vm2, %v13_v17, %v11_v18 }
  0x21   :  { %17 = vst.msk [vmem:[%s553_s1] sm:$0xff] %vm16_vm3, %v15_v19  }
  0x78   :  { %v37_v20 = vpop.permute.xlu0 %36  }
  0x79   :  { %39 = vst.msk [vmem:[%s553_s1] sm:$0xff] %vm38_vm4, %v37_v20  }
  0x7a   :  { %v81_v21 = vpop.permute.xlu1 %80  }
  0x7d   :  { %v59_v22 = vpop.permute.xlu0 %58  }
  0x7e   :  { %61 = vst.msk [vmem:[%s553_s1] sm:$0xff] %vm60_vm5, %v59_v22  }
  0x7f   :  { %83 = vst.msk [vmem:[%s553_s1] sm:$0xff] %vm82_vm6, %v81_v21   ;;  %v103_v23 = vpop.permute.xlu1 %102  }
  0x80   :  { %105 = vst.msk [vmem:[%s553_s1] sm:$0xff] %vm104_vm7, %v103_v23  }
  0x82   :  { %v125_v24 = vpop.permute.xlu0 %124  }
  0x83   :  { %127 = vst.msk [vmem:[%s553_s1] sm:$0xff] %vm126_vm8, %v125_v24  }
  0x84   :  { %v147_v25 = vpop.permute.xlu1 %146  }
  0x85   :  { %149 = vst.msk [vmem:[%s553_s1] sm:$0xff] %vm148_vm9, %v147_v25  }
  0x87   :  { %v169_v26 = vpop.permute.xlu0 %168  }
  0x88   :  { %171 = vst.msk [vmem:[%s553_s1] sm:$0xff] %vm170_vm10, %v169_v26  }
  0x89   :  { %v191_v27 = vpop.permute.xlu1 %190  }
  0x8a   :  { %193 = vst.msk [vmem:[%s553_s1] sm:$0xff] %vm192_vm11, %v191_v27  }
  0x8c   :  { %v213_v28 = vpop.permute.xlu0 %212  }
  0x8d   :  { %215 = vst.msk [vmem:[%s553_s1] sm:$0xff] %vm214_vm12, %v213_v28  }
  0x8e   :  { %v235_v29 = vpop.permute.xlu1 %234  }
  0x8f   :  { %237 = vst.msk [vmem:[%s553_s1] sm:$0xff] %vm236_vm13, %v235_v29  }
  0x91   :  { %v257_v30 = vpop.permute.xlu0 %256  }
  0x92   :  { %259 = vst.msk [vmem:[%s553_s1] sm:$0xff] %vm258_vm14, %v257_v30  }

// kernel: tile.28
= control target key start
LH: loop header
LB: loop body
LE: loop exit
PB: predicated region body
PF: predicated region fallthrough
CT: control target
= control target key end

     0   :  { %s28_s0 = inlined_call_operand.vmem [shape: f32[2], index: 0, kind: input, shape index: {}]   ;;  %s29_s1 = inlined_call_operand.vmem [shape: f32[16,2], index: 1, kind: output, shape index: {}]  }
   0x1   :  { %v4_v0 = vld [vmem:[%s28_s0] ss:$0 sm:$0xff] }
   0x2   :  { %5 = vst [vmem:[%s29_s1] sm:$0xff] %v4_v0  ;;  %8 = vst [vmem:[%s29_s1 + $0x8] sm:$0xff] %v4_v0 }

// kernel: tile.29
= control target key start
LH: loop header
LB: loop body
LE: loop exit
PB: predicated region body
PF: predicated region fallthrough
CT: control target
= control target key end

     0   :  { %s131_s10 = smov 30   ;;  %s132_s11 = smov 26   ;;  %vm3_vm0 = vcmask 15360   ;;  %vm9_vm1 = vcmask 261360   ;;  %vm15_vm2 = vcmask 244960   ;;  %vm21_vm3 = vcmask 228560   ;;  %s207_s0 = inlined_call_operand.vmem [shape: f32[16,2], index: 0, kind: input, shape index: {}]   ;;  %s208_s1 = inlined_call_operand.vmem [shape: f32[1,32], index: 1, kind: output, shape index: {}]  }
   0x1   :  { %v101_v0 = vld [vmem:[%s207_s0 + $0xf] sm:$0x1]   ;;  %v103_v1 = vld [vmem:[%s207_s0 + $0xd] sm:$0x1]   ;;  %v102_v2 = vld [vmem:[%s207_s0 + $0xe] sm:$0x1]  }
   0x2   :  { %7 = vrot.lane.b32.xlu0 %v101_v0, %s131_s10  ;;  %19 = vrot.lane.b32.xlu1 %v103_v1, %s132_s11  ;;  %v104_v3 = vld [vmem:[%s207_s0 + $0xc] sm:$0x1]   ;;  %s133_s16 = smov 28   ;;  %s134_s17 = smov 24   ;;  %v105_v4 = vld [vmem:[%s207_s0 + $0xb] sm:$0x1]  }
   0x3   :  { %v106_v5 = vld [vmem:[%s207_s0 + $0xa] sm:$0x1]   ;;  %v2_v6 = vld [vmem:[%s207_s0] sm:$0x1]   ;;  %s135_s24 = smov 22   ;;  %s136_s25 = smov 20  }
   0x4   :  { %4 = vst.msk [vmem:[#allocation0] sm:$0x1] %vm3_vm0, %v2_v6   ;;  %v107_v7 = vld [vmem:[%s207_s0 + $0x9] sm:$0x1]   ;;  %v108_v8 = vld [vmem:[%s207_s0 + $0x8] sm:$0x1]  }
   0x5   :  { %s137_s30 = smov 18   ;;  %s138_s2 = smov 16   ;;  %v109_v9 = vld [vmem:[%s207_s0 + $0x7] sm:$0x1]   ;;  %v110_v10 = vld [vmem:[%s207_s0 + $0x6] sm:$0x1]  }
   0x6   :  { %13 = vrot.lane.b32.xlu0 %v102_v2, %s133_s16  ;;  %25 = vrot.lane.b32.xlu1 %v104_v3, %s134_s17  ;;  %s139_s7 = smov 14   ;;  %s140_s8 = smov 12   ;;  %v111_v11 = vld [vmem:[%s207_s0 + $0x5] sm:$0x1]   ;;  %v112_v12 = vld [vmem:[%s207_s0 + $0x4] sm:$0x1]  }
   0x7   :  { %s141_s13 = smov 10   ;;  %s142_s14 = smov 8   ;;  %v113_v13 = vld [vmem:[%s207_s0 + $0x3] sm:$0x1]   ;;  %v114_v14 = vld [vmem:[%s207_s0 + $0x2] sm:$0x1]  }
   0x8   :  { %s143_s19 = smov 6   ;;  %s144_s20 = smov 4   ;;  %v115_v15 = vld [vmem:[%s207_s0 + $0x1] sm:$0x1]   ;;  %vm27_vm4 = vcmask 212160   ;;  %vm33_vm5 = vcmask 195760  }
   0x9   :  { %s145_s0 = smov 2   ;;  %vm39_vm6 = vcmask 179360   ;;  %vm45_vm7 = vcmask 162960   ;;  %vm51_vm8 = vcmask 146560   ;;  %vm57_vm9 = vcmask 130160  }
   0xa   :  { %31 = vrot.lane.b32.xlu0 %v105_v4, %s135_s24  ;;  %37 = vrot.lane.b32.xlu1 %v106_v5, %s136_s25  ;;  %vm63_vm10 = vcmask 113760   ;;  %vm69_vm11 = vcmask 97360   ;;  %vm75_vm12 = vcmask 80960   ;;  %vm81_vm13 = vcmask 64560  }
   0xb   :  { %vm87_vm14 = vcmask 48160   ;;  %vm93_vm15 = vcmask 31760  }
   0xe   :  { %43 = vrot.lane.b32.xlu0 %v107_v7, %s137_s30  ;;  %49 = vrot.lane.b32.xlu1 %v108_v8, %s138_s2 }
  0x12   :  { %55 = vrot.lane.b32.xlu0 %v109_v9, %s139_s7  ;;  %61 = vrot.lane.b32.xlu1 %v110_v10, %s140_s8 }
  0x16   :  { %67 = vrot.lane.b32.xlu0 %v111_v11, %s141_s13  ;;  %73 = vrot.lane.b32.xlu1 %v112_v12, %s142_s14 }
  0x1a   :  { %79 = vrot.lane.b32.xlu0 %v113_v13, %s143_s19  ;;  %85 = vrot.lane.b32.xlu1 %v114_v14, %s144_s20 }
  0x1e   :  { %91 = vrot.lane.b32.xlu0 %v115_v15, %s145_s0 }
  0x74   :  { %v8_v16 = vpop.permute.xlu0 %7   ;;  %v20_v17 = vpop.permute.xlu1 %19  }
  0x75   :  { %10 = vst.msk [vmem:[#allocation0] sm:$0x1] %vm9_vm1, %v8_v16  }
  0x78   :  { %v14_v18 = vpop.permute.xlu0 %13   ;;  %v26_v19 = vpop.permute.xlu1 %25  }
  0x79   :  { %16 = vst.msk [vmem:[#allocation0] sm:$0x1] %vm15_vm2, %v14_v18  }
  0x7a   :  { %22 = vst.msk [vmem:[#allocation0] sm:$0x1] %vm21_vm3, %v20_v17  }
  0x7b   :  { %28 = vst.msk [vmem:[#allocation0] sm:$0x1] %vm27_vm4, %v26_v19  }
  0x7c   :  { %v32_v20 = vpop.permute.xlu0 %31   ;;  %v38_v21 = vpop.permute.xlu1 %37  }
  0x7d   :  { %34 = vst.msk [vmem:[#allocation0] sm:$0x1] %vm33_vm5, %v32_v20  }
  0x7e   :  { %40 = vst.msk [vmem:[#allocation0] sm:$0x1] %vm39_vm6, %v38_v21  }
  0x80   :  { %v44_v22 = vpop.permute.xlu0 %43   ;;  %v50_v23 = vpop.permute.xlu1 %49  }
  0x81   :  { %46 = vst.msk [vmem:[#allocation0] sm:$0x1] %vm45_vm7, %v44_v22  }
  0x82   :  { %52 = vst.msk [vmem:[#allocation0] sm:$0x1] %vm51_vm8, %v50_v23  }
  0x84   :  { %v56_v24 = vpop.permute.xlu0 %55   ;;  %v62_v25 = vpop.permute.xlu1 %61  }
  0x85   :  { %58 = vst.msk [vmem:[#allocation0] sm:$0x1] %vm57_vm9, %v56_v24  }
  0x86   :  { %64 = vst.msk [vmem:[#allocation0] sm:$0x1] %vm63_vm10, %v62_v25  }
  0x88   :  { %v68_v26 = vpop.permute.xlu0 %67   ;;  %v74_v27 = vpop.permute.xlu1 %73  }
  0x89   :  { %70 = vst.msk [vmem:[#allocation0] sm:$0x1] %vm69_vm11, %v68_v26  }
  0x8a   :  { %76 = vst.msk [vmem:[#allocation0] sm:$0x1] %vm75_vm12, %v74_v27  }
  0x8c   :  { %v80_v28 = vpop.permute.xlu0 %79   ;;  %v86_v29 = vpop.permute.xlu1 %85  }
  0x8d   :  { %82 = vst.msk [vmem:[#allocation0] sm:$0x1] %vm81_vm13, %v80_v28  }
  0x8e   :  { %88 = vst.msk [vmem:[#allocation0] sm:$0x1] %vm87_vm14, %v86_v29  }
  0x90   :  { %v92_v30 = vpop.permute.xlu0 %91  }
  0x91   :  { %94 = vst.msk [vmem:[#allocation0] sm:$0x1] %vm93_vm15, %v92_v30  }
  0x98   :  { %v98_v31 = vld [vmem:[#allocation0] sm:$0x1] }
  0x99   :  { %100 = vst [vmem:[%s208_s1] sm:$0x1] %v98_v31 }

// kernel: tile.33
= control target key start
LH: loop header
LB: loop body
LE: loop exit
PB: predicated region body
PF: predicated region fallthrough
CT: control target
= control target key end

     0   :  { %s28_s0 = inlined_call_operand.vmem [shape: f32[8], index: 0, kind: input, shape index: {}]   ;;  %s29_s1 = inlined_call_operand.vmem [shape: f32[14,8], index: 1, kind: output, shape index: {}]  }
   0x1   :  { %v4_v0 = vld [vmem:[%s28_s0] ss:$0 sm:$0xff] }
   0x2   :  { %5 = vst [vmem:[%s29_s1] sm:$0xff] %v4_v0  ;;  %8 = vst [vmem:[%s29_s1 + $0x8] sm:$0xff] %v4_v0 }

// kernel: tile.34
= control target key start
LH: loop header
LB: loop body
LE: loop exit
PB: predicated region body
PF: predicated region fallthrough
CT: control target
= control target key end

     0   :  { %s115_s10 = smov 104   ;;  %s116_s11 = smov 88   ;;  %vm3_vm0 = vcmask 64512   ;;  %vm9_vm1 = vcmask 917312   ;;  %vm15_vm2 = vcmask 851712   ;;  %vm21_vm3 = vcmask 786112   ;;  %s183_s0 = inlined_call_operand.vmem [shape: f32[14,8], index: 0, kind: input, shape index: {}]   ;;  %s184_s1 = inlined_call_operand.vmem [shape: f32[1,112], index: 1, kind: output, shape index: {}]  }
   0x1   :  { %v89_v0 = vld [vmem:[%s183_s0 + $0xd] sm:$0x1]   ;;  %v91_v1 = vld [vmem:[%s183_s0 + $0xb] sm:$0x1]   ;;  %v90_v2 = vld [vmem:[%s183_s0 + $0xc] sm:$0x1]  }
   0x2   :  { %7 = vrot.lane.b32.xlu0 %v89_v0, %s115_s10  ;;  %19 = vrot.lane.b32.xlu1 %v91_v1, %s116_s11  ;;  %v92_v3 = vld [vmem:[%s183_s0 + $0xa] sm:$0x1]   ;;  %s117_s16 = smov 96   ;;  %s118_s17 = smov 80   ;;  %v93_v4 = vld [vmem:[%s183_s0 + $0x9] sm:$0x1]  }
   0x3   :  { %v94_v5 = vld [vmem:[%s183_s0 + $0x8] sm:$0x1]   ;;  %v2_v6 = vld [vmem:[%s183_s0] sm:$0x1]   ;;  %s119_s24 = smov 72   ;;  %s120_s25 = smov 64  }
   0x4   :  { %4 = vst.msk [vmem:[#allocation0] sm:$0x1] %vm3_vm0, %v2_v6   ;;  %v95_v7 = vld [vmem:[%s183_s0 + $0x7] sm:$0x1]   ;;  %v96_v8 = vld [vmem:[%s183_s0 + $0x6] sm:$0x1]  }
   0x5   :  { %s121_s30 = smov 56   ;;  %s122_s2 = smov 48   ;;  %v97_v9 = vld [vmem:[%s183_s0 + $0x5] sm:$0x1]   ;;  %v98_v10 = vld [vmem:[%s183_s0 + $0x4] sm:$0x1]  }
   0x6   :  { %13 = vrot.lane.b32.xlu0 %v90_v2, %s117_s16  ;;  %25 = vrot.lane.b32.xlu1 %v92_v3, %s118_s17  ;;  %s123_s7 = smov 40   ;;  %s124_s8 = smov 32   ;;  %v99_v11 = vld [vmem:[%s183_s0 + $0x3] sm:$0x1]   ;;  %v100_v12 = vld [vmem:[%s183_s0 + $0x2] sm:$0x1]  }
   0x7   :  { %s125_s13 = smov 24   ;;  %s126_s14 = smov 16   ;;  %v101_v13 = vld [vmem:[%s183_s0 + $0x1] sm:$0x1]   ;;  %vm27_vm4 = vcmask 720512   ;;  %vm33_vm5 = vcmask 654912  }
   0x8   :  { %s127_s0 = smov 8   ;;  %vm39_vm6 = vcmask 589312   ;;  %vm45_vm7 = vcmask 523712   ;;  %vm51_vm8 = vcmask 458112   ;;  %vm57_vm9 = vcmask 392512  }
   0x9   :  { %vm63_vm10 = vcmask 326912   ;;  %vm69_vm11 = vcmask 261312   ;;  %vm75_vm12 = vcmask 195712   ;;  %vm81_vm13 = vcmask 130112  }
   0xa   :  { %31 = vrot.lane.b32.xlu0 %v93_v4, %s119_s24  ;;  %37 = vrot.lane.b32.xlu1 %v94_v5, %s120_s25 }
   0xe   :  { %43 = vrot.lane.b32.xlu0 %v95_v7, %s121_s30  ;;  %49 = vrot.lane.b32.xlu1 %v96_v8, %s122_s2 }
  0x12   :  { %55 = vrot.lane.b32.xlu0 %v97_v9, %s123_s7  ;;  %61 = vrot.lane.b32.xlu1 %v98_v10, %s124_s8 }
  0x16   :  { %67 = vrot.lane.b32.xlu0 %v99_v11, %s125_s13  ;;  %73 = vrot.lane.b32.xlu1 %v100_v12, %s126_s14 }
  0x1a   :  { %79 = vrot.lane.b32.xlu0 %v101_v13, %s127_s0 }
  0x74   :  { %v8_v14 = vpop.permute.xlu0 %7   ;;  %v20_v15 = vpop.permute.xlu1 %19  }
  0x75   :  { %10 = vst.msk [vmem:[#allocation0] sm:$0x1] %vm9_vm1, %v8_v14  }
  0x78   :  { %v14_v16 = vpop.permute.xlu0 %13   ;;  %v26_v17 = vpop.permute.xlu1 %25  }
  0x79   :  { %16 = vst.msk [vmem:[#allocation0] sm:$0x1] %vm15_vm2, %v14_v16  }
  0x7a   :  { %22 = vst.msk [vmem:[#allocation0] sm:$0x1] %vm21_vm3, %v20_v15  }
  0x7b   :  { %28 = vst.msk [vmem:[#allocation0] sm:$0x1] %vm27_vm4, %v26_v17  }
  0x7c   :  { %v32_v18 = vpop.permute.xlu0 %31   ;;  %v38_v19 = vpop.permute.xlu1 %37  }
  0x7d   :  { %34 = vst.msk [vmem:[#allocation0] sm:$0x1] %vm33_vm5, %v32_v18  }
  0x7e   :  { %40 = vst.msk [vmem:[#allocation0] sm:$0x1] %vm39_vm6, %v38_v19  }
  0x80   :  { %v44_v20 = vpop.permute.xlu0 %43   ;;  %v50_v21 = vpop.permute.xlu1 %49  }
  0x81   :  { %46 = vst.msk [vmem:[#allocation0] sm:$0x1] %vm45_vm7, %v44_v20  }
  0x82   :  { %52 = vst.msk [vmem:[#allocation0] sm:$0x1] %vm51_vm8, %v50_v21  }
  0x84   :  { %v56_v22 = vpop.permute.xlu0 %55   ;;  %v62_v23 = vpop.permute.xlu1 %61  }
  0x85   :  { %58 = vst.msk [vmem:[#allocation0] sm:$0x1] %vm57_vm9, %v56_v22  }
  0x86   :  { %64 = vst.msk [vmem:[#allocation0] sm:$0x1] %vm63_vm10, %v62_v23  }
  0x88   :  { %v68_v24 = vpop.permute.xlu0 %67   ;;  %v74_v25 = vpop.permute.xlu1 %73  }
  0x89   :  { %70 = vst.msk [vmem:[#allocation0] sm:$0x1] %vm69_vm11, %v68_v24  }
  0x8a   :  { %76 = vst.msk [vmem:[#allocation0] sm:$0x1] %vm75_vm12, %v74_v25  }
  0x8c   :  { %v80_v26 = vpop.permute.xlu0 %79  }
  0x8d   :  { %82 = vst.msk [vmem:[#allocation0] sm:$0x1] %vm81_vm13, %v80_v26  }
  0x94   :  { %v86_v27 = vld [vmem:[#allocation0] sm:$0x1] }
  0x95   :  { %88 = vst [vmem:[%s184_s1] sm:$0x1] %v86_v27 }

// kernel: tile.38
= control target key start
LH: loop header
LB: loop body
LE: loop exit
PB: predicated region body
PF: predicated region fallthrough
CT: control target
= control target key end

     0   :  { %s28_s0 = inlined_call_operand.vmem [shape: f32[8], index: 0, kind: input, shape index: {}]   ;;  %s29_s1 = inlined_call_operand.vmem [shape: f32[12,8], index: 1, kind: output, shape index: {}]  }
   0x1   :  { %v4_v0 = vld [vmem:[%s28_s0] ss:$0 sm:$0xff] }
   0x2   :  { %5 = vst [vmem:[%s29_s1] sm:$0xff] %v4_v0  ;;  %8 = vst [vmem:[%s29_s1 + $0x8] sm:$0xff] %v4_v0 }

// kernel: tile.39
= control target key start
LH: loop header
LB: loop body
LE: loop exit
PB: predicated region body
PF: predicated region fallthrough
CT: control target
= control target key end

     0   :  { %s99_s10 = smov 88   ;;  %s100_s11 = smov 72   ;;  %vm3_vm0 = vcmask 64512   ;;  %vm9_vm1 = vcmask 786112   ;;  %vm15_vm2 = vcmask 720512   ;;  %vm21_vm3 = vcmask 654912   ;;  %s159_s0 = inlined_call_operand.vmem [shape: f32[12,8], index: 0, kind: input, shape index: {}]   ;;  %s160_s1 = inlined_call_operand.vmem [shape: f32[1,96], index: 1, kind: output, shape index: {}]  }
   0x1   :  { %v77_v0 = vld [vmem:[%s159_s0 + $0xb] sm:$0x1]   ;;  %v79_v1 = vld [vmem:[%s159_s0 + $0x9] sm:$0x1]   ;;  %v78_v2 = vld [vmem:[%s159_s0 + $0xa] sm:$0x1]  }
   0x2   :  { %7 = vrot.lane.b32.xlu0 %v77_v0, %s99_s10  ;;  %19 = vrot.lane.b32.xlu1 %v79_v1, %s100_s11  ;;  %v80_v3 = vld [vmem:[%s159_s0 + $0x8] sm:$0x1]   ;;  %s101_s16 = smov 80   ;;  %s102_s17 = smov 64   ;;  %v81_v4 = vld [vmem:[%s159_s0 + $0x7] sm:$0x1]  }
   0x3   :  { %v2_v5 = vld [vmem:[%s159_s0] sm:$0x1]   ;;  %v82_v6 = vld [vmem:[%s159_s0 + $0x6] sm:$0x1]   ;;  %s103_s24 = smov 56   ;;  %s104_s25 = smov 48  }
   0x4   :  { %4 = vst.msk [vmem:[#allocation0] sm:$0x1] %vm3_vm0, %v2_v5   ;;  %v83_v7 = vld [vmem:[%s159_s0 + $0x5] sm:$0x1]   ;;  %v84_v8 = vld [vmem:[%s159_s0 + $0x4] sm:$0x1]  }
   0x5   :  { %s105_s30 = smov 40   ;;  %s106_s2 = smov 32   ;;  %v85_v9 = vld [vmem:[%s159_s0 + $0x3] sm:$0x1]   ;;  %v86_v10 = vld [vmem:[%s159_s0 + $0x2] sm:$0x1]  }
   0x6   :  { %13 = vrot.lane.b32.xlu0 %v78_v2, %s101_s16  ;;  %25 = vrot.lane.b32.xlu1 %v80_v3, %s102_s17  ;;  %s107_s7 = smov 24   ;;  %s108_s8 = smov 16   ;;  %v87_v11 = vld [vmem:[%s159_s0 + $0x1] sm:$0x1]   ;;  %vm27_vm4 = vcmask 589312   ;;  %vm33_vm5 = vcmask 523712  }
   0x7   :  { %s109_s0 = smov 8   ;;  %vm39_vm6 = vcmask 458112   ;;  %vm45_vm7 = vcmask 392512   ;;  %vm51_vm8 = vcmask 326912   ;;  %vm57_vm9 = vcmask 261312  }
   0x8   :  { %vm63_vm10 = vcmask 195712   ;;  %vm69_vm11 = vcmask 130112  }
   0xa   :  { %31 = vrot.lane.b32.xlu0 %v81_v4, %s103_s24  ;;  %37 = vrot.lane.b32.xlu1 %v82_v6, %s104_s25 }
   0xe   :  { %43 = vrot.lane.b32.xlu0 %v83_v7, %s105_s30  ;;  %49 = vrot.lane.b32.xlu1 %v84_v8, %s106_s2 }
  0x12   :  { %55 = vrot.lane.b32.xlu0 %v85_v9, %s107_s7  ;;  %61 = vrot.lane.b32.xlu1 %v86_v10, %s108_s8 }
  0x16   :  { %67 = vrot.lane.b32.xlu0 %v87_v11, %s109_s0 }
  0x74   :  { %v8_v12 = vpop.permute.xlu0 %7   ;;  %v20_v13 = vpop.permute.xlu1 %19  }
  0x75   :  { %10 = vst.msk [vmem:[#allocation0] sm:$0x1] %vm9_vm1, %v8_v12  }
  0x78   :  { %v14_v14 = vpop.permute.xlu0 %13   ;;  %v26_v15 = vpop.permute.xlu1 %25  }
  0x79   :  { %16 = vst.msk [vmem:[#allocation0] sm:$0x1] %vm15_vm2, %v14_v14  }
  0x7a   :  { %22 = vst.msk [vmem:[#allocation0] sm:$0x1] %vm21_vm3, %v20_v13  }
  0x7b   :  { %28 = vst.msk [vmem:[#allocation0] sm:$0x1] %vm27_vm4, %v26_v15  }
  0x7c   :  { %v32_v16 = vpop.permute.xlu0 %31   ;;  %v38_v17 = vpop.permute.xlu1 %37  }
  0x7d   :  { %34 = vst.msk [vmem:[#allocation0] sm:$0x1] %vm33_vm5, %v32_v16  }
  0x7e   :  { %40 = vst.msk [vmem:[#allocation0] sm:$0x1] %vm39_vm6, %v38_v17  }
  0x80   :  { %v44_v18 = vpop.permute.xlu0 %43   ;;  %v50_v19 = vpop.permute.xlu1 %49  }
  0x81   :  { %46 = vst.msk [vmem:[#allocation0] sm:$0x1] %vm45_vm7, %v44_v18  }
  0x82   :  { %52 = vst.msk [vmem:[#allocation0] sm:$0x1] %vm51_vm8, %v50_v19  }
  0x84   :  { %v56_v20 = vpop.permute.xlu0 %55   ;;  %v62_v21 = vpop.permute.xlu1 %61  }
  0x85   :  { %58 = vst.msk [vmem:[#allocation0] sm:$0x1] %vm57_vm9, %v56_v20  }
  0x86   :  { %64 = vst.msk [vmem:[#allocation0] sm:$0x1] %vm63_vm10, %v62_v21  }
  0x88   :  { %v68_v22 = vpop.permute.xlu0 %67  }
  0x89   :  { %70 = vst.msk [vmem:[#allocation0] sm:$0x1] %vm69_vm11, %v68_v22  }
  0x90   :  { %v74_v23 = vld [vmem:[#allocation0] sm:$0x1] }
  0x91   :  { %76 = vst [vmem:[%s160_s1] sm:$0x1] %v74_v23 }

// kernel: up_orig_forward.1
= control target key start
LH: loop header
LB: loop body
LE: loop exit
PB: predicated region body
PF: predicated region fallthrough
CT: control target
= control target key end

     0   :  { %vm75_vm0 = vcmask 523264   ;;  %vm173_vm1 = vcmask 261120   ;;  %v6064_v23 = vmov 0.0   ;;  %vm178_vm2 = vcmask 254976   ;;  %s6066_s30 = smov 126   ;;  %s6070_s27 = smov 120   ;;  %s7430_s2 = inlined_call_operand.vmem [shape: f32[64,32], index: 2, kind: input, shape index: {}]   ;;  %s7431_s0 = inlined_call_operand.vmem [shape: f32[32,64], index: 0, kind: input, shape index: {}]   ;;  %s7432_s1 = inlined_call_operand.vmem [shape: f32[28,28], index: 1, kind: input, shape index: {}]   ;;  %s7433_s4 = inlined_call_operand.vmem [shape: f32[9,28,112], index: 4, kind: input, shape index: {}]   ;;  %s7434_s5 = inlined_call_operand.vmem [shape: f32[9,28,112], index: 5, kind: input, shape index: {}]   ;;  %s7435_s3 = inlined_call_operand.vmem [shape: f32[1,32], index: 3, kind: input, shape index: {}]   ;;  %s7436_s9 = inlined_call_operand.vmem [shape: f32[112,8], index: 9, kind: input, shape index: {}]   ;;  %s7437_s6 = inlined_call_operand.vmem [shape: f32[1,112], index: 6, kind: input, shape index: {}]   ;;  %s7438_s10 = inlined_call_operand.vmem [shape: f32[8,112], index: 10, kind: input, shape index: {}]   ;;  %s7439_s11 = inlined_call_operand.vmem [shape: f32[9,96,96], index: 11, kind: input, shape index: {}]   ;;  %s7440_s7 = inlined_call_operand.vmem [shape: f32[1,8], index: 7, kind: input, shape index: {}]   ;;  %s7441_s8 = inlined_call_operand.vmem [shape: f32[1,8], index: 8, kind: input, shape index: {}]   ;;  %s7442_s15 = inlined_call_operand.vmem [shape: f32[96,8], index: 15, kind: input, shape index: {}]   ;;  %s7443_s12 = inlined_call_operand.vmem [shape: f32[1,96], index: 12, kind: input, shape index: {}]   ;;  %s7444_s16 = inlined_call_operand.vmem [shape: f32[8,96], index: 16, kind: input, shape index: {}]   ;;  %s7445_s13 = inlined_call_operand.vmem [shape: f32[1,8], index: 13, kind: input, shape index: {}]   ;;  %s7446_s14 = inlined_call_operand.vmem [shape: f32[1,8], index: 14, kind: input, shape index: {}]   ;;  %s7447_s17 = inlined_call_operand.vmem [shape: f32[24,96], index: 17, kind: output, shape index: {}]  }
   0x1   :  { %7450 = sst [smem:[#allocation5_spill]] %s7430_s2  ;;  %v185_v9 = vld [vmem:[%s7432_s1] sm:$0xff]  ;;  %v199_v10 = vld [vmem:[%s7432_s1 + $0xe] sm:$0xff]  ;;  %s6063_s2 = smov 2   ;;  %v186_v14 = vld [vmem:[%s7432_s1 + $0x8] sm:$0x3f] }
   0x2   :  { %7451 = sst [smem:[#allocation6_spill]] %s7431_s0  ;;  %s7452_s26 = sld [smem:[#allocation5_spill]]  ;;  %189 = vrot.lane.b32.xlu0 %v185_v9, %s6063_s2  ;;  %203 = vrot.lane.b32.xlu1 %v199_v10, %s6063_s2  ;;  %v200_v15 = vld [vmem:[%s7432_s1 + $0x16] sm:$0x3f]  ;;  %v227_v20 = vld [vmem:[%s7433_s4] sm:$0xff]  ;;  %180 = vst.msk [vmem:[#allocation3] sm:$0xff] %vm173_vm1, %v6064_v23 }
   0x3   :  { %s7453_s24 = sld [smem:[#allocation6_spill]]  ;;  %v228_v21 = vld [vmem:[%s7433_s4 + $0x8] sm:$0xff]  ;;  %181 = vst.msk [vmem:[#allocation3 + $0x8] sm:$0xff] %vm173_vm1, %v6064_v23  ;;  %182 = vst.msk [vmem:[#allocation3 + $0x10] sm:$0xff] %vm173_vm1, %v6064_v23  ;;  %v229_v24 = vld [vmem:[%s7433_s4 + $0x10] sm:$0xff]  ;;  %vm244_vm3 = vcmask 1043456  }
   0x4   :  { %v5468_v22 = vpack.c.bf16 %v228_v21, %v227_v20  ;;  %183 = vst.msk [vmem:[#allocation3 + $0x18] sm:$0xff] %vm173_vm1, %v6064_v23  ;;  %v230_v25 = vld [vmem:[%s7433_s4 + $0x18] sm:$0xf]  ;;  %vm6065_vm4 = vmmov 1   ;;  %v337_v28 = vld [vmem:[%s7434_s5] sm:$0xff]  ;;  %v338_v29 = vld [vmem:[%s7434_s5 + $0x8] sm:$0xff] }
   0x5   :  { %v5472_v26 = vpack.c.bf16 %v230_v25, %v229_v24  ;;  %179 = vst.msk [vmem:[#allocation2 + $0x20] sm:$0x3] %vm178_vm2, %v6064_v23  ;;  %184 = vst.msk [vmem:[#allocation3 + $0x20] sm:$0x3] %vm178_vm2, %v6064_v23  ;;  %v5478_v30 = vpack.c.bf16 %v338_v29, %v337_v28  ;;  %vm195_vm6 = vcmask 244752   ;;  %vm197_vm7 = vcmask 242704  }
   0x6   :  { %191 = vrot.lane.b32.xlu0 %v186_v14, %s6063_s2  ;;  %205 = vrot.lane.b32.xlu1 %v200_v15, %s6063_s2  ;;  %vm6236_vm5 = vmpackc.low %vm244_vm3, %vm6065_vm4  ;;  %v4107_v35 = vld [vmem:[%s7435_s3] ss:$0 sm:$0xff]  ;;  %v339_v44 = vld [vmem:[%s7434_s5 + $0x10] sm:$0xff]  ;;  %vm231_vm8 = vcmask 228352   ;;  %s6067_s1 = smov 124   ;;  %v6068_v21 = vmov 0.0|0.0  }
   0x7   :  { %5469 = vmatprep.subr.bf16.mxu1 %v5468_v22  ;;  %v340_v45 = vld [vmem:[%s7434_s5 + $0x18] sm:$0xf]  ;;  %v4123_v49 = vld [vmem:[%s7433_s4 + $0x20] sm:$0xff]  ;;  %v4124_v50 = vld [vmem:[%s7433_s4 + $0x28] sm:$0xff]  ;;  %vm6069_vm9 = vmmov 0   ;;  %vm2255_vm10 = vcmask 914432  }
   0x8   :  { %v60_v0 = vld [vmem:[%s7452_s26] sm:$0xff]  ;;  %v61_v1 = vld [vmem:[%s7452_s26 + $0x8] sm:$0xff]  ;;  %v62_v2 = vld [vmem:[%s7452_s26 + $0x10] sm:$0xff]  ;;  %5471 = vmatpush3.bf16.msra.mxu1 %v5468_v22  ;;  %v5482_v48 = vpack.c.bf16 %v340_v45, %v339_v44  ;;  %v5488_v54 = vpack.c.bf16 %v4124_v50, %v4123_v49  ;;  %vm2253_vm11 = vcmask 916480   ;;  %vm2473_vm12 = vcmask 64512  }
   0x9   :  { %v5452_v3 = vpack.c.bf16 %v61_v1, %v60_v0  ;;  %v63_v4 = vld [vmem:[%s7452_s26 + $0x18] sm:$0xff]  ;;  %v64_v6 = vld [vmem:[%s7452_s26 + $0x20] sm:$0xff]  ;;  %v65_v7 = vld [vmem:[%s7452_s26 + $0x28] sm:$0xff]  ;;  %5474 = vmatprep.subr.msk.bf16.mxu1 %vm6236_vm5, %v5472_v26  ;;  %vm2644_vm13 = vcmask 910336   ;;  %vm2670_vm14 = vcmask 785408   ;;  %vm3717_vm15 = vcmask 781312  }
   0xa   :  { %v5456_v5 = vpack.c.bf16 %v63_v4, %v62_v2  ;;  %v56_v8 = vld [vmem:[%s7453_s24] sm:$0xff]  ;;  %v5460_v11 = vpack.c.bf16 %v65_v7, %v64_v6  ;;  %v66_v12 = vld [vmem:[%s7452_s26 + $0x30] sm:$0xff]  ;;  %v67_v13 = vld [vmem:[%s7452_s26 + $0x38] sm:$0xff]  ;;  %2645 = vst.msk [vmem:[#allocation4 + $0x20] sm:$0x3] %vm2644_vm13, %v6064_v23 }
   0xb   :  { %5453 = vmatprep.subr.bf16.mxu0 %v5452_v3  ;;  %4788 = vmatprep.mubr.msk.f32.mxu0 %vm75_vm0, %v56_v8  ;;  %v5464_v16 = vpack.c.bf16 %v67_v13, %v66_v12  ;;  %v57_v17 = vld [vmem:[%s7453_s24 + $0x8] sm:$0xff]  ;;  %v58_v18 = vld [vmem:[%s7453_s24 + $0x10] sm:$0xff]  ;;  %v59_v19 = vld [vmem:[%s7453_s24 + $0x18] sm:$0xff] }
   0xc   :  { %5455 = vmatpush3.bf16.msra.mxu0 %v5452_v3  ;;  %5477 = vmatpush3.bf16.msk.msra.mxu1 %vm6236_vm5, %v5472_v26  ;;  %v4125_v55 = vld [vmem:[%s7433_s4 + $0x30] sm:$0xff]  ;;  %v4126_v56 = vld [vmem:[%s7433_s4 + $0x38] sm:$0xf]  ;;  %v4132_v60 = vld [vmem:[%s7434_s5 + $0x20] sm:$0xff] }
   0xd   :  { %5457 = vmatprep.subr.bf16.mxu0 %v5456_v5  ;;  %5479 = vmatprep.subr.bf16.mxu1 %v5478_v30  ;;  %v5492_v59 = vpack.c.bf16 %v4126_v56, %v4125_v55  ;;  %v4133_v61 = vld [vmem:[%s7434_s5 + $0x28] sm:$0xff]  ;;  %v4141_v26 = vld [vmem:[%s7433_s4 + $0x40] sm:$0xff]  ;;  %v2301_v27 = vld [vmem:[%s7436_s9 + $0x10] sm:$0xff] }
   0xe   :  { %v6301_v63 = vpack.c.bf16 %v4133_v61, %v4132_v60  ;;  %v2300_v20 = vld [vmem:[%s7436_s9 + $0x8] sm:$0xff] }
   0xf   :  { %v4142_v28 = vld [vmem:[%s7433_s4 + $0x48] sm:$0xff] }
  0x10   :  { %5459 = vmatpush3.bf16.msra.mxu0 %v5456_v5 }
  0x11   :  { %5461 = vmatprep.subr.bf16.mxu0 %v5460_v11 }
  0x14   :  { %5463 = vmatpush3.bf16.msra.mxu0 %v5460_v11 }
  0x15   :  { %5465 = vmatprep.subr.bf16.mxu0 %v5464_v16 }
  0x18   :  { %5467 = vmatpush3.bf16.msra.mxu0 %v5464_v16  ;;  %v4134_v16 = vld [vmem:[%s7434_s5 + $0x30] sm:$0xff] }
  0x19   :  { %5669 = vmatprep.subr.bf16.mxu0 %v6068_v21 }
  0x1b   :  { %4789 = vmatmul.mubr.msk.f32.vlgmr.msra.gmra.mrb[0].mxu0 %vm75_vm0, %v57_v17  ;;  %v4135_v17 = vld [vmem:[%s7434_s5 + $0x38] sm:$0xf] }
  0x1c   :  { %4791 = vmatprep.mubr.msk.f32.mxu0 %vm75_vm0, %v58_v18  ;;  %v5502_v24 = vpack.c.bf16 %v4135_v17, %v4134_v16 }
  0x1f   :  { %4792 = vmatmul.mubr.msk.f32.gmra.mrb[2].mxu0 %vm75_vm0, %v59_v19  ;;  %v2299_v19 = vld [vmem:[%s7436_s9] sm:$0xff] }
  0x20   :  { %v6425_v25 = vpack.c.bf16 %v2300_v20, %v2299_v19  ;;  %v4178_v19 = vld [vmem:[%s7433_s4 + $0x88] sm:$0xff]  ;;  %5105 = vmatprep.mubr.msk.f32.mxu0 %vm6069_vm9, %v6064_v23 }
  0x22   :  { %5671 = vmatpush3.bf16.msra.mxu0 %v6425_v25 }
  0x23   :  { %5672 = vmatprep.subr.bf16.mxu0 %v6068_v21 }
  0x74   :  { %v190_v31 = vpop.permute.xlu0 %189  ;;  %v204_v32 = vpop.permute.xlu1 %203 }
  0x75   :  { %196 = vst.msk [vmem:[#allocation3 + $0x1] sm:$0xff] %vm195_vm6, %v190_v31  ;;  %209 = vst.msk [vmem:[#allocation3 + $0x11] sm:$0xff] %vm195_vm6, %v204_v32  ;;  %v5508_v31 = vpack.c.bf16 %v4142_v28, %v4141_v26  ;;  %v4143_v32 = vld [vmem:[%s7433_s4 + $0x50] sm:$0xff]  ;;  %v4186_v28 = vld [vmem:[%s7434_s5 + $0x80] sm:$0xff] }
  0x78   :  { %v192_v33 = vpop.permute.xlu0 %191  ;;  %v206_v34 = vpop.permute.xlu1 %205 }
  0x79   :  { %198 = vst.msk [vmem:[#allocation3 + $0x9] sm:$0x3f] %vm197_vm7, %v192_v33  ;;  %210 = vst.msk [vmem:[#allocation3 + $0x19] sm:$0x3f] %vm197_vm7, %v206_v34  ;;  %v4144_v33 = vld [vmem:[%s7433_s4 + $0x58] sm:$0xf] }
  0x7c   :  { %v223_v53 = vld [vmem:[#allocation3] sm:$0xff]  ;;  %v225_v58 = vld [vmem:[#allocation3 + $0x10] sm:$0xff] }
  0x7d   :  { %v6336_v5 = vld [vmem:[#allocation3 + $0x1] sm:$0xff]  ;;  %v6344_v7 = vld [vmem:[#allocation3 + $0x11] sm:$0xff] }
  0x80   :  { %v224_v57 = vld [vmem:[#allocation3 + $0x8] sm:$0xff]  ;;  %v226_v62 = vld [vmem:[#allocation3 + $0x18] sm:$0xff] }
  0x81   :  { %v6332_v4 = vld [vmem:[#allocation3 + $0x9] sm:$0xff]  ;;  %v6340_v6 = vld [vmem:[#allocation3 + $0x19] sm:$0xff] }
  0x82   :  { %v6380_v12 = vld [vmem:[#allocation3 + $0xa] sm:$0xff]  ;;  %v6384_v13 = vld [vmem:[#allocation3 + $0x2] sm:$0xff]  ;;  %v6388_v14 = vld [vmem:[#allocation3 + $0x1a] sm:$0xff] }
  0x83   :  { %v6392_v15 = vld [vmem:[#allocation3 + $0x12] sm:$0xff] }
  0xee   :  { %v4790_v36 = vpop.f32.mrb[0].mxu0 }
  0xef   :  { %v160_v37 = vadd.f32 %v4790_v36, %v4107_v35  ;;  %v154_v38 = vpop.f32.mrb[1].mxu0  ;;  %v5512_v36 = vpack.c.bf16 %v4144_v33, %v4143_v32  ;;  %v4195_v32 = vld [vmem:[%s7433_s4 + $0xa0] sm:$0xff]  ;;  %v4196_v33 = vld [vmem:[%s7433_s4 + $0xa8] sm:$0xff] }
  0xf0   :  { %v155_v39 = vadd.f32 %v4107_v35, %v154_v38  ;;  %v4151_v38 = vld [vmem:[%s7434_s5 + $0x48] sm:$0xff] }
  0xf1   :  { %175 = vst.msk [vmem:[#allocation2 + $0x8] sm:$0xff] %vm173_vm1, %v160_v37  ;;  %v4150_v37 = vld [vmem:[%s7434_s5 + $0x40] sm:$0xff] }
  0xf2   :  { %174 = vst.msk [vmem:[#allocation2] sm:$0xff] %vm173_vm1, %v155_v39  ;;  %v4793_v40 = vpop.f32.mrb[2].mxu0 }
  0xf3   :  { %v170_v41 = vadd.f32 %v4793_v40, %v4107_v35  ;;  %v164_v42 = vpop.f32.mrb[3].mxu0 }
  0xf4   :  { %v165_v43 = vadd.f32 %v4107_v35, %v164_v42  ;;  %v4152_v42 = vld [vmem:[%s7434_s5 + $0x50] sm:$0xff] }
  0xf5   :  { %177 = vst.msk [vmem:[#allocation2 + $0x18] sm:$0xff] %vm173_vm1, %v170_v41  ;;  %v5518_v41 = vpack.c.bf16 %v4151_v38, %v4150_v37  ;;  %v4198_v37 = vld [vmem:[%s7433_s4 + $0xb8] sm:$0xf] }
  0xf6   :  { %176 = vst.msk [vmem:[#allocation2 + $0x10] sm:$0xff] %vm173_vm1, %v165_v43  ;;  %v4153_v43 = vld [vmem:[%s7434_s5 + $0x58] sm:$0xf] }
  0xf8   :  { %v220_v46 = vld [vmem:[#allocation2 + $0x8] sm:$0xff] }
  0xf9   :  { %452 = vrot.lane.b32.xlu1 %v220_v46, %s6066_s30  ;;  %v219_v47 = vld [vmem:[#allocation2] sm:$0xff] }
  0xfa   :  { %450 = vrot.lane.b32.xlu0 %v219_v47, %s6066_s30  ;;  %4802 = vmatprep.mubr.msk.f32.mxu1 %vm231_vm8, %v219_v47  ;;  %v6320_v1 = vld [vmem:[#allocation2 + $0x1] sm:$0xff] }
  0xfb   :  { %4803 = vmatmul.mubr.msk.f32.vlgmr.msra.gmra.mrb[0].mxu1 %vm231_vm8, %v220_v46  ;;  %v6368_v9 = vld [vmem:[#allocation2 + $0x2] sm:$0xff] }
  0xfc   :  { %5481 = vmatpush3.bf16.msra.mxu1 %v5478_v30  ;;  %v222_v51 = vld [vmem:[#allocation2 + $0x18] sm:$0xff] }
  0xfd   :  { %456 = vrot.lane.b32.xlu1 %v222_v51, %s6066_s30  ;;  %v221_v52 = vld [vmem:[#allocation2 + $0x10] sm:$0xff]  ;;  %5484 = vmatprep.subr.msk.bf16.mxu1 %vm6236_vm5, %v5482_v48  ;;  %v6324_v2 = vld [vmem:[#allocation2 + $0x19] sm:$0xff] }
  0xfe   :  { %454 = vrot.lane.b32.xlu0 %v221_v52, %s6066_s30  ;;  %4805 = vmatprep.mubr.msk.f32.mxu1 %vm231_vm8, %v221_v52  ;;  %v6316_v0 = vld [vmem:[#allocation2 + $0x9] sm:$0xff]  ;;  %v6328_v3 = vld [vmem:[#allocation2 + $0x11] sm:$0xff]  ;;  %v6372_v10 = vld [vmem:[#allocation2 + $0x1a] sm:$0xff] }
  0xff   :  { %4806 = vmatmul.mubr.msk.f32.gmra.mrb[2].mxu1 %vm231_vm8, %v222_v51  ;;  %v6364_v8 = vld [vmem:[#allocation2 + $0xa] sm:$0xff]  ;;  %v6376_v11 = vld [vmem:[#allocation2 + $0x12] sm:$0xff] }
 0x100   :  { %5487 = vmatpush3.bf16.msk.msra.mxu1 %vm6236_vm5, %v5482_v48  ;;  %4816 = vmatprep.mubr.msk.f32.mxu1 %vm231_vm8, %v223_v53  ;;  %v4160_v48 = vld [vmem:[%s7433_s4 + $0x68] sm:$0xff] }
 0x101   :  { %565 = vrot.lane.b32.xlu1 %v224_v57, %s6066_s30  ;;  %5489 = vmatprep.subr.bf16.mxu1 %v5488_v54 }
 0x102   :  { %563 = vrot.lane.b32.xlu0 %v223_v53, %s6066_s30 }
 0x103   :  { %4817 = vmatmul.mubr.msk.f32.vlgmr.msra.gmra.mrb[0].mxu1 %vm231_vm8, %v224_v57 }
 0x104   :  { %4819 = vmatprep.mubr.msk.f32.mxu1 %vm231_vm8, %v225_v58  ;;  %5491 = vmatpush3.bf16.msra.mxu1 %v5488_v54 }
 0x105   :  { %569 = vrot.lane.b32.xlu1 %v226_v62, %s6066_s30  ;;  %5494 = vmatprep.subr.msk.bf16.mxu1 %vm6236_vm5, %v5492_v59 }
 0x106   :  { %567 = vrot.lane.b32.xlu0 %v225_v58, %s6066_s30 }
 0x107   :  { %4820 = vmatmul.mubr.msk.f32.gmra.mrb[2].mxu1 %vm231_vm8, %v226_v62 }
 0x108   :  { %5497 = vmatpush3.bf16.msk.msra.mxu1 %vm6236_vm5, %v5492_v59 }
 0x109   :  { %678 = vrot.lane.b32.xlu1 %v220_v46, %s6067_s1  ;;  %5499 = vmatprep.subr.bf16.mxu1 %v6301_v63  ;;  %v5522_v46 = vpack.c.bf16 %v4153_v43, %v4152_v42 }
 0x10a   :  { %676 = vrot.lane.b32.xlu0 %v219_v47, %s6067_s1  ;;  %v4159_v47 = vld [vmem:[%s7433_s4 + $0x60] sm:$0xff] }
 0x10d   :  { %682 = vrot.lane.b32.xlu1 %v222_v51, %s6067_s1  ;;  %v5528_v51 = vpack.c.bf16 %v4160_v48, %v4159_v47 }
 0x10e   :  { %680 = vrot.lane.b32.xlu0 %v221_v52, %s6067_s1  ;;  %v4161_v52 = vld [vmem:[%s7433_s4 + $0x70] sm:$0xff] }
 0x111   :  { %791 = vrot.lane.b32.xlu1 %v224_v57, %s6067_s1  ;;  %v4168_v57 = vld [vmem:[%s7434_s5 + $0x60] sm:$0xff] }
 0x112   :  { %789 = vrot.lane.b32.xlu0 %v223_v53, %s6067_s1  ;;  %v4162_v53 = vld [vmem:[%s7433_s4 + $0x78] sm:$0xf] }
 0x113   :  { %v5532_v56 = vpack.c.bf16 %v4162_v53, %v4161_v52  ;;  %v4215_v53 = vld [vmem:[%s7433_s4 + $0xd0] sm:$0xff] }
 0x115   :  { %795 = vrot.lane.b32.xlu1 %v226_v62, %s6067_s1  ;;  %v4170_v62 = vld [vmem:[%s7434_s5 + $0x70] sm:$0xff] }
 0x116   :  { %793 = vrot.lane.b32.xlu0 %v225_v58, %s6067_s1  ;;  %v4169_v58 = vld [vmem:[%s7434_s5 + $0x68] sm:$0xff] }
 0x117   :  { %v5538_v60 = vpack.c.bf16 %v4169_v58, %v4168_v57  ;;  %v4222_v57 = vld [vmem:[%s7434_s5 + $0xc0] sm:$0xff]  ;;  %v4223_v58 = vld [vmem:[%s7434_s5 + $0xc8] sm:$0xff] }
 0x119   :  { %1130 = vrot.lane.b32.xlu1 %v6316_v0, %s6066_s30 }
 0x11a   :  { %1128 = vrot.lane.b32.xlu0 %v6320_v1, %s6066_s30 }
 0x11d   :  { %1134 = vrot.lane.b32.xlu1 %v6324_v2, %s6066_s30 }
 0x11e   :  { %1132 = vrot.lane.b32.xlu0 %v6328_v3, %s6066_s30 }
 0x121   :  { %1243 = vrot.lane.b32.xlu1 %v6332_v4, %s6066_s30 }
 0x122   :  { %1241 = vrot.lane.b32.xlu0 %v6336_v5, %s6066_s30 }
 0x125   :  { %1247 = vrot.lane.b32.xlu1 %v6340_v6, %s6066_s30 }
 0x126   :  { %1245 = vrot.lane.b32.xlu0 %v6344_v7, %s6066_s30 }
 0x129   :  { %1356 = vrot.lane.b32.xlu1 %v6316_v0, %s6067_s1 }
 0x12a   :  { %1354 = vrot.lane.b32.xlu0 %v6320_v1, %s6067_s1 }
 0x12d   :  { %1360 = vrot.lane.b32.xlu1 %v6324_v2, %s6067_s1 }
 0x12e   :  { %1358 = vrot.lane.b32.xlu0 %v6328_v3, %s6067_s1 }
 0x131   :  { %1469 = vrot.lane.b32.xlu1 %v6332_v4, %s6067_s1 }
 0x132   :  { %1467 = vrot.lane.b32.xlu0 %v6336_v5, %s6067_s1 }
 0x135   :  { %1473 = vrot.lane.b32.xlu1 %v6340_v6, %s6067_s1 }
 0x136   :  { %1471 = vrot.lane.b32.xlu0 %v6344_v7, %s6067_s1 }
 0x139   :  { %1808 = vrot.lane.b32.xlu1 %v6364_v8, %s6066_s30 }
 0x13a   :  { %1806 = vrot.lane.b32.xlu0 %v6368_v9, %s6066_s30 }
 0x13d   :  { %1812 = vrot.lane.b32.xlu1 %v6372_v10, %s6066_s30 }
 0x13e   :  { %1810 = vrot.lane.b32.xlu0 %v6376_v11, %s6066_s30 }
 0x141   :  { %1921 = vrot.lane.b32.xlu1 %v6380_v12, %s6066_s30 }
 0x142   :  { %1919 = vrot.lane.b32.xlu0 %v6384_v13, %s6066_s30 }
 0x145   :  { %1925 = vrot.lane.b32.xlu1 %v6388_v14, %s6066_s30 }
 0x146   :  { %1923 = vrot.lane.b32.xlu0 %v6392_v15, %s6066_s30 }
 0x149   :  { %2034 = vrot.lane.b32.xlu1 %v6364_v8, %s6067_s1 }
 0x14a   :  { %2032 = vrot.lane.b32.xlu0 %v6368_v9, %s6067_s1 }
 0x14d   :  { %2038 = vrot.lane.b32.xlu1 %v6372_v10, %s6067_s1 }
 0x14e   :  { %2036 = vrot.lane.b32.xlu0 %v6376_v11, %s6067_s1 }
 0x151   :  { %2147 = vrot.lane.b32.xlu1 %v6380_v12, %s6067_s1 }
 0x152   :  { %2145 = vrot.lane.b32.xlu0 %v6384_v13, %s6067_s1 }
 0x155   :  { %2151 = vrot.lane.b32.xlu1 %v6388_v14, %s6067_s1 }
 0x156   :  { %2149 = vrot.lane.b32.xlu0 %v6392_v15, %s6067_s1 }
 0x16b   :  { %v453_v18 = vpop.permute.xlu1 %452 }
 0x16c   :  { %v451_v22 = vpop.permute.xlu0 %450 }
 0x16d   :  { %4830 = vmatprep.mubr.msk.f32.mxu1 %vm231_vm8, %v451_v22  ;;  %v4179_v22 = vld [vmem:[%s7433_s4 + $0x90] sm:$0xff] }
 0x16e   :  { %4831 = vmatmul.mubr.msk.f32.vlgmr.msra.gmra.mrb[0].mxu1 %vm231_vm8, %v453_v18  ;;  %v4177_v18 = vld [vmem:[%s7433_s4 + $0x80] sm:$0xff] }
 0x16f   :  { %5501 = vmatpush3.bf16.msra.mxu1 %v6301_v63  ;;  %v457_v29 = vpop.permute.xlu1 %456  ;;  %v4171_v63 = vld [vmem:[%s7434_s5 + $0x78] sm:$0xf] }
 0x170   :  { %v455_v30 = vpop.permute.xlu0 %454  ;;  %5504 = vmatprep.subr.msk.bf16.mxu1 %vm6236_vm5, %v5502_v24  ;;  %v5542_v17 = vpack.c.bf16 %v4171_v63, %v4170_v62  ;;  %v4224_v62 = vld [vmem:[%s7434_s5 + $0xd0] sm:$0xff]  ;;  %v4225_v63 = vld [vmem:[%s7434_s5 + $0xd8] sm:$0xf] }
 0x171   :  { %4833 = vmatprep.mubr.msk.f32.mxu1 %vm231_vm8, %v455_v30  ;;  %v4188_v30 = vld [vmem:[%s7434_s5 + $0x90] sm:$0xff] }
 0x172   :  { %4834 = vmatmul.mubr.msk.f32.gmra.mrb[2].mxu1 %vm231_vm8, %v457_v29  ;;  %v4187_v29 = vld [vmem:[%s7434_s5 + $0x88] sm:$0xff] }
 0x173   :  { %5507 = vmatpush3.bf16.msk.msra.mxu1 %vm6236_vm5, %v5502_v24  ;;  %v566_v34 = vpop.permute.xlu1 %565  ;;  %v4180_v24 = vld [vmem:[%s7433_s4 + $0x98] sm:$0xf] }
 0x174   :  { %v564_v35 = vpop.permute.xlu0 %563  ;;  %5509 = vmatprep.subr.bf16.mxu1 %v5508_v31 }
 0x175   :  { %4844 = vmatprep.mubr.msk.f32.mxu1 %vm231_vm8, %v564_v35 }
 0x176   :  { %4845 = vmatmul.mubr.msk.f32.vlgmr.msra.gmra.mrb[0].mxu1 %vm231_vm8, %v566_v34 }
 0x177   :  { %5511 = vmatpush3.bf16.msra.mxu1 %v5508_v31  ;;  %v570_v39 = vpop.permute.xlu1 %569  ;;  %v4189_v31 = vld [vmem:[%s7434_s5 + $0x98] sm:$0xf] }
 0x178   :  { %v568_v40 = vpop.permute.xlu0 %567  ;;  %5514 = vmatprep.subr.msk.bf16.mxu1 %vm6236_vm5, %v5512_v36 }
 0x179   :  { %4847 = vmatprep.mubr.msk.f32.mxu1 %vm231_vm8, %v568_v40  ;;  %v4204_v40 = vld [vmem:[%s7434_s5 + $0xa0] sm:$0xff] }
 0x17a   :  { %4848 = vmatmul.mubr.msk.f32.gmra.mrb[2].mxu1 %vm231_vm8, %v570_v39 }
 0x17b   :  { %5517 = vmatpush3.bf16.msk.msra.mxu1 %vm6236_vm5, %v5512_v36  ;;  %v679_v44 = vpop.permute.xlu1 %678  ;;  %v4197_v36 = vld [vmem:[%s7433_s4 + $0xb0] sm:$0xff] }
 0x17c   :  { %v677_v45 = vpop.permute.xlu0 %676  ;;  %5519 = vmatprep.subr.bf16.mxu1 %v5518_v41  ;;  %v5572_v39 = vpack.c.bf16 %v4198_v37, %v4197_v36  ;;  %v4260_v36 = vld [vmem:[%s7434_s5 + $0x110] sm:$0xff]  ;;  %v4261_v37 = vld [vmem:[%s7434_s5 + $0x118] sm:$0xf] }
 0x17d   :  { %4858 = vmatprep.mubr.msk.f32.mxu1 %vm231_vm8, %v677_v45  ;;  %v4207_v45 = vld [vmem:[%s7434_s5 + $0xb8] sm:$0xf] }
 0x17e   :  { %4859 = vmatmul.mubr.msk.f32.vlgmr.msra.gmra.mrb[0].mxu1 %vm231_vm8, %v679_v44  ;;  %v4206_v44 = vld [vmem:[%s7434_s5 + $0xb0] sm:$0xff] }
 0x17f   :  { %5521 = vmatpush3.bf16.msra.mxu1 %v5518_v41  ;;  %v683_v49 = vpop.permute.xlu1 %682  ;;  %v4205_v41 = vld [vmem:[%s7434_s5 + $0xa8] sm:$0xff]  ;;  %v5582_v47 = vpack.c.bf16 %v4207_v45, %v4206_v44  ;;  %v2302_v45 = vld [vmem:[%s7436_s9 + $0x18] sm:$0xff] }
 0x180   :  { %v681_v50 = vpop.permute.xlu0 %680  ;;  %5524 = vmatprep.subr.msk.bf16.mxu1 %vm6236_vm5, %v5522_v46  ;;  %v5578_v43 = vpack.c.bf16 %v4205_v41, %v4204_v40 }
 0x181   :  { %4861 = vmatprep.mubr.msk.f32.mxu1 %vm231_vm8, %v681_v50  ;;  %v4214_v50 = vld [vmem:[%s7433_s4 + $0xc8] sm:$0xff] }
 0x182   :  { %4862 = vmatmul.mubr.msk.f32.gmra.mrb[2].mxu1 %vm231_vm8, %v683_v49  ;;  %v4213_v49 = vld [vmem:[%s7433_s4 + $0xc0] sm:$0xff] }
 0x183   :  { %5527 = vmatpush3.bf16.msk.msra.mxu1 %vm6236_vm5, %v5522_v46  ;;  %v792_v54 = vpop.permute.xlu1 %791  ;;  %v5588_v52 = vpack.c.bf16 %v4214_v50, %v4213_v49  ;;  %v2305_v49 = vld [vmem:[%s7436_s9 + $0x30] sm:$0xff]  ;;  %v2306_v50 = vld [vmem:[%s7436_s9 + $0x38] sm:$0xff] }
 0x184   :  { %v790_v55 = vpop.permute.xlu0 %789  ;;  %5529 = vmatprep.subr.bf16.mxu1 %v5528_v51 }
 0x185   :  { %4872 = vmatprep.mubr.msk.f32.mxu1 %vm231_vm8, %v790_v55 }
 0x186   :  { %4873 = vmatmul.mubr.msk.f32.vlgmr.msra.gmra.mrb[0].mxu1 %vm231_vm8, %v792_v54  ;;  %v4216_v54 = vld [vmem:[%s7433_s4 + $0xd8] sm:$0xf] }
 0x187   :  { %5531 = vmatpush3.bf16.msra.mxu1 %v5528_v51  ;;  %v796_v61 = vpop.permute.xlu1 %795 }
 0x188   :  { %v794_v59 = vpop.permute.xlu0 %793  ;;  %5534 = vmatprep.subr.msk.bf16.mxu1 %vm6236_vm5, %v5532_v56 }
 0x189   :  { %4875 = vmatprep.mubr.msk.f32.mxu1 %vm231_vm8, %v794_v59 }
 0x18a   :  { %4876 = vmatmul.mubr.msk.f32.gmra.mrb[2].mxu1 %vm231_vm8, %v796_v61 }
 0x18b   :  { %5537 = vmatpush3.bf16.msk.msra.mxu1 %vm6236_vm5, %v5532_v56  ;;  %4886 = vmatprep.mubr.msk.f32.mxu1 %vm231_vm8, %v6320_v1  ;;  %v1131_v20 = vpop.permute.xlu1 %1130  ;;  %v5548_v1 = vpack.c.bf16 %v4178_v19, %v4177_v18  ;;  %v5592_v56 = vpack.c.bf16 %v4216_v54, %v4215_v53  ;;  %v4231_v18 = vld [vmem:[%s7433_s4 + $0xe0] sm:$0xff]  ;;  %v4232_v19 = vld [vmem:[%s7433_s4 + $0xe8] sm:$0xff] }
 0x18c   :  { %v1129_v16 = vpop.permute.xlu0 %1128  ;;  %5539 = vmatprep.subr.bf16.mxu1 %v5538_v60  ;;  %v2308_v53 = vld [vmem:[%s7436_s9 + $0x48] sm:$0xff] }
 0x18e   :  { %4887 = vmatmul.mubr.msk.f32.vlgmr.msra.gmra.mrb[0].mxu1 %vm231_vm8, %v6316_v0  ;;  %v5552_v0 = vpack.c.bf16 %v4180_v24, %v4179_v22  ;;  %v4234_v22 = vld [vmem:[%s7433_s4 + $0xf8] sm:$0xf] }
 0x18f   :  { %5541 = vmatpush3.bf16.msra.mxu1 %v5538_v60  ;;  %4889 = vmatprep.mubr.msk.f32.mxu1 %vm231_vm8, %v6328_v3  ;;  %v1135_v3 = vpop.permute.xlu1 %1134  ;;  %v5598_v60 = vpack.c.bf16 %v4223_v58, %v4222_v57  ;;  %v2311_v58 = vld [vmem:[%s7436_s9 + $0x60] sm:$0xff] }
 0x190   :  { %5544 = vmatprep.subr.msk.bf16.mxu1 %vm6236_vm5, %v5542_v17  ;;  %v1133_v26 = vpop.permute.xlu0 %1132 }
 0x192   :  { %4890 = vmatmul.mubr.msk.f32.gmra.mrb[2].mxu1 %vm231_vm8, %v6324_v2 }
 0x193   :  { %5547 = vmatpush3.bf16.msk.msra.mxu1 %vm6236_vm5, %v5542_v17  ;;  %4900 = vmatprep.mubr.msk.f32.mxu1 %vm231_vm8, %v6336_v5  ;;  %v5558_v5 = vpack.c.bf16 %v4187_v29, %v4186_v28  ;;  %v5602_v17 = vpack.c.bf16 %v4225_v63, %v4224_v62  ;;  %v4243_v28 = vld [vmem:[%s7434_s5 + $0xf8] sm:$0xf]  ;;  %v4249_v29 = vld [vmem:[%s7433_s4 + $0x100] sm:$0xff] }
 0x194   :  { %5549 = vmatprep.subr.bf16.mxu1 %v5548_v1  ;;  %v1242_v2 = vpop.permute.xlu0 %1241 }
 0x196   :  { %4901 = vmatmul.mubr.msk.f32.vlgmr.msra.gmra.mrb[0].mxu1 %vm231_vm8, %v6332_v4  ;;  %v1244_v4 = vpop.permute.xlu1 %1243 }
 0x197   :  { %5551 = vmatpush3.bf16.msra.mxu1 %v5548_v1  ;;  %4903 = vmatprep.mubr.msk.f32.mxu1 %vm231_vm8, %v6344_v7  ;;  %v5562_v7 = vpack.c.bf16 %v4189_v31, %v4188_v30  ;;  %v4233_v1 = vld [vmem:[%s7433_s4 + $0xf0] sm:$0xff] }
 0x198   :  { %5554 = vmatprep.subr.msk.bf16.mxu1 %vm6236_vm5, %v5552_v0  ;;  %v1246_v34 = vpop.permute.xlu0 %1245  ;;  %v4251_v31 = vld [vmem:[%s7433_s4 + $0x110] sm:$0xff] }
 0x19a   :  { %4904 = vmatmul.mubr.msk.f32.gmra.mrb[2].mxu1 %vm231_vm8, %v6340_v6  ;;  %v5568_v6 = vpack.c.bf16 %v4196_v33, %v4195_v32  ;;  %v1248_v35 = vpop.permute.xlu1 %1247  ;;  %v4258_v33 = vld [vmem:[%s7434_s5 + $0x100] sm:$0xff] }
 0x19b   :  { %5557 = vmatpush3.bf16.msk.msra.mxu1 %vm6236_vm5, %v5552_v0  ;;  %4914 = vmatprep.mubr.msk.f32.mxu1 %vm231_vm8, %v1129_v16  ;;  %v4241_v0 = vld [vmem:[%s7434_s5 + $0xe8] sm:$0xff] }
 0x19c   :  { %5559 = vmatprep.subr.bf16.mxu1 %v5558_v5  ;;  %v1355_v38 = vpop.permute.xlu0 %1354 }
 0x19e   :  { %4915 = vmatmul.mubr.msk.f32.vlgmr.msra.gmra.mrb[0].mxu1 %vm231_vm8, %v1131_v20  ;;  %v1357_v42 = vpop.permute.xlu1 %1356 }
 0x19f   :  { %5561 = vmatpush3.bf16.msra.mxu1 %v5558_v5  ;;  %4917 = vmatprep.mubr.msk.f32.mxu1 %vm231_vm8, %v1133_v26  ;;  %v4240_v26 = vld [vmem:[%s7434_s5 + $0xe0] sm:$0xff] }
 0x1a0   :  { %5564 = vmatprep.subr.msk.bf16.mxu1 %vm6236_vm5, %v5562_v7  ;;  %v1359_v46 = vpop.permute.xlu0 %1358 }
 0x1a2   :  { %4918 = vmatmul.mubr.msk.f32.gmra.mrb[2].mxu1 %vm231_vm8, %v1135_v3  ;;  %v1361_v48 = vpop.permute.xlu1 %1360  ;;  %v4242_v3 = vld [vmem:[%s7434_s5 + $0xf0] sm:$0xff] }
 0x1a3   :  { %5567 = vmatpush3.bf16.msk.msra.mxu1 %vm6236_vm5, %v5562_v7  ;;  %4928 = vmatprep.mubr.msk.f32.mxu1 %vm231_vm8, %v1242_v2  ;;  %v4250_v2 = vld [vmem:[%s7433_s4 + $0x108] sm:$0xff] }
 0x1a4   :  { %5569 = vmatprep.subr.bf16.mxu1 %v5568_v6  ;;  %v1468_v51 = vpop.permute.xlu0 %1467 }
 0x1a6   :  { %4929 = vmatmul.mubr.msk.f32.vlgmr.msra.gmra.mrb[0].mxu1 %vm231_vm8, %v1244_v4  ;;  %v1470_v55 = vpop.permute.xlu1 %1469  ;;  %v4252_v4 = vld [vmem:[%s7433_s4 + $0x118] sm:$0xf]  ;;  %s6071_s4 = smov 112  }
 0x1a7   :  { %5571 = vmatpush3.bf16.msra.mxu1 %v5568_v6  ;;  %4931 = vmatprep.mubr.msk.f32.mxu1 %vm231_vm8, %v1246_v34  ;;  %v5632_v32 = vpack.c.bf16 %v4252_v4, %v4251_v31  ;;  %v4259_v34 = vld [vmem:[%s7434_s5 + $0x108] sm:$0xff] }
 0x1a8   :  { %5574 = vmatprep.subr.msk.bf16.mxu1 %vm6236_vm5, %v5572_v39  ;;  %v1472_v59 = vpop.permute.xlu0 %1471 }
 0x1aa   :  { %4932 = vmatmul.mubr.msk.f32.gmra.mrb[2].mxu1 %vm231_vm8, %v1248_v35  ;;  %v1474_v61 = vpop.permute.xlu1 %1473  ;;  %v5638_v35 = vpack.c.bf16 %v4259_v34, %v4258_v33 }
 0x1ab   :  { %5577 = vmatpush3.bf16.msk.msra.mxu1 %vm6236_vm5, %v5572_v39  ;;  %4942 = vmatprep.mubr.msk.f32.mxu1 %vm231_vm8, %v1355_v38  ;;  %v5642_v39 = vpack.c.bf16 %v4261_v37, %v4260_v36 }
 0x1ac   :  { %5579 = vmatprep.subr.bf16.mxu1 %v5578_v43  ;;  %v1807_v16 = vpop.permute.xlu0 %1806 }
 0x1ae   :  { %4943 = vmatmul.mubr.msk.f32.vlgmr.msra.gmra.mrb[0].mxu1 %vm231_vm8, %v1357_v42  ;;  %v1809_v20 = vpop.permute.xlu1 %1808 }
 0x1af   :  { %5581 = vmatpush3.bf16.msra.mxu1 %v5578_v43  ;;  %4945 = vmatprep.mubr.msk.f32.mxu1 %vm231_vm8, %v1359_v46  ;;  %v5652_v46 = vpack.c.bf16 %v2302_v45, %v2301_v27 }
 0x1b0   :  { %5584 = vmatprep.subr.msk.bf16.mxu1 %vm6236_vm5, %v5582_v47  ;;  %v1811_v24 = vpop.permute.xlu0 %1810 }
 0x1b1   :  { %5674 = vmatpush3.bf16.msra.mxu0 %v5652_v46 }
 0x1b2   :  { %4946 = vmatmul.mubr.msk.f32.gmra.mrb[2].mxu1 %vm231_vm8, %v1361_v48  ;;  %5675 = vmatprep.subr.bf16.mxu0 %v6068_v21 }
 0x1b3   :  { %5587 = vmatpush3.bf16.msk.msra.mxu1 %vm6236_vm5, %v5582_v47  ;;  %4956 = vmatprep.mubr.msk.f32.mxu1 %vm231_vm8, %v1468_v51  ;;  %v2304_v47 = vld [vmem:[%s7436_s9 + $0x28] sm:$0xff]  ;;  %v5658_v51 = vpack.c.bf16 %v2306_v50, %v2305_v49  ;;  %v2472_v50 = vld [vmem:[%s7438_s10] sm:$0xff] }
 0x1b4   :  { %5589 = vmatprep.subr.bf16.mxu1 %v5588_v52 }
 0x1b6   :  { %4957 = vmatmul.mubr.msk.f32.vlgmr.msra.gmra.mrb[0].mxu1 %vm231_vm8, %v1470_v55  ;;  %v2309_v55 = vld [vmem:[%s7436_s9 + $0x50] sm:$0xff] }
 0x1b7   :  { %5591 = vmatpush3.bf16.msra.mxu1 %v5588_v52  ;;  %4959 = vmatprep.mubr.msk.f32.mxu1 %vm231_vm8, %v1472_v59  ;;  %v2307_v52 = vld [vmem:[%s7436_s9 + $0x40] sm:$0xff]  ;;  %v2312_v59 = vld [vmem:[%s7436_s9 + $0x68] sm:$0xff] }
 0x1b8   :  { %5594 = vmatprep.subr.msk.bf16.mxu1 %vm6236_vm5, %v5592_v56  ;;  %v5661_v54 = vpack.c.bf16 %v2308_v53, %v2307_v52  ;;  %v2659_v52 = vld [vmem:[%s7439_s11 + $0x8] sm:$0xff] }
 0x1ba   :  { %4960 = vmatmul.mubr.msk.f32.gmra.mrb[2].mxu1 %vm231_vm8, %v1474_v61  ;;  %v4112_v61 = vld [vmem:[%s7437_s6] ss:$0 sm:$0xff] }
 0x1bb   :  { %5597 = vmatpush3.bf16.msk.msra.mxu1 %vm6236_vm5, %v5592_v56  ;;  %4970 = vmatprep.mubr.msk.f32.mxu1 %vm231_vm8, %v6368_v9  ;;  %v5608_v9 = vpack.c.bf16 %v4232_v19, %v4231_v18  ;;  %v2310_v56 = vld [vmem:[%s7436_s9 + $0x58] sm:$0xff] }
 0x1bc   :  { %5599 = vmatprep.subr.bf16.mxu1 %v5598_v60  ;;  %v5664_v57 = vpack.c.bf16 %v2310_v56, %v2309_v55 }
 0x1be   :  { %4971 = vmatmul.mubr.msk.f32.vlgmr.msra.gmra.mrb[0].mxu1 %vm231_vm8, %v6364_v8  ;;  %v5612_v8 = vpack.c.bf16 %v4234_v22, %v4233_v1 }
 0x1bf   :  { %5601 = vmatpush3.bf16.msra.mxu1 %v5598_v60  ;;  %4973 = vmatprep.mubr.msk.f32.mxu1 %vm231_vm8, %v6376_v11  ;;  %v1813_v11 = vpop.permute.xlu1 %1812  ;;  %v5667_v60 = vpack.c.bf16 %v2312_v59, %v2311_v58 }
 0x1c0   :  { %5604 = vmatprep.subr.msk.bf16.mxu1 %vm6236_vm5, %v5602_v17 }
 0x1c2   :  { %4974 = vmatmul.mubr.msk.f32.gmra.mrb[2].mxu1 %vm231_vm8, %v6372_v10  ;;  %v1920_v10 = vpop.permute.xlu0 %1919 }
 0x1c3   :  { %5607 = vmatpush3.bf16.msk.msra.mxu1 %vm6236_vm5, %v5602_v17  ;;  %4984 = vmatprep.mubr.msk.f32.mxu1 %vm231_vm8, %v6384_v13  ;;  %v5618_v13 = vpack.c.bf16 %v4241_v0, %v4240_v26 }
 0x1c4   :  { %5609 = vmatprep.subr.bf16.mxu1 %v5608_v9 }
 0x1c6   :  { %4985 = vmatmul.mubr.msk.f32.vlgmr.msra.gmra.mrb[0].mxu1 %vm231_vm8, %v6380_v12  ;;  %v1922_v12 = vpop.permute.xlu1 %1921  ;;  %v1924_v5 = vpop.permute.xlu0 %1923 }
 0x1c7   :  { %5611 = vmatpush3.bf16.msra.mxu1 %v5608_v9  ;;  %4987 = vmatprep.mubr.msk.f32.mxu1 %vm231_vm8, %v6392_v15  ;;  %v5622_v15 = vpack.c.bf16 %v4243_v28, %v4242_v3 }
 0x1c8   :  { %5614 = vmatprep.subr.msk.bf16.mxu1 %vm6236_vm5, %v5612_v8 }
 0x1ca   :  { %4988 = vmatmul.mubr.msk.f32.gmra.mrb[2].mxu1 %vm231_vm8, %v6388_v14  ;;  %v5628_v14 = vpack.c.bf16 %v4250_v2, %v4249_v29  ;;  %v1926_v30 = vpop.permute.xlu1 %1925  ;;  %v2033_v7 = vpop.permute.xlu0 %2032 }
 0x1cb   :  { %5617 = vmatpush3.bf16.msk.msra.mxu1 %vm6236_vm5, %v5612_v8  ;;  %4998 = vmatprep.mubr.msk.f32.mxu1 %vm231_vm8, %v1807_v16 }
 0x1cc   :  { %5619 = vmatprep.subr.bf16.mxu1 %v5618_v13 }
 0x1ce   :  { %4999 = vmatmul.mubr.msk.f32.vlgmr.msra.gmra.mrb[0].mxu1 %vm231_vm8, %v1809_v20  ;;  %v2035_v6 = vpop.permute.xlu1 %2034  ;;  %v2037_v38 = vpop.permute.xlu0 %2036 }
 0x1cf   :  { %5621 = vmatpush3.bf16.msra.mxu1 %v5618_v13  ;;  %5001 = vmatprep.mubr.msk.f32.mxu1 %vm231_vm8, %v1811_v24 }
 0x1d0   :  { %5624 = vmatprep.subr.msk.bf16.mxu1 %vm6236_vm5, %v5622_v15 }
 0x1d2   :  { %5002 = vmatmul.mubr.msk.f32.gmra.mrb[2].mxu1 %vm231_vm8, %v1813_v11  ;;  %v2039_v40 = vpop.permute.xlu1 %2038  ;;  %v2146_v41 = vpop.permute.xlu0 %2145 }
 0x1d3   :  { %5627 = vmatpush3.bf16.msk.msra.mxu1 %vm6236_vm5, %v5622_v15  ;;  %5012 = vmatprep.mubr.msk.f32.mxu1 %vm231_vm8, %v1920_v10 }
 0x1d4   :  { %5629 = vmatprep.subr.bf16.mxu1 %v5628_v14 }
 0x1d6   :  { %5013 = vmatmul.mubr.msk.f32.vlgmr.msra.gmra.mrb[0].mxu1 %vm231_vm8, %v1922_v12  ;;  %v2148_v42 = vpop.permute.xlu1 %2147  ;;  %v2150_v43 = vpop.permute.xlu0 %2149 }
 0x1d7   :  { %5631 = vmatpush3.bf16.msra.mxu1 %v5628_v14  ;;  %5015 = vmatprep.mubr.msk.f32.mxu1 %vm231_vm8, %v1924_v5 }
 0x1d8   :  { %5634 = vmatprep.subr.msk.bf16.mxu1 %vm6236_vm5, %v5632_v32 }
 0x1da   :  { %5016 = vmatmul.mubr.msk.f32.gmra.mrb[2].mxu1 %vm231_vm8, %v1926_v30  ;;  %v2152_v44 = vpop.permute.xlu1 %2151 }
 0x1db   :  { %5637 = vmatpush3.bf16.msk.msra.mxu1 %vm6236_vm5, %v5632_v32  ;;  %5026 = vmatprep.mubr.msk.f32.mxu1 %vm231_vm8, %v2033_v7 }
 0x1dc   :  { %5639 = vmatprep.subr.bf16.mxu1 %v5638_v35 }
 0x1de   :  { %5027 = vmatmul.mubr.msk.f32.vlgmr.msra.gmra.mrb[0].mxu1 %vm231_vm8, %v2035_v6 }
 0x1df   :  { %5641 = vmatpush3.bf16.msra.mxu1 %v5638_v35  ;;  %5029 = vmatprep.mubr.msk.f32.mxu1 %vm231_vm8, %v2037_v38 }
 0x1e0   :  { %5644 = vmatprep.subr.msk.bf16.mxu1 %vm6236_vm5, %v5642_v39 }
 0x1e2   :  { %5030 = vmatmul.mubr.msk.f32.gmra.mrb[2].mxu1 %vm231_vm8, %v2039_v40 }
 0x1e3   :  { %5647 = vmatpush3.bf16.msk.msra.mxu1 %vm6236_vm5, %v5642_v39  ;;  %5040 = vmatprep.mubr.msk.f32.mxu1 %vm231_vm8, %v2146_v41 }
 0x1e4   :  { %5648 = vmatprep.subr.bf16.mxu1 %v6068_v21 }
 0x1e6   :  { %5041 = vmatmul.mubr.msk.f32.vlgmr.msra.gmra.mrb[0].mxu1 %vm231_vm8, %v2148_v42 }
 0x1e7   :  { %5043 = vmatprep.mubr.msk.f32.mxu1 %vm231_vm8, %v2150_v43  ;;  %5650 = vmatpush3.bf16.msra.mxu1 %v6425_v25  ;;  %v2303_v25 = vld [vmem:[%s7436_s9 + $0x20] sm:$0xff] }
 0x1e8   :  { %5651 = vmatprep.subr.bf16.mxu1 %v6068_v21  ;;  %v5655_v48 = vpack.c.bf16 %v2304_v47, %v2303_v25 }
 0x1ea   :  { %5044 = vmatmul.mubr.msk.f32.gmra.mrb[2].mxu1 %vm231_vm8, %v2152_v44  ;;  %5677 = vmatpush3.bf16.msra.mxu0 %v5655_v48 }
 0x1eb   :  { %5653 = vmatpush3.bf16.msra.mxu1 %v5652_v46  ;;  %5678 = vmatprep.subr.bf16.mxu0 %v6068_v21 }
 0x1ec   :  { %5654 = vmatprep.subr.bf16.mxu1 %v6068_v21  ;;  %5074 = vmatprep.mubr.msk.f32.mxu1 %vm6069_vm9, %v6064_v23 }
 0x1ee   :  { %5680 = vmatpush3.bf16.msra.mxu0 %v5658_v51 }
 0x1ef   :  { %5656 = vmatpush3.bf16.msra.mxu1 %v5655_v48  ;;  %5681 = vmatprep.subr.bf16.mxu0 %v6068_v21 }
 0x1f0   :  { %5657 = vmatprep.subr.bf16.mxu1 %v6068_v21 }
 0x1f2   :  { %5683 = vmatpush3.bf16.msra.mxu0 %v5661_v54 }
 0x1f3   :  { %5659 = vmatpush3.bf16.msra.mxu1 %v5658_v51  ;;  %5684 = vmatprep.subr.bf16.mxu0 %v6068_v21  ;;  %v2658_v51 = vld [vmem:[%s7439_s11] sm:$0xff] }
 0x1f4   :  { %5660 = vmatprep.subr.bf16.mxu1 %v6068_v21  ;;  %v5690_v53 = vpack.c.bf16 %v2659_v52, %v2658_v51 }
 0x1f6   :  { %5686 = vmatpush3.bf16.msra.mxu0 %v5664_v57 }
 0x1f7   :  { %5662 = vmatpush3.bf16.msra.mxu1 %v5661_v54  ;;  %5687 = vmatprep.subr.bf16.mxu0 %v6068_v21 }
 0x1f8   :  { %5663 = vmatprep.subr.bf16.mxu1 %v6068_v21 }
 0x1fa   :  { %5689 = vmatpush3.bf16.msra.mxu0 %v5667_v60 }
 0x1fb   :  { %5665 = vmatpush3.bf16.msra.mxu1 %v5664_v57  ;;  %5108 = vmatprep.subr.mxu0 %v6064_v23 }
 0x1fc   :  { %5666 = vmatprep.subr.bf16.mxu1 %v6068_v21 }
 0x1ff   :  { %5668 = vmatpush3.bf16.msra.mxu1 %v5667_v60 }
 0x200   :  { %5691 = vmatprep.subr.bf16.mxu1 %v5690_v53 }
 0x2b9   :  { %v5042_v62 = vpop.f32.mrb[0].mxu1 }
 0x2ba   :  { %v6795_v63 = vadd.f32 %v5042_v62, %v4112_v61  ;;  %v2230_v16 = vpop.f32.mrb[1].mxu1 }
 0x2bb   :  { %v6797_v17 = vadd.f32 %v4112_v61, %v2230_v16 }
 0x2bc   :  { %v2256_v18 = vsel %vm2255_vm10, %v6795_v63, 0.0  ;;  %v2266_v19 = vmul.f32 %v6795_v63, %v6795_v63 }
 0x2bd   :  { %v2254_v20 = vsel %vm2253_vm11, %v6797_v17, 0.0  ;;  %v2265_v9 = vmul.f32 %v6797_v17, %v6797_v17  ;;  %v5045_v1 = vpop.f32.mrb[2].mxu1 }
 0x2be   :  { %v2268_v22 = vsel %vm2255_vm10, %v2266_v19, 0.0  ;;  %v2257_v24 = vadd.f32 %v2256_v18, %v2254_v20  ;;  %v6808_v8 = vadd.f32 %v5045_v1, %v4112_v61  ;;  %v2240_v11 = vpop.f32.mrb[3].mxu1  ;;  %v2467_v18 = vld [vmem:[%s7440_s7] sm:$0x1] }
 0x2bf   :  { %v2267_v26 = vsel %vm2253_vm11, %v2265_v9, 0.0  ;;  %v6811_v0 = vadd.f32 %v4112_v61, %v2240_v11  ;;  %v2469_v9 = vld [vmem:[%s7441_s8] sm:$0x1]  ;;  %v2661_v11 = vld [vmem:[%s7439_s11 + $0x18] sm:$0xff] }
 0x2c0   :  { %v2258_v10 = vrot.slane %v2257_v24, 4  ;;  %v2269_v13 = vadd.f32 %v2268_v22, %v2267_v26  ;;  %v2278_v3 = vsel %vm2255_vm10, %v6808_v8, 0.0  ;;  %v2288_v28 = vmul.f32 %v6808_v8, %v6808_v8 }
 0x2c1   :  { %v2277_v12 = vsel %vm2253_vm11, %v6811_v0, 0.0  ;;  %v2287_v15 = vmul.f32 %v6811_v0, %v6811_v0 }
 0x2c2   :  { %v2259_v29 = vadd.f32 %v2258_v10, %v2257_v24  ;;  %v2270_v2 = vrot.slane %v2269_v13, 4  ;;  %v2290_v5 = vsel %vm2255_vm10, %v2288_v28, 0.0  ;;  %v2279_v14 = vadd.f32 %v2278_v3, %v2277_v12  ;;  %v2660_v24 = vld [vmem:[%s7439_s11 + $0x10] sm:$0xff]  ;;  %v2662_v10 = vld [vmem:[%s7439_s11 + $0x20] sm:$0xff]  ;;  %v2665_v12 = vld [vmem:[%s7439_s11 + $0x38] sm:$0xff] }
 0x2c3   :  { %v2289_v30 = vsel %vm2253_vm11, %v2287_v15, 0.0  ;;  %v5694_v26 = vpack.c.bf16 %v2661_v11, %v2660_v24  ;;  %v2664_v28 = vld [vmem:[%s7439_s11 + $0x30] sm:$0xff] }
 0x2c4   :  { %v2260_v31 = vrot.slane %v2259_v29, 2  ;;  %v2271_v4 = vadd.f32 %v2270_v2, %v2269_v13  ;;  %v2280_v7 = vrot.slane %v2279_v14, 4  ;;  %v2291_v32 = vadd.f32 %v2290_v5, %v2289_v30  ;;  %v2663_v13 = vld [vmem:[%s7439_s11 + $0x28] sm:$0xff]  ;;  %v2669_v30 = vld [vmem:[%s7439_s11 + $0x58] sm:$0xff] }
 0x2c5   :  { %v5698_v3 = vpack.c.bf16 %v2663_v13, %v2662_v10  ;;  %v5702_v15 = vpack.c.bf16 %v2665_v12, %v2664_v28  ;;  %v2667_v2 = vld [vmem:[%s7439_s11 + $0x48] sm:$0xff]  ;;  %v4294_v12 = vld [vmem:[%s7439_s11 + $0xd0] sm:$0xff] }
 0x2c6   :  { %v2261_v33 = vadd.f32 %v2260_v31, %v2259_v29  ;;  %v2272_v34 = vrot.slane %v2271_v4, 2  ;;  %v2281_v6 = vadd.f32 %v2280_v7, %v2279_v14  ;;  %v2292_v35 = vrot.slane %v2291_v32, 4  ;;  %v2666_v29 = vld [vmem:[%s7439_s11 + $0x40] sm:$0xff]  ;;  %v2668_v14 = vld [vmem:[%s7439_s11 + $0x50] sm:$0xff]  ;;  %v4277_v7 = vld [vmem:[%s7439_s11 + $0x68] sm:$0xff] }
 0x2c7   :  { %v5706_v5 = vpack.c.bf16 %v2667_v2, %v2666_v29  ;;  %v5710_v31 = vpack.c.bf16 %v2669_v30, %v2668_v14  ;;  %v4296_v14 = vld [vmem:[%s7439_s11 + $0xe0] sm:$0xff]  ;;  %v4297_v30 = vld [vmem:[%s7439_s11 + $0xe8] sm:$0xff] }
 0x2c8   :  { %v2273_v36 = vadd.f32 %v2272_v34, %v2271_v4  ;;  %v2282_v37 = vrot.slane %v2281_v6, 2  ;;  %v2293_v38 = vadd.f32 %v2292_v35, %v2291_v32  ;;  %v2262_v39 = vrot.slane %v2261_v33, 1  ;;  %v4276_v4 = vld [vmem:[%s7439_s11 + $0x60] sm:$0xff]  ;;  %v4278_v32 = vld [vmem:[%s7439_s11 + $0x70] sm:$0xff]  ;;  %v4279_v34 = vld [vmem:[%s7439_s11 + $0x78] sm:$0xff] }
 0x2c9   :  { %v4280_v35 = vld [vmem:[%s7439_s11 + $0x80] sm:$0xff] }
 0x2ca   :  { %v2283_v40 = vadd.f32 %v2282_v37, %v2281_v6  ;;  %v2294_v41 = vrot.slane %v2293_v38, 2  ;;  %v2274_v42 = vrot.slane %v2273_v36, 1  ;;  %v2263_v27 = vadd.f32 %v2262_v39, %v2261_v33  ;;  %v4283_v39 = vld [vmem:[%s7439_s11 + $0x98] sm:$0xff] }
 0x2cb   :  { %v5714_v33 = vpack.c.bf16 %v4277_v7, %v4276_v4  ;;  %v5718_v6 = vpack.c.bf16 %v4279_v34, %v4278_v32  ;;  %v5746_v7 = vpack.c.bf16 %v4297_v30, %v4296_v14  ;;  %v4298_v32 = vld [vmem:[%s7439_s11 + $0xf0] sm:$0xff] }
 0x2cc   :  { %v2284_v43 = vrot.slane %v2283_v40, 1  ;;  %v2295_v44 = vadd.f32 %v2294_v41, %v2293_v38  ;;  %v2275_v25 = vadd.f32 %v2274_v42, %v2273_v36  ;;  %v4281_v36 = vld [vmem:[%s7439_s11 + $0x88] sm:$0xff]  ;;  %v4282_v38 = vld [vmem:[%s7439_s11 + $0x90] sm:$0xff]  ;;  %v4284_v41 = vld [vmem:[%s7439_s11 + $0xa0] sm:$0xff] }
 0x2cd   :  { %v5722_v37 = vpack.c.bf16 %v4281_v36, %v4280_v35  ;;  %v4285_v42 = vld [vmem:[%s7439_s11 + $0xa8] sm:$0xff]  ;;  %v4300_v35 = vld [vmem:[%s7439_s11 + $0x100] sm:$0xff]  ;;  %v4342_v30 = vld [vmem:[%s7439_s11 + $0x1f0] sm:$0xff] }
 0x2ce   :  { %v2285_v45 = vadd.f32 %v2284_v43, %v2283_v40  ;;  %v2296_v46 = vrot.slane %v2295_v44, 1  ;;  %v5726_v40 = vpack.c.bf16 %v4283_v39, %v4282_v38  ;;  %v5730_v43 = vpack.c.bf16 %v4285_v42, %v4284_v41  ;;  %v4301_v36 = vld [vmem:[%s7439_s11 + $0x108] sm:$0xff]  ;;  %v4302_v38 = vld [vmem:[%s7439_s11 + $0x110] sm:$0xff]  ;;  %v4303_v39 = vld [vmem:[%s7439_s11 + $0x118] sm:$0xff] }
 0x2cf   :  { %v4308_v41 = vld [vmem:[%s7439_s11 + $0x120] sm:$0xff]  ;;  %v4309_v42 = vld [vmem:[%s7439_s11 + $0x128] sm:$0xff] }
 0x2d0   :  { %v2286_v47 = vadd.f32 %v2285_v45, %v2263_v27  ;;  %v2297_v48 = vadd.f32 %v2296_v46, %v2295_v44  ;;  %v4286_v44 = vld [vmem:[%s7439_s11 + $0xb0] sm:$0xff]  ;;  %v4287_v27 = vld [vmem:[%s7439_s11 + $0xb8] sm:$0xff]  ;;  %v2620_v46 = vlaneseq }
 0x2d1   :  { %v5734_v45 = vpack.c.bf16 %v4287_v27, %v4286_v44  ;;  %v4310_v44 = vld [vmem:[%s7439_s11 + $0x130] sm:$0xff]  ;;  %v4311_v27 = vld [vmem:[%s7439_s11 + $0x138] sm:$0xff] }
 0x2d2   :  { %v2298_v49 = vadd.f32 %v2297_v48, %v2275_v25  ;;  %5075 = vmatmul.mubr.msk.f32.vlgmr.msra.gmra.mrb[4].mxu1 %vm2253_vm11, %v2286_v47  ;;  %v2621_v25 = vshrl.u32 %v2620_v46, 7  ;;  %v5766_v46 = vpack.c.bf16 %v4311_v27, %v4310_v44  ;;  %v4351_v44 = vld [vmem:[%s7439_s11 + $0x238] sm:$0xff] }
 0x2d3   :  { %5693 = vmatpush3.bf16.msra.mxu1 %v5690_v53 }
 0x2d4   :  { %5106 = vmatmul.mubr.msk.f32.vlgmr.msra.gmra.mrb[4].mxu0 %vm2253_vm11, %v2298_v49  ;;  %5695 = vmatprep.subr.bf16.mxu1 %v5694_v26  ;;  %v6915_v47 = vsub.s32 0, %v2621_v25  ;;  %v4312_v25 = vld [vmem:[%s7439_s11 + $0x140] sm:$0xff] }
 0x2d5   :  { %5110 = vmatprep.mubr.msk.f32.mxu0 %vm6069_vm9, %v6064_v23  ;;  %5109 = vmatpush3.msra.mxu0 %v2472_v50 }
 0x2d6   :  { %5113 = vmatprep.subr.mxu0 %v6064_v23 }
 0x2d7   :  { %5697 = vmatpush3.bf16.msra.mxu1 %v5694_v26 }
 0x2d8   :  { %5699 = vmatprep.subr.bf16.mxu1 %v5698_v3 }
 0x2db   :  { %5701 = vmatpush3.bf16.msra.mxu1 %v5698_v3 }
 0x2dc   :  { %5703 = vmatprep.subr.bf16.mxu1 %v5702_v15 }
 0x2df   :  { %5705 = vmatpush3.bf16.msra.mxu1 %v5702_v15  ;;  %v4295_v15 = vld [vmem:[%s7439_s11 + $0xd8] sm:$0xff] }
 0x2e0   :  { %5707 = vmatprep.subr.bf16.mxu1 %v5706_v5 }
 0x2e3   :  { %5709 = vmatpush3.bf16.msra.mxu1 %v5706_v5  ;;  %v5742_v5 = vpack.c.bf16 %v4295_v15, %v4294_v12  ;;  %v4335_v15 = vld [vmem:[%s7439_s11 + $0x1d8] sm:$0xff] }
 0x2e4   :  { %5711 = vmatprep.subr.bf16.mxu1 %v5710_v31 }
 0x2e7   :  { %5713 = vmatpush3.bf16.msra.mxu1 %v5710_v31 }
 0x2e8   :  { %5906 = vmatprep.subr.bf16.mxu1 %v6068_v21 }
 0x3a5   :  { %v2382_v54 = vpop.f32.mrb[4].mxu1 }
 0x3a6   :  { %v2387_v55 = vmul.f32 0.0025510204, %v2382_v54  ;;  %v5076_v56 = vpop.f32.mrb[5].mxu1 }
 0x3a7   :  { %v2457_v57 = vpop.f32.mrb[4].mxu0 }
 0x3a8   :  { %v2462_v58 = vmul.f32 %v2387_v55, %v2387_v55  ;;  %v2461_v59 = vmul.f32 0.0025510204, %v2457_v57  ;;  %v5107_v60 = vpop.f32.mrb[5].mxu0 }
 0x3aa   :  { %v2463_v61 = vsub.f32 %v2461_v59, %v2462_v58  ;;  %v4292_v58 = vld [vmem:[%s7439_s11 + $0xc0] sm:$0xff]  ;;  %v4293_v59 = vld [vmem:[%s7439_s11 + $0xc8] sm:$0xff] }
 0x3ac   :  { %v2464_v62 = vmax.f32 %v2463_v61, 0.0 }
 0x3ae   :  { %v2465_v16 = vadd.f32 1e-05, %v2464_v62 }
 0x3b0   :  { %6059 = vrsqrt.f32 %v2465_v16 }
 0x3ba   :  { %v6060_v19 = vpop.eup %6059 }
 0x3bb   :  { %v2468_v20 = vmul.f32 %v6060_v19, %v2467_v18 }
 0x3bd   :  { %5111 = vmatmul.mubr.msk.f32.vlgmr.msra.gmra.mrb[6].mxu0 %vm2473_vm12, %v2468_v20  ;;  %v2470_v1 = vmul.f32 %v2468_v20, %v2387_v55 }
 0x3be   :  { %5114 = vmatpush3.msra.mxu0 %v2472_v50  ;;  %5115 = vmatprep.mubr.msk.f32.mxu0 %vm6069_vm9, %v6064_v23 }
 0x3bf   :  { %v2471_v22 = vsub.f32 %v2469_v9, %v2470_v1  ;;  %5715 = vmatprep.subr.bf16.mxu0 %v5714_v33 }
 0x3c1   :  { %5116 = vmatmul.mubr.msk.f32.vlgmr.msra.gmra.mrb[8].mxu0 %vm2473_vm12, %v2471_v22 }
 0x3c2   :  { %5717 = vmatpush3.bf16.msra.mxu0 %v5714_v33  ;;  %v4299_v33 = vld [vmem:[%s7439_s11 + $0xf8] sm:$0xff] }
 0x3c3   :  { %5719 = vmatprep.subr.bf16.mxu0 %v5718_v6 }
 0x3c6   :  { %5721 = vmatpush3.bf16.msra.mxu0 %v5718_v6  ;;  %v5750_v6 = vpack.c.bf16 %v4299_v33, %v4298_v32  ;;  %v4344_v33 = vld [vmem:[%s7439_s11 + $0x200] sm:$0xff] }
 0x3c7   :  { %5723 = vmatprep.subr.bf16.mxu0 %v5722_v37 }
 0x3ca   :  { %5725 = vmatpush3.bf16.msra.mxu0 %v5722_v37  ;;  %v5754_v37 = vpack.c.bf16 %v4301_v36, %v4300_v35  ;;  %v4346_v36 = vld [vmem:[%s7439_s11 + $0x210] sm:$0xff] }
 0x3cb   :  { %5727 = vmatprep.subr.bf16.mxu0 %v5726_v40 }
 0x3ce   :  { %5729 = vmatpush3.bf16.msra.mxu0 %v5726_v40  ;;  %v5758_v40 = vpack.c.bf16 %v4303_v39, %v4302_v38 }
 0x3cf   :  { %5731 = vmatprep.subr.bf16.mxu0 %v5730_v43 }
 0x3d2   :  { %5733 = vmatpush3.bf16.msra.mxu0 %v5730_v43  ;;  %v5762_v43 = vpack.c.bf16 %v4309_v42, %v4308_v41  ;;  %v4349_v41 = vld [vmem:[%s7439_s11 + $0x228] sm:$0xff] }
 0x3d3   :  { %5735 = vmatprep.subr.bf16.mxu0 %v5734_v45 }
 0x3d6   :  { %5737 = vmatpush3.bf16.msra.mxu0 %v5734_v45 }
 0x490   :  { %v2543_v48 = vpop.f32.mrb[6].mxu0 }
 0x491   :  { %v2623_v49 = vrot.slane %v2543_v48, %v6915_v47  ;;  %v5112_v50 = vpop.f32.mrb[7].mxu0  ;;  %v4313_v48 = vld [vmem:[%s7439_s11 + $0x148] sm:$0xff] }
 0x492   :  { %v5770_v50 = vpack.c.bf16 %v4313_v48, %v4312_v25  ;;  %v4358_v48 = vld [vmem:[%s7439_s11 + $0x250] sm:$0xff] }
 0x493   :  { %v2624_v51 = vmul.f32 %v6797_v17, %v2623_v49  ;;  %v2625_v53 = vmul.f32 %v6795_v63, %v2623_v49  ;;  %v2626_v54 = vmul.f32 %v6811_v0, %v2623_v49  ;;  %v2627_v55 = vmul.f32 %v6808_v8, %v2623_v49 }
 0x494   :  { %v2616_v52 = vpop.f32.mrb[8].mxu0  ;;  %v6929_v63 = vpack.c.bf16 %v4293_v59, %v4292_v58  ;;  %v4318_v58 = vld [vmem:[%s7439_s11 + $0x170] sm:$0xff]  ;;  %v4319_v59 = vld [vmem:[%s7439_s11 + $0x178] sm:$0xff] }
 0x495   :  { %v2631_v56 = vrot.slane %v2616_v52, %v6915_v47  ;;  %v5117_v57 = vpop.f32.mrb[9].mxu0  ;;  %v4314_v52 = vld [vmem:[%s7439_s11 + $0x150] sm:$0xff] }
 0x496   :  { %5739 = vmatprep.subr.bf16.mxu0 %v6929_v63 }
 0x497   :  { %v2632_v60 = vadd.f32 %v2631_v56, %v2624_v51  ;;  %v2633_v17 = vadd.f32 %v2631_v56, %v2625_v53  ;;  %v2634_v61 = vadd.f32 %v2631_v56, %v2626_v54  ;;  %v2635_v62 = vadd.f32 %v2631_v56, %v2627_v55  ;;  %v4315_v53 = vld [vmem:[%s7439_s11 + $0x158] sm:$0xff]  ;;  %v4316_v55 = vld [vmem:[%s7439_s11 + $0x160] sm:$0xff]  ;;  %v4317_v56 = vld [vmem:[%s7439_s11 + $0x168] sm:$0xff] }
 0x498   :  { %v5774_v54 = vpack.c.bf16 %v4315_v53, %v4314_v52  ;;  %v5778_v57 = vpack.c.bf16 %v4317_v56, %v4316_v55  ;;  %v4360_v52 = vld [vmem:[%s7439_s11 + $0x260] sm:$0xff]  ;;  %v4361_v53 = vld [vmem:[%s7439_s11 + $0x268] sm:$0xff] }
 0x499   :  { %v2636_v0 = vmax.f32 %v2632_v60, 0.0  ;;  %v2637_v16 = vmax.f32 %v2633_v17, 0.0  ;;  %v2638_v8 = vmax.f32 %v2634_v61, 0.0  ;;  %v2639_v18 = vmax.f32 %v2635_v62, 0.0  ;;  %v4324_v17 = vld [vmem:[%s7439_s11 + $0x180] sm:$0xff]  ;;  %v4325_v61 = vld [vmem:[%s7439_s11 + $0x188] sm:$0xff] }
 0x49a   :  { %v5782_v60 = vpack.c.bf16 %v4319_v59, %v4318_v58  ;;  %v5786_v62 = vpack.c.bf16 %v4325_v61, %v4324_v17  ;;  %v4362_v59 = vld [vmem:[%s7439_s11 + $0x270] sm:$0xff] }
 0x49b   :  { %2640 = vst.msk [vmem:[#allocation4] sm:$0xff] %vm2253_vm11, %v2636_v0  ;;  %2641 = vst.msk [vmem:[#allocation4 + $0x8] sm:$0xff] %vm2253_vm11, %v2637_v16  ;;  %v4327_v0 = vld [vmem:[%s7439_s11 + $0x198] sm:$0xff] }
 0x49c   :  { %2642 = vst.msk [vmem:[#allocation4 + $0x10] sm:$0xff] %vm2253_vm11, %v2638_v8  ;;  %2643 = vst.msk [vmem:[#allocation4 + $0x18] sm:$0xff] %vm2253_vm11, %v2639_v18  ;;  %v4328_v8 = vld [vmem:[%s7439_s11 + $0x1a0] sm:$0xff]  ;;  %v4329_v18 = vld [vmem:[%s7439_s11 + $0x1a8] sm:$0xff] }
 0x4a2   :  { %v2655_v19 = vld [vmem:[#allocation4 + $0x8] sm:$0xff]  ;;  %v2654_v20 = vld [vmem:[#allocation4] sm:$0xff] }
 0x4a3   :  { %2787 = vrot.lane.b32.xlu1 %v2655_v19, %s6070_s27  ;;  %2785 = vrot.lane.b32.xlu0 %v2654_v20, %s6070_s27  ;;  %v2656_v9 = vld [vmem:[#allocation4 + $0x10] sm:$0xff]  ;;  %v2657_v1 = vld [vmem:[#allocation4 + $0x18] sm:$0xff]  ;;  %v6948_v24 = vld [vmem:[#allocation4 + $0x1] sm:$0xff] }
 0x4a4   :  { %5142 = vmatprep.mubr.msk.f32.mxu1 %vm2670_vm14, %v2654_v20  ;;  %v6946_v22 = vld [vmem:[#allocation4 + $0x9] sm:$0xff]  ;;  %v6954_v11 = vld [vmem:[#allocation4 + $0x19] sm:$0xff]  ;;  %v6956_v26 = vld [vmem:[#allocation4 + $0x11] sm:$0xff] }
 0x4a5   :  { %5143 = vmatmul.mubr.msk.f32.vlgmr.msra.gmra.mrb[6].mxu1 %vm2670_vm14, %v2655_v19  ;;  %v6966_v10 = vld [vmem:[#allocation4 + $0xa] sm:$0xff]  ;;  %v6968_v13 = vld [vmem:[#allocation4 + $0x2] sm:$0xff]  ;;  %v6974_v3 = vld [vmem:[#allocation4 + $0x1a] sm:$0xff] }
 0x4a6   :  { %5145 = vmatprep.mubr.msk.f32.mxu1 %vm2670_vm14, %v2656_v9  ;;  %v6976_v28 = vld [vmem:[#allocation4 + $0x12] sm:$0xff] }
 0x4a7   :  { %2791 = vrot.lane.b32.xlu1 %v2657_v1, %s6070_s27  ;;  %2789 = vrot.lane.b32.xlu0 %v2656_v9, %s6070_s27 }
 0x4a9   :  { %5146 = vmatmul.mubr.msk.f32.gmra.mrb[8].mxu1 %vm2670_vm14, %v2657_v1 }
 0x4aa   :  { %5412 = vmatprep.mubr.msk.f32.mxu1 %vm6069_vm9, %v6064_v23 }
 0x4ab   :  { %2905 = vrot.lane.b32.xlu1 %v2655_v19, %s6071_s4  ;;  %2903 = vrot.lane.b32.xlu0 %v2654_v20, %s6071_s4  ;;  %v5794_v19 = vpack.c.bf16 %v4329_v18, %v4328_v8  ;;  %v4330_v20 = vld [vmem:[%s7439_s11 + $0x1b0] sm:$0xff] }
 0x4ac   :  { %v4366_v8 = vld [vmem:[%s7439_s11 + $0x290] sm:$0xff] }
 0x4af   :  { %2909 = vrot.lane.b32.xlu1 %v2657_v1, %s6071_s4  ;;  %2907 = vrot.lane.b32.xlu0 %v2656_v9, %s6071_s4  ;;  %v4331_v9 = vld [vmem:[%s7439_s11 + $0x1b8] sm:$0xff] }
 0x4b3   :  { %3141 = vrot.lane.b32.xlu1 %v6946_v22, %s6070_s27  ;;  %3139 = vrot.lane.b32.xlu0 %v6948_v24, %s6070_s27 }
 0x4b7   :  { %3145 = vrot.lane.b32.xlu1 %v6954_v11, %s6070_s27  ;;  %3143 = vrot.lane.b32.xlu0 %v6956_v26, %s6070_s27 }
 0x4bb   :  { %3259 = vrot.lane.b32.xlu1 %v6946_v22, %s6071_s4  ;;  %3257 = vrot.lane.b32.xlu0 %v6948_v24, %s6071_s4 }
 0x4bf   :  { %3263 = vrot.lane.b32.xlu1 %v6954_v11, %s6071_s4  ;;  %3261 = vrot.lane.b32.xlu0 %v6956_v26, %s6071_s4 }
 0x4c3   :  { %3495 = vrot.lane.b32.xlu1 %v6966_v10, %s6070_s27  ;;  %3493 = vrot.lane.b32.xlu0 %v6968_v13, %s6070_s27 }
 0x4c7   :  { %3499 = vrot.lane.b32.xlu1 %v6974_v3, %s6070_s27  ;;  %3497 = vrot.lane.b32.xlu0 %v6976_v28, %s6070_s27 }
 0x4cb   :  { %3613 = vrot.lane.b32.xlu1 %v6966_v10, %s6071_s4  ;;  %3611 = vrot.lane.b32.xlu0 %v6968_v13, %s6071_s4 }
 0x4cf   :  { %3617 = vrot.lane.b32.xlu1 %v6974_v3, %s6071_s4  ;;  %3615 = vrot.lane.b32.xlu0 %v6976_v28, %s6071_s4 }
 0x515   :  { %v2788_v29 = vpop.permute.xlu1 %2787  ;;  %v2786_v2 = vpop.permute.xlu0 %2785 }
 0x516   :  { %5172 = vmatprep.mubr.msk.f32.mxu0 %vm2670_vm14, %v2786_v2  ;;  %v4340_v2 = vld [vmem:[%s7439_s11 + $0x1e0] sm:$0xff] }
 0x517   :  { %5173 = vmatmul.mubr.msk.f32.vlgmr.msra.gmra.mrb[10].mxu0 %vm2670_vm14, %v2788_v29 }
 0x518   :  { %5741 = vmatpush3.bf16.msra.mxu0 %v6929_v63  ;;  %v4326_v63 = vld [vmem:[%s7439_s11 + $0x190] sm:$0xff] }
 0x519   :  { %v2792_v31 = vpop.permute.xlu1 %2791  ;;  %v2790_v4 = vpop.permute.xlu0 %2789  ;;  %5743 = vmatprep.subr.bf16.mxu0 %v5742_v5  ;;  %v5790_v16 = vpack.c.bf16 %v4327_v0, %v4326_v63  ;;  %v4364_v63 = vld [vmem:[%s7439_s11 + $0x280] sm:$0xff]  ;;  %v4365_v0 = vld [vmem:[%s7439_s11 + $0x288] sm:$0xff] }
 0x51a   :  { %5175 = vmatprep.mubr.msk.f32.mxu0 %vm2670_vm14, %v2790_v4 }
 0x51b   :  { %5176 = vmatmul.mubr.msk.f32.gmra.mrb[12].mxu0 %vm2670_vm14, %v2792_v31  ;;  %v4343_v31 = vld [vmem:[%s7439_s11 + $0x1f8] sm:$0xff] }
 0x51c   :  { %5745 = vmatpush3.bf16.msra.mxu0 %v5742_v5  ;;  %v4341_v5 = vld [vmem:[%s7439_s11 + $0x1e8] sm:$0xff]  ;;  %v5814_v32 = vpack.c.bf16 %v4343_v31, %v4342_v30  ;;  %v4383_v30 = vld [vmem:[%s7439_s11 + $0x2f8] sm:$0xff] }
 0x51d   :  { %v2904_v34 = vpop.permute.xlu0 %2903  ;;  %5747 = vmatprep.subr.bf16.mxu0 %v5746_v7  ;;  %v2906_v45 = vpop.permute.xlu1 %2905  ;;  %v5810_v14 = vpack.c.bf16 %v4341_v5, %v4340_v2  ;;  %v4381_v5 = vld [vmem:[%s7439_s11 + $0x2e8] sm:$0xff] }
 0x51e   :  { %5202 = vmatprep.mubr.msk.f32.mxu0 %vm2670_vm14, %v2904_v34  ;;  %v4345_v34 = vld [vmem:[%s7439_s11 + $0x208] sm:$0xff] }
 0x520   :  { %5749 = vmatpush3.bf16.msra.mxu0 %v5746_v7 }
 0x521   :  { %5751 = vmatprep.subr.bf16.mxu0 %v5750_v6  ;;  %v2908_v49 = vpop.permute.xlu0 %2907  ;;  %v2910_v51 = vpop.permute.xlu1 %2909 }
 0x524   :  { %5753 = vmatpush3.bf16.msra.mxu0 %v5750_v6  ;;  %v5818_v6 = vpack.c.bf16 %v4345_v34, %v4344_v33  ;;  %v4390_v33 = vld [vmem:[%s7439_s11 + $0x310] sm:$0xff]  ;;  %v4391_v34 = vld [vmem:[%s7439_s11 + $0x318] sm:$0xff] }
 0x525   :  { %5755 = vmatprep.subr.bf16.mxu0 %v5754_v37  ;;  %v3140_v1 = vpop.permute.xlu0 %3139  ;;  %v3142_v4 = vpop.permute.xlu1 %3141 }
 0x528   :  { %5757 = vmatpush3.bf16.msra.mxu0 %v5754_v37  ;;  %v4347_v37 = vld [vmem:[%s7439_s11 + $0x218] sm:$0xff] }
 0x529   :  { %5759 = vmatprep.subr.bf16.mxu0 %v5758_v40  ;;  %v3144_v7 = vpop.permute.xlu0 %3143  ;;  %v3146_v35 = vpop.permute.xlu1 %3145  ;;  %v5822_v39 = vpack.c.bf16 %v4347_v37, %v4346_v36  ;;  %v5886_v36 = vpack.c.bf16 %v4391_v34, %v4390_v33  ;;  %v4392_v37 = vld [vmem:[%s7439_s11 + $0x320] sm:$0xff] }
 0x52c   :  { %5761 = vmatpush3.bf16.msra.mxu0 %v5758_v40  ;;  %v4348_v40 = vld [vmem:[%s7439_s11 + $0x220] sm:$0xff] }
 0x52d   :  { %5763 = vmatprep.subr.bf16.mxu0 %v5762_v43  ;;  %v3258_v38 = vpop.permute.xlu0 %3257  ;;  %v5826_v42 = vpack.c.bf16 %v4349_v41, %v4348_v40  ;;  %v4394_v41 = vld [vmem:[%s7439_s11 + $0x330] sm:$0xff] }
 0x52f   :  { %5203 = vmatmul.mubr.msk.f32.vlgmr.msra.gmra.mrb[10].mxu0 %vm2670_vm14, %v2906_v45  ;;  %v4356_v45 = vld [vmem:[%s7439_s11 + $0x240] sm:$0xff] }
 0x530   :  { %5205 = vmatprep.mubr.msk.f32.mxu0 %vm2670_vm14, %v2908_v49  ;;  %5765 = vmatpush3.bf16.msra.mxu0 %v5762_v43  ;;  %v4350_v43 = vld [vmem:[%s7439_s11 + $0x230] sm:$0xff]  ;;  %v4359_v49 = vld [vmem:[%s7439_s11 + $0x258] sm:$0xff] }
 0x531   :  { %5767 = vmatprep.subr.bf16.mxu0 %v5766_v46  ;;  %v5830_v27 = vpack.c.bf16 %v4351_v44, %v4350_v43 }
 0x533   :  { %5206 = vmatmul.mubr.msk.f32.gmra.mrb[12].mxu0 %vm2670_vm14, %v2910_v51  ;;  %v5838_v51 = vpack.c.bf16 %v4359_v49, %v4358_v48  ;;  %v4399_v48 = vld [vmem:[%s7439_s11 + $0x358] sm:$0xff] }
 0x534   :  { %5769 = vmatpush3.bf16.msra.mxu0 %v5766_v46  ;;  %5232 = vmatprep.mubr.msk.f32.mxu0 %vm2670_vm14, %v6948_v24  ;;  %v4332_v24 = vld [vmem:[%s7439_s11 + $0x1c0] sm:$0xff]  ;;  %v4357_v46 = vld [vmem:[%s7439_s11 + $0x248] sm:$0xff] }
 0x535   :  { %5771 = vmatprep.subr.bf16.mxu0 %v5770_v50  ;;  %v5834_v25 = vpack.c.bf16 %v4357_v46, %v4356_v45  ;;  %v4397_v45 = vld [vmem:[%s7439_s11 + $0x348] sm:$0xff] }
 0x538   :  { %5773 = vmatpush3.bf16.msra.mxu0 %v5770_v50  ;;  %v3260_v50 = vpop.permute.xlu1 %3259 }
 0x539   :  { %5775 = vmatprep.subr.bf16.mxu0 %v5774_v54 }
 0x53c   :  { %5777 = vmatpush3.bf16.msra.mxu0 %v5774_v54  ;;  %v3262_v54 = vpop.permute.xlu0 %3261  ;;  %v3264_v58 = vpop.permute.xlu1 %3263 }
 0x53d   :  { %5779 = vmatprep.subr.bf16.mxu0 %v5778_v57 }
 0x540   :  { %5781 = vmatpush3.bf16.msra.mxu0 %v5778_v57  ;;  %v5842_v57 = vpack.c.bf16 %v4361_v53, %v4360_v52  ;;  %v3494_v2 = vpop.permute.xlu0 %3493  ;;  %v3761_v53 = vld [vmem:[%s7442_s15] sm:$0xff] }
 0x541   :  { %5783 = vmatprep.subr.bf16.mxu0 %v5782_v60 }
 0x544   :  { %5785 = vmatpush3.bf16.msra.mxu0 %v5782_v60  ;;  %v4363_v60 = vld [vmem:[%s7439_s11 + $0x278] sm:$0xff] }
 0x545   :  { %5787 = vmatprep.subr.bf16.mxu0 %v5786_v62 }
 0x547   :  { %5233 = vmatmul.mubr.msk.f32.vlgmr.msra.gmra.mrb[10].mxu0 %vm2670_vm14, %v6946_v22  ;;  %v5798_v22 = vpack.c.bf16 %v4331_v9, %v4330_v20  ;;  %v4373_v20 = vld [vmem:[%s7439_s11 + $0x2a8] sm:$0xff] }
 0x548   :  { %5235 = vmatprep.mubr.msk.f32.mxu0 %vm2670_vm14, %v6956_v26  ;;  %5789 = vmatpush3.bf16.msra.mxu0 %v5786_v62  ;;  %v4333_v26 = vld [vmem:[%s7439_s11 + $0x1c8] sm:$0xff]  ;;  %v5846_v62 = vpack.c.bf16 %v4363_v60, %v4362_v59  ;;  %v3764_v59 = vld [vmem:[%s7442_s15 + $0x18] sm:$0xff] }
 0x549   :  { %5791 = vmatprep.subr.bf16.mxu0 %v5790_v16  ;;  %v5802_v12 = vpack.c.bf16 %v4333_v26, %v4332_v24  ;;  %v4376_v26 = vld [vmem:[%s7439_s11 + $0x2c0] sm:$0xff] }
 0x54b   :  { %5236 = vmatmul.mubr.msk.f32.gmra.mrb[12].mxu0 %vm2670_vm14, %v6954_v11  ;;  %v4334_v11 = vld [vmem:[%s7439_s11 + $0x1d0] sm:$0xff] }
 0x54c   :  { %5793 = vmatpush3.bf16.msra.mxu0 %v5790_v16  ;;  %5262 = vmatprep.mubr.msk.f32.mxu0 %vm2670_vm14, %v3140_v1  ;;  %v5806_v29 = vpack.c.bf16 %v4335_v15, %v4334_v11  ;;  %v5850_v16 = vpack.c.bf16 %v4365_v0, %v4364_v63  ;;  %v4374_v1 = vld [vmem:[%s7439_s11 + $0x2b0] sm:$0xff]  ;;  %v3766_v63 = vld [vmem:[%s7442_s15 + $0x28] sm:$0xff] }
 0x54d   :  { %5795 = vmatprep.subr.bf16.mxu0 %v5794_v19  ;;  %v4378_v15 = vld [vmem:[%s7439_s11 + $0x2d0] sm:$0xff] }
 0x550   :  { %5797 = vmatpush3.bf16.msra.mxu0 %v5794_v19  ;;  %v4372_v19 = vld [vmem:[%s7439_s11 + $0x2a0] sm:$0xff] }
 0x551   :  { %5799 = vmatprep.subr.bf16.mxu0 %v5798_v22  ;;  %v5858_v9 = vpack.c.bf16 %v4373_v20, %v4372_v19  ;;  %v3770_v19 = vld [vmem:[%s7442_s15 + $0x48] sm:$0xff] }
 0x554   :  { %5801 = vmatpush3.bf16.msra.mxu0 %v5798_v22  ;;  %v4375_v22 = vld [vmem:[%s7439_s11 + $0x2b8] sm:$0xff] }
 0x555   :  { %5803 = vmatprep.subr.bf16.mxu0 %v5802_v12  ;;  %v5862_v24 = vpack.c.bf16 %v4375_v22, %v4374_v1  ;;  %v3772_v1 = vld [vmem:[%s7442_s15 + $0x58] sm:$0xff] }
 0x558   :  { %5805 = vmatpush3.bf16.msra.mxu0 %v5802_v12  ;;  %v4377_v12 = vld [vmem:[%s7439_s11 + $0x2c8] sm:$0xff] }
 0x559   :  { %5807 = vmatprep.subr.bf16.mxu0 %v5806_v29  ;;  %v5866_v11 = vpack.c.bf16 %v4377_v12, %v4376_v26 }
 0x55c   :  { %5809 = vmatpush3.bf16.msra.mxu0 %v5806_v29  ;;  %v4379_v29 = vld [vmem:[%s7439_s11 + $0x2d8] sm:$0xff] }
 0x55d   :  { %5811 = vmatprep.subr.bf16.mxu0 %v5810_v14 }
 0x55f   :  { %5263 = vmatmul.mubr.msk.f32.vlgmr.msra.gmra.mrb[10].mxu0 %vm2670_vm14, %v3142_v4  ;;  %v4388_v4 = vld [vmem:[%s7439_s11 + $0x300] sm:$0xff] }
 0x560   :  { %5265 = vmatprep.mubr.msk.f32.mxu0 %vm2670_vm14, %v3144_v7  ;;  %5813 = vmatpush3.bf16.msra.mxu0 %v5810_v14  ;;  %v4389_v7 = vld [vmem:[%s7439_s11 + $0x308] sm:$0xff] }
 0x561   :  { %5815 = vmatprep.subr.bf16.mxu0 %v5814_v32 }
 0x563   :  { %5266 = vmatmul.mubr.msk.f32.gmra.mrb[12].mxu0 %vm2670_vm14, %v3146_v35  ;;  %v3498_v35 = vpop.permute.xlu0 %3497 }
 0x564   :  { %5817 = vmatpush3.bf16.msra.mxu0 %v5814_v32  ;;  %5292 = vmatprep.mubr.msk.f32.mxu0 %vm2670_vm14, %v3258_v38  ;;  %v5882_v32 = vpack.c.bf16 %v4389_v7, %v4388_v4  ;;  %v4393_v38 = vld [vmem:[%s7439_s11 + $0x328] sm:$0xff] }
 0x565   :  { %5819 = vmatprep.subr.bf16.mxu0 %v5818_v6 }
 0x567   :  { %v3612_v43 = vpop.permute.xlu0 %3611 }
 0x568   :  { %5821 = vmatpush3.bf16.msra.mxu0 %v5818_v6  ;;  %v3496_v6 = vpop.permute.xlu1 %3495 }
 0x569   :  { %5823 = vmatprep.subr.bf16.mxu0 %v5822_v39 }
 0x56c   :  { %5825 = vmatpush3.bf16.msra.mxu0 %v5822_v39  ;;  %v5890_v39 = vpack.c.bf16 %v4393_v38, %v4392_v37  ;;  %v3500_v40 = vpop.permute.xlu1 %3499 }
 0x56d   :  { %5827 = vmatprep.subr.bf16.mxu0 %v5826_v42 }
 0x570   :  { %5829 = vmatpush3.bf16.msra.mxu0 %v5826_v42  ;;  %v4395_v42 = vld [vmem:[%s7439_s11 + $0x338] sm:$0xff] }
 0x571   :  { %5831 = vmatprep.subr.bf16.mxu0 %v5830_v27  ;;  %v5894_v44 = vpack.c.bf16 %v4395_v42, %v4394_v41 }
 0x574   :  { %5833 = vmatpush3.bf16.msra.mxu0 %v5830_v27  ;;  %v4396_v27 = vld [vmem:[%s7439_s11 + $0x340] sm:$0xff] }
 0x575   :  { %5835 = vmatprep.subr.bf16.mxu0 %v5834_v25  ;;  %v5898_v46 = vpack.c.bf16 %v4397_v45, %v4396_v27 }
 0x577   :  { %5293 = vmatmul.mubr.msk.f32.vlgmr.msra.gmra.mrb[10].mxu0 %vm2670_vm14, %v3260_v50  ;;  %v3614_v50 = vpop.permute.xlu1 %3613 }
 0x578   :  { %v7165_v55 = vpop.f32.mrb[6].mxu1  ;;  %5295 = vmatprep.mubr.msk.f32.mxu0 %vm2670_vm14, %v3262_v54  ;;  %5837 = vmatpush3.bf16.msra.mxu0 %v5834_v25  ;;  %v4398_v25 = vld [vmem:[%s7439_s11 + $0x350] sm:$0xff]  ;;  %v3762_v54 = vld [vmem:[%s7442_s15 + $0x8] sm:$0xff] }
 0x579   :  { %v7168_v56 = vpop.f32.mrb[7].mxu1  ;;  %5839 = vmatprep.subr.bf16.mxu0 %v5838_v51  ;;  %v5902_v49 = vpack.c.bf16 %v4399_v48, %v4398_v25 }
 0x57b   :  { %5296 = vmatmul.mubr.msk.f32.gmra.mrb[12].mxu0 %vm2670_vm14, %v3264_v58  ;;  %v3618_v52 = vpop.permute.xlu1 %3617  ;;  %v3763_v58 = vld [vmem:[%s7442_s15 + $0x10] sm:$0xff] }
 0x57c   :  { %v7177_v17 = vpop.f32.mrb[8].mxu1  ;;  %5841 = vmatpush3.bf16.msra.mxu0 %v5838_v51  ;;  %5322 = vmatprep.mubr.msk.f32.mxu0 %vm2670_vm14, %v6968_v13  ;;  %v4367_v13 = vld [vmem:[%s7439_s11 + $0x298] sm:$0xff]  ;;  %v3616_v51 = vpop.permute.xlu0 %3615  ;;  %v7297_v60 = vpack.c.bf16 %v3764_v59, %v3763_v58 }
 0x57d   :  { %v7181_v61 = vpop.f32.mrb[9].mxu1  ;;  %5843 = vmatprep.subr.bf16.mxu0 %v5842_v57  ;;  %v5854_v18 = vpack.c.bf16 %v4367_v13, %v4366_v8  ;;  %v3768_v8 = vld [vmem:[%s7442_s15 + $0x38] sm:$0xff] }
 0x580   :  { %5845 = vmatpush3.bf16.msra.mxu0 %v5842_v57  ;;  %v7287_v57 = vpack.c.bf16 %v3762_v54, %v3761_v53 }
 0x581   :  { %5847 = vmatprep.subr.bf16.mxu0 %v5846_v62 }
 0x582   :  { %5908 = vmatpush3.bf16.msra.mxu1 %v7287_v57 }
 0x583   :  { %5909 = vmatprep.subr.bf16.mxu1 %v6068_v21 }
 0x584   :  { %5849 = vmatpush3.bf16.msra.mxu0 %v5846_v62  ;;  %v3765_v62 = vld [vmem:[%s7442_s15 + $0x20] sm:$0xff] }
 0x585   :  { %5851 = vmatprep.subr.bf16.mxu0 %v5850_v16  ;;  %v7307_v0 = vpack.c.bf16 %v3766_v63, %v3765_v62 }
 0x586   :  { %5911 = vmatpush3.bf16.msra.mxu1 %v7297_v60 }
 0x587   :  { %5912 = vmatprep.subr.bf16.mxu1 %v6068_v21 }
 0x588   :  { %5853 = vmatpush3.bf16.msra.mxu0 %v5850_v16  ;;  %v3767_v16 = vld [vmem:[%s7442_s15 + $0x30] sm:$0xff] }
 0x589   :  { %5855 = vmatprep.subr.bf16.mxu0 %v5854_v18  ;;  %v7317_v13 = vpack.c.bf16 %v3768_v8, %v3767_v16 }
 0x58a   :  { %5914 = vmatpush3.bf16.msra.mxu1 %v7307_v0 }
 0x58b   :  { %5915 = vmatprep.subr.bf16.mxu1 %v6068_v21 }
 0x58c   :  { %5857 = vmatpush3.bf16.msra.mxu0 %v5854_v18  ;;  %v3769_v18 = vld [vmem:[%s7442_s15 + $0x40] sm:$0xff] }
 0x58d   :  { %5859 = vmatprep.subr.bf16.mxu0 %v5858_v9  ;;  %v7327_v20 = vpack.c.bf16 %v3770_v19, %v3769_v18 }
 0x58e   :  { %5917 = vmatpush3.bf16.msra.mxu1 %v7317_v13 }
 0x58f   :  { %5323 = vmatmul.mubr.msk.f32.vlgmr.msra.gmra.mrb[10].mxu0 %vm2670_vm14, %v6966_v10  ;;  %v5870_v10 = vpack.c.bf16 %v4379_v29, %v4378_v15  ;;  %5918 = vmatprep.subr.bf16.mxu1 %v6068_v21 }
 0x590   :  { %5325 = vmatprep.mubr.msk.f32.mxu0 %vm2670_vm14, %v6976_v28  ;;  %5861 = vmatpush3.bf16.msra.mxu0 %v5858_v9  ;;  %v4380_v28 = vld [vmem:[%s7439_s11 + $0x2e0] sm:$0xff]  ;;  %v3771_v9 = vld [vmem:[%s7442_s15 + $0x50] sm:$0xff] }
 0x591   :  { %5863 = vmatprep.subr.bf16.mxu0 %v5862_v24  ;;  %v5874_v14 = vpack.c.bf16 %v4381_v5, %v4380_v28  ;;  %v7337_v22 = vpack.c.bf16 %v3772_v1, %v3771_v9 }
 0x592   :  { %5920 = vmatpush3.bf16.msra.mxu1 %v7327_v20 }
 0x593   :  { %5326 = vmatmul.mubr.msk.f32.gmra.mrb[12].mxu0 %vm2670_vm14, %v6974_v3  ;;  %v4382_v3 = vld [vmem:[%s7439_s11 + $0x2f0] sm:$0xff]  ;;  %5921 = vmatprep.subr.bf16.mxu1 %v6068_v21 }
 0x594   :  { %5865 = vmatpush3.bf16.msra.mxu0 %v5862_v24  ;;  %5352 = vmatprep.mubr.msk.f32.mxu0 %vm2670_vm14, %v3494_v2  ;;  %v5878_v31 = vpack.c.bf16 %v4383_v30, %v4382_v3  ;;  %v4271_v24 = vld [vmem:[%s7443_s12] ss:$0 sm:$0xff] }
 0x595   :  { %5867 = vmatprep.subr.bf16.mxu0 %v5866_v11  ;;  %v2769_v26 = vadd.f32 %v7165_v55, %v4271_v24  ;;  %v2768_v12 = vadd.f32 %v4271_v24, %v7168_v56  ;;  %v2770_v5 = vadd.f32 %v4271_v24, %v7181_v61 }
 0x596   :  { %5923 = vmatpush3.bf16.msra.mxu1 %v7337_v22 }
 0x597   :  { %5924 = vmatprep.subr.bf16.mxu1 %v6068_v21 }
 0x598   :  { %5869 = vmatpush3.bf16.msra.mxu0 %v5866_v11 }
 0x599   :  { %5871 = vmatprep.subr.bf16.mxu0 %v5870_v10 }
 0x59c   :  { %5873 = vmatpush3.bf16.msra.mxu0 %v5870_v10  ;;  %v2771_v10 = vadd.f32 %v7177_v17, %v4271_v24 }
 0x59d   :  { %5875 = vmatprep.subr.bf16.mxu0 %v5874_v14 }
 0x5a0   :  { %5877 = vmatpush3.bf16.msra.mxu0 %v5874_v14 }
 0x5a1   :  { %5879 = vmatprep.subr.bf16.mxu0 %v5878_v31 }
 0x5a4   :  { %5881 = vmatpush3.bf16.msra.mxu0 %v5878_v31 }
 0x5a5   :  { %5883 = vmatprep.subr.bf16.mxu0 %v5882_v32 }
 0x5a7   :  { %5353 = vmatmul.mubr.msk.f32.vlgmr.msra.gmra.mrb[10].mxu0 %vm2670_vm14, %v3496_v6 }
 0x5a8   :  { %5355 = vmatprep.mubr.msk.f32.mxu0 %vm2670_vm14, %v3498_v35  ;;  %5885 = vmatpush3.bf16.msra.mxu0 %v5882_v32 }
 0x5a9   :  { %5887 = vmatprep.subr.bf16.mxu0 %v5886_v36 }
 0x5ab   :  { %5356 = vmatmul.mubr.msk.f32.gmra.mrb[12].mxu0 %vm2670_vm14, %v3500_v40 }
 0x5ac   :  { %5889 = vmatpush3.bf16.msra.mxu0 %v5886_v36  ;;  %5382 = vmatprep.mubr.msk.f32.mxu0 %vm2670_vm14, %v3612_v43 }
 0x5ad   :  { %5891 = vmatprep.subr.bf16.mxu0 %v5890_v39 }
 0x5b0   :  { %5893 = vmatpush3.bf16.msra.mxu0 %v5890_v39 }
 0x5b1   :  { %5895 = vmatprep.subr.bf16.mxu0 %v5894_v44 }
 0x5b4   :  { %5897 = vmatpush3.bf16.msra.mxu0 %v5894_v44 }
 0x5b5   :  { %5899 = vmatprep.subr.bf16.mxu0 %v5898_v46 }
 0x5b8   :  { %5901 = vmatpush3.bf16.msra.mxu0 %v5898_v46 }
 0x5b9   :  { %5903 = vmatprep.subr.bf16.mxu0 %v5902_v49 }
 0x5bc   :  { %5905 = vmatpush3.bf16.msra.mxu0 %v5902_v49 }
 0x5bf   :  { %5383 = vmatmul.mubr.msk.f32.vlgmr.msra.gmra.mrb[10].mxu0 %vm2670_vm14, %v3614_v50 }
 0x5c0   :  { %5385 = vmatprep.mubr.msk.f32.mxu0 %vm2670_vm14, %v3616_v51 }
 0x5c3   :  { %5386 = vmatmul.mubr.msk.f32.gmra.mrb[12].mxu0 %vm2670_vm14, %v3618_v52 }
 0x692   :  { %v5384_v11 = vpop.f32.mrb[10].mxu0 }
 0x693   :  { %v7346_v15 = vadd.f32 %v5384_v11, %v2769_v26  ;;  %v3693_v29 = vpop.f32.mrb[11].mxu0 }
 0x694   :  { %v7348_v2 = vadd.f32 %v3693_v29, %v2768_v12  ;;  %v3927_v29 = vld [vmem:[%s7445_s13] sm:$0x1] }
 0x695   :  { %v3718_v28 = vsel %vm3717_vm15, %v7346_v15, 0.0  ;;  %v3728_v38 = vmul.f32 %v7346_v15, %v7346_v15 }
 0x696   :  { %v3716_v14 = vsel %vm2670_vm14, %v7348_v2, 0.0  ;;  %v5387_v55 = vpop.f32.mrb[12].mxu0  ;;  %v3727_v39 = vmul.f32 %v7348_v2, %v7348_v2 }
 0x697   :  { %v3719_v3 = vadd.f32 %v3718_v28, %v3716_v14  ;;  %v7356_v56 = vadd.f32 %v5387_v55, %v2771_v10  ;;  %v3703_v30 = vpop.f32.mrb[13].mxu0  ;;  %v3730_v27 = vsel %vm3717_vm15, %v3728_v38, 0.0 }
 0x698   :  { %v7358_v31 = vadd.f32 %v3703_v30, %v2770_v5  ;;  %v3729_v45 = vsel %vm2670_vm14, %v3727_v39, 0.0  ;;  %v3929_v5 = vld [vmem:[%s7446_s14] sm:$0x1] }
 0x699   :  { %v3720_v4 = vrot.slane %v3719_v3, 4  ;;  %v3740_v7 = vsel %vm3717_vm15, %v7356_v56, 0.0  ;;  %v3750_v6 = vmul.f32 %v7356_v56, %v7356_v56  ;;  %v3731_v49 = vadd.f32 %v3730_v27, %v3729_v45 }
 0x69a   :  { %v3739_v17 = vsel %vm2670_vm14, %v7358_v31, 0.0  ;;  %v3749_v35 = vmul.f32 %v7358_v31, %v7358_v31 }
 0x69b   :  { %v3721_v32 = vadd.f32 %v3720_v4, %v3719_v3  ;;  %v3741_v33 = vadd.f32 %v3740_v7, %v3739_v17  ;;  %v3752_v41 = vsel %vm3717_vm15, %v3750_v6, 0.0  ;;  %v3732_v53 = vrot.slane %v3731_v49, 4 }
 0x69c   :  { %v3751_v42 = vsel %vm2670_vm14, %v3749_v35, 0.0 }
 0x69d   :  { %v3722_v61 = vrot.slane %v3721_v32, 2  ;;  %v3742_v34 = vrot.slane %v3741_v33, 4  ;;  %v3753_v25 = vadd.f32 %v3752_v41, %v3751_v42  ;;  %v3733_v58 = vadd.f32 %v3732_v53, %v3731_v49 }
 0x69f   :  { %v3723_v36 = vadd.f32 %v3722_v61, %v3721_v32  ;;  %v3743_v37 = vadd.f32 %v3742_v34, %v3741_v33  ;;  %v3754_v52 = vrot.slane %v3753_v25, 4  ;;  %v3734_v62 = vrot.slane %v3733_v58, 2 }
 0x6a1   :  { %v3744_v40 = vrot.slane %v3743_v37, 2  ;;  %v3724_v43 = vrot.slane %v3723_v36, 1  ;;  %v3755_v54 = vadd.f32 %v3754_v52, %v3753_v25  ;;  %v3735_v16 = vadd.f32 %v3734_v62, %v3733_v58 }
 0x6a3   :  { %v3745_v44 = vadd.f32 %v3744_v40, %v3743_v37  ;;  %v3725_v48 = vadd.f32 %v3724_v43, %v3723_v36  ;;  %v3756_v59 = vrot.slane %v3755_v54, 2  ;;  %v3736_v8 = vrot.slane %v3735_v16, 1 }
 0x6a5   :  { %v3746_v46 = vrot.slane %v3745_v44, 1  ;;  %v3757_v63 = vadd.f32 %v3756_v59, %v3755_v54  ;;  %v3737_v18 = vadd.f32 %v3736_v8, %v3735_v16 }
 0x6a7   :  { %v3747_v50 = vadd.f32 %v3746_v46, %v3745_v44 }
 0x6a9   :  { %v3748_v51 = vadd.f32 %v3747_v50, %v3725_v48 }
 0x6ab   :  { %5413 = vmatmul.mubr.msk.f32.vlgmr.msra.gmra.mrb[10].mxu1 %vm2670_vm14, %v3748_v51 }
 0x6ac   :  { %5926 = vmatpush3.bf16.msra.mxu1 %v7287_v57  ;;  %5439 = vmatprep.mubr.msk.f32.mxu1 %vm6069_vm9, %v6064_v23  ;;  %v3758_v57 = vrot.slane %v3757_v63, 1 }
 0x6ad   :  { %5927 = vmatprep.subr.bf16.mxu1 %v6068_v21 }
 0x6b0   :  { %5929 = vmatpush3.bf16.msra.mxu1 %v7297_v60  ;;  %v3759_v60 = vadd.f32 %v3758_v57, %v3757_v63 }
 0x6b1   :  { %5930 = vmatprep.subr.bf16.mxu1 %v6068_v21 }
 0x6b2   :  { %v3760_v19 = vadd.f32 %v3759_v60, %v3737_v18 }
 0x6b4   :  { %5932 = vmatpush3.bf16.msra.mxu1 %v7307_v0  ;;  %v3932_v0 = vld [vmem:[%s7444_s16] sm:$0xff] }
 0x6b5   :  { %5933 = vmatprep.subr.bf16.mxu1 %v6068_v21 }
 0x6b8   :  { %5935 = vmatpush3.bf16.msra.mxu1 %v7317_v13 }
 0x6b9   :  { %5936 = vmatprep.subr.bf16.mxu1 %v6068_v21 }
 0x6bc   :  { %5938 = vmatpush3.bf16.msra.mxu1 %v7327_v20 }
 0x6bd   :  { %5939 = vmatprep.subr.bf16.mxu1 %v6068_v21 }
 0x6c0   :  { %5941 = vmatpush3.bf16.msra.mxu1 %v7337_v22 }
 0x6c1   :  { %5442 = vmatprep.subr.mxu1 %v6064_v23 }
 0x6c3   :  { %5440 = vmatmul.mubr.msk.f32.vlgmr.msra.gmra.mrb[12].mxu1 %vm2670_vm14, %v3760_v19 }
 0x6c4   :  { %5444 = vmatprep.mubr.msk.f32.mxu1 %vm6069_vm9, %v6064_v23  ;;  %5443 = vmatpush3.msra.mxu1 %v3932_v0 }
 0x6c5   :  { %5447 = vmatprep.subr.mxu1 %v6064_v23 }
 0x77e   :  { %v3842_v21 = vpop.f32.mrb[10].mxu1 }
 0x77f   :  { %v5414_v13 = vpop.f32.mrb[11].mxu1  ;;  %v3847_v20 = vmul.f32 0.0034722222, %v3842_v21 }
 0x781   :  { %v3922_v1 = vmul.f32 %v3847_v20, %v3847_v20 }
 0x796   :  { %v3917_v9 = vpop.f32.mrb[12].mxu1 }
 0x797   :  { %v3921_v22 = vmul.f32 0.0034722222, %v3917_v9  ;;  %v5441_v24 = vpop.f32.mrb[13].mxu1 }
 0x799   :  { %v3923_v26 = vsub.f32 %v3921_v22, %v3922_v1 }
 0x79b   :  { %v3924_v12 = vmax.f32 %v3923_v26, 0.0 }
 0x79d   :  { %v3925_v11 = vadd.f32 1e-05, %v3924_v12 }
 0x79f   :  { %6061 = vrsqrt.f32 %v3925_v11 }
 0x7a9   :  { %v6062_v10 = vpop.eup %6061 }
 0x7aa   :  { %v3928_v28 = vmul.f32 %v6062_v10, %v3927_v29 }
 0x7ac   :  { %5445 = vmatmul.mubr.msk.f32.vlgmr.msra.gmra.mrb[14].mxu1 %vm2473_vm12, %v3928_v28  ;;  %v3930_v14 = vmul.f32 %v3928_v28, %v3847_v20 }
 0x7ad   :  { %5448 = vmatpush3.msra.mxu1 %v3932_v0  ;;  %5449 = vmatprep.mubr.msk.f32.mxu1 %vm6069_vm9, %v6064_v23 }
 0x7ae   :  { %v3931_v55 = vsub.f32 %v3929_v5, %v3930_v14 }
 0x7b0   :  { %5450 = vmatmul.mubr.msk.f32.vlgmr.msra.gmra.mrb[16].mxu1 %vm2473_vm12, %v3931_v55 }
 0x87f   :  { %v4002_v3 = vpop.f32.mrb[14].mxu1 }
 0x880   :  { %v4082_v30 = vrot.slane %v4002_v3, %v6915_v47  ;;  %v5446_v4 = vpop.f32.mrb[15].mxu1 }
 0x882   :  { %v4083_v7 = vmul.f32 %v7348_v2, %v4082_v30  ;;  %v4084_v32 = vmul.f32 %v7346_v15, %v4082_v30  ;;  %v4085_v33 = vmul.f32 %v7358_v31, %v4082_v30  ;;  %v4086_v61 = vmul.f32 %v7356_v56, %v4082_v30 }
 0x883   :  { %v4075_v17 = vpop.f32.mrb[16].mxu1 }
 0x884   :  { %v4090_v34 = vrot.slane %v4075_v17, %v6915_v47  ;;  %v5451_v6 = vpop.f32.mrb[17].mxu1 }
 0x886   :  { %v4091_v23 = vadd.f32 %v4090_v34, %v4083_v7  ;;  %v4092_v35 = vadd.f32 %v4090_v34, %v4084_v32  ;;  %v4093_v36 = vadd.f32 %v4090_v34, %v4085_v33  ;;  %v4094_v37 = vadd.f32 %v4090_v34, %v4086_v61 }
 0x888   :  { %v4095_v38 = vmax.f32 %v4091_v23, 0.0  ;;  %v4096_v39 = vmax.f32 %v4092_v35, 0.0  ;;  %v4097_v40 = vmax.f32 %v4093_v36, 0.0  ;;  %v4098_v41 = vmax.f32 %v4094_v37, 0.0 }
 0x88a   :  { %4099 = vst.msk [vmem:[%s7447_s17] sm:$0xff] %vm2670_vm14, %v4095_v38  ;;  %4101 = vst.msk [vmem:[%s7447_s17 + $0xc] sm:$0xff] %vm2670_vm14, %v4097_v40 }
 0x88b   :  { %4100 = vst.msk [vmem:[%s7447_s17 + $0x8] sm:$0xf] %vm3717_vm15, %v4096_v39  ;;  %4102 = vst.msk [vmem:[%s7447_s17 + $0x14] sm:$0xf] %vm3717_vm15, %v4098_v41 }

</bundles_post_ra>
